<compile_context>
chip_gen: v7x
topology: tpu7x:2x2x1
jax: 0.10.0
libtpu: 0.0.40
codegen_flags: <defaults>
</compile_context>

<pallas_src>
import functools

import jax
import jax.numpy as jnp
from jax import lax
from jax.experimental import pallas as pl
from jax.experimental.pallas import tpu as pltpu

EPS = 1e-5


# ----------------------------- Pallas kernels -------------------------------

def _unit_s1_kernel(x_ref, w1_ref, b1_ref, w3_ref, b3_ref, w2_ref, b2_ref,
                    o_ref, pad_ref):
    """Fused stride=1 bottleneck: pw1x1+BN+ReLU6 -> grouped 3x3+BN -> pw1x1+BN+ReLU6.

    x_ref:   (1, H, W, Ch)   bf16   (first half of the channel split)
    w1/w2:   (Ch, Ch)/(Mid, Mid) bf16, w3: (9*Ch, Mid) bf16 (block-diag taps)
    biases:  (1, C) f32
    o_ref:   (1, H, W, Mid)  f32
    pad_ref: VMEM (H+2, W+2, Ch) bf16 scratch (zero-padded pw1 output).
    """
    _, H, W, Ch = x_ref.shape
    Mid = w3_ref.shape[1]
    hw = H * W

    # ---- 1x1 conv + BN + ReLU6: single [HW,Ch]@[Ch,Ch] MXU matmul ----
    x = x_ref[0].reshape(hw, Ch)                                  # bf16
    y = jnp.dot(x, w1_ref[...], preferred_element_type=jnp.float32)
    y = jnp.clip(y + b1_ref[...], 0.0, 6.0)

    # ---- zero-pad the intermediate in VMEM (no HBM im2col round trip) ----
    pad_ref[...] = jnp.zeros(pad_ref.shape, pad_ref.dtype)
    pad_ref[1:H + 1, 1:W + 1, :] = y.reshape(H, W, Ch).astype(pad_ref.dtype)

    # ---- grouped 3x3 + BN: 9 shifted taps -> one K=9*Ch matmul ----
    taps = [pad_ref[dy:dy + H, dx:dx + W, :].reshape(hw, Ch)
            for dy in range(3) for dx in range(3)]
    t = jnp.concatenate(taps, axis=-1)                            # (hw, 9*Ch)
    z = jnp.dot(t, w3_ref[...], preferred_element_type=jnp.float32) + b3_ref[...]

    # ---- 1x1 conv + BN + ReLU6 ----
    z = z.astype(jnp.bfloat16)
    o = jnp.dot(z, w2_ref[...], preferred_element_type=jnp.float32)
    o = jnp.clip(o + b2_ref[...], 0.0, 6.0)
    o_ref[0] = o.reshape(H, W, Mid).astype(o_ref.dtype)


def _unit_s2_kernel(xs_ref, w1_ref, b1_ref, w3_ref, b3_ref, w2_ref, b2_ref,
                    ws3_ref, bs3_ref, ws1_ref, bs1_ref,
                    o1_ref, o2_ref, pad_ref):
    """Fused stride=2 unit: bottleneck AND shortcut branch in one kernel.

    xs_ref:  (1, 4, H/2+1, W/2+1, Cin) bf16 - the 4 parity sub-images of the
             input, each zero-padded by one row/col at the top/left.
             Tap (dy,dx) of a stride-2 3x3 conv reads sub-image (r(dy), s(dx))
             at a unit-stride offset in {0,1}  =>  only static contiguous slices.
    o1_ref:  (1, H/2, W/2, Mid)  bottleneck output (x1)
    o2_ref:  (1, H/2, W/2, Cin)  shortcut output   (x2)
    pad_ref: VMEM (4, H/2+1, W/2+1, Cin) bf16 scratch for the padded pw1 output.
    """
    _, _, Hp, Wp, Cin = xs_ref.shape
    H2, W2 = Hp - 1, Wp - 1
    Mid = w3_ref.shape[1]
    hw = H2 * W2

    RO = ((1, 0), (0, 1), (1, 1))       # dy/dx -> (parity, slice offset)

    def gather_taps(read, c):
        pieces = []
        for dy in range(3):
            r, oy = RO[dy]
            for dx in range(3):
                s, ox = RO[dx]
                pieces.append(read(2 * r + s, oy, ox).reshape(hw, c))
        return jnp.concatenate(pieces, axis=-1)                   # (hw, 9*c)

    # -------- shortcut: grouped 3x3/s2 + BN  ->  1x1 + BN + ReLU6 --------
    ts = gather_taps(
        lambda k, oy, ox: xs_ref[0, k, oy:oy + H2, ox:ox + W2, :], Cin)
    zs = jnp.dot(ts, ws3_ref[...], preferred_element_type=jnp.float32) + bs3_ref[...]
    zs = zs.astype(jnp.bfloat16)
    ys = jnp.dot(zs, ws1_ref[...], preferred_element_type=jnp.float32)
    ys = jnp.clip(ys + bs1_ref[...], 0.0, 6.0)
    o2_ref[0] = ys.reshape(H2, W2, Cin).astype(o2_ref.dtype)

    # -------- bottleneck: 1x1+BN+ReLU6 -> grouped 3x3/s2+BN -> 1x1+BN+ReLU6 ----
    # pw1 is pixelwise, so apply it to all 4 (unpadded) sub-image interiors at once.
    xin = xs_ref[0, :, 1:, 1:, :].reshape(4 * hw, Cin)            # bf16
    y = jnp.dot(xin, w1_ref[...], preferred_element_type=jnp.float32)
    y = jnp.clip(y + b1_ref[...], 0.0, 6.0)
    pad_ref[...] = jnp.zeros(pad_ref.shape, pad_ref.dtype)
    pad_ref[:, 1:, 1:, :] = y.reshape(4, H2, W2, Cin).astype(pad_ref.dtype)

    tb = gather_taps(
        lambda k, oy, ox: pad_ref[k, oy:oy + H2, ox:ox + W2, :], Cin)
    zb = jnp.dot(tb, w3_ref[...], preferred_element_type=jnp.float32) + b3_ref[...]
    zb = zb.astype(jnp.bfloat16)
    yb = jnp.dot(zb, w2_ref[...], preferred_element_type=jnp.float32)
    yb = jnp.clip(yb + b2_ref[...], 0.0, 6.0)
    o1_ref[0] = yb.reshape(H2, W2, Mid).astype(o1_ref.dtype)


# ----------------------------- Pallas wrappers -------------------------------

def _unit_s1_call(x1_bf16, params):
    n, h, w, ch = x1_bf16.shape
    w1, b1, _ = params["pw1"]
    w3, b3, _ = params["dw3"]
    w2, b2, _ = params["pw2"]
    mid = w3.shape[1]
    return pl.pallas_call(
        _unit_s1_kernel,
        out_shape=jax.ShapeDtypeStruct((n, h, w, mid), jnp.float32),
        grid=(n,),
        in_specs=[
            pl.BlockSpec((1, h, w, ch), lambda i: (i, 0, 0, 0)),
            pl.BlockSpec((ch, ch), lambda i: (0, 0)),
            pl.BlockSpec((1, ch), lambda i: (0, 0)),
            pl.BlockSpec((9 * ch, mid), lambda i: (0, 0)),
            pl.BlockSpec((1, mid), lambda i: (0, 0)),
            pl.BlockSpec((mid, mid), lambda i: (0, 0)),
            pl.BlockSpec((1, mid), lambda i: (0, 0)),
        ],
        out_specs=pl.BlockSpec((1, h, w, mid), lambda i: (i, 0, 0, 0)),
        scratch_shapes=[pltpu.VMEM((h + 2, w + 2, ch), jnp.bfloat16)],
        compiler_params=pltpu.CompilerParams(dimension_semantics=("parallel",)),
    )(x1_bf16, w1, b1.reshape(1, ch), w3, b3.reshape(1, mid),
      w2, b2.reshape(1, mid))


def _unit_s2_call(xs_bf16, params):
    n, _, hp, wp, cin = xs_bf16.shape
    h2, w2s = hp - 1, wp - 1
    w1, b1, _ = params["pw1"]
    w3, b3, _ = params["dw3"]
    w2, b2, _ = params["pw2"]
    ws3, bs3, _ = params["s_dw3"]
    ws1, bs1, _ = params["s_pw1"]
    mid = w3.shape[1]
    return pl.pallas_call(
        _unit_s2_kernel,
        out_shape=(jax.ShapeDtypeStruct((n, h2, w2s, mid), jnp.float32),
                   jax.ShapeDtypeStruct((n, h2, w2s, cin), jnp.float32)),
        grid=(n,),
        in_specs=[
            pl.BlockSpec((1, 4, hp, wp, cin), lambda i: (i, 0, 0, 0, 0)),
            pl.BlockSpec((cin, cin), lambda i: (0, 0)),
            pl.BlockSpec((1, cin), lambda i: (0, 0)),
            pl.BlockSpec((9 * cin, mid), lambda i: (0, 0)),
            pl.BlockSpec((1, mid), lambda i: (0, 0)),
            pl.BlockSpec((mid, mid), lambda i: (0, 0)),
            pl.BlockSpec((1, mid), lambda i: (0, 0)),
            pl.BlockSpec((9 * cin, cin), lambda i: (0, 0)),
            pl.BlockSpec((1, cin), lambda i: (0, 0)),
            pl.BlockSpec((cin, cin), lambda i: (0, 0)),
            pl.BlockSpec((1, cin), lambda i: (0, 0)),
        ],
        out_specs=(pl.BlockSpec((1, h2, w2s, mid), lambda i: (i, 0, 0, 0)),
                   pl.BlockSpec((1, h2, w2s, cin), lambda i: (i, 0, 0, 0))),
        scratch_shapes=[pltpu.VMEM((4, hp, wp, cin), jnp.bfloat16)],
        compiler_params=pltpu.CompilerParams(dimension_semantics=("parallel",)),
    )(xs_bf16, w1, b1.reshape(1, cin), w3, b3.reshape(1, mid),
      w2, b2.reshape(1, mid), ws3, bs3.reshape(1, cin), ws1, bs1.reshape(1, cin))


@functools.partial(jax.jit, static_argnames=("stride", "groups"))
def shufflenet_unit_pallas(x_nchw, params, stride, groups):
    x = jnp.transpose(x_nchw, (0, 2, 3, 1)).astype(jnp.float32)   # NCHW -> NHWC
    n, h, w, c = x.shape
    if stride > 1:
        assert h % 2 == 0 and w % 2 == 0
        # parity (space-to-depth) sub-images, zero-padded 1 px at top/left
        subs = jnp.stack([x[:, r::2, s::2, :] for r in range(2) for s in range(2)],
                         axis=1)                                   # (N,4,H/2,W/2,C)
        subs = jnp.pad(subs, ((0, 0), (0, 0), (1, 0), (1, 0), (0, 0)))
        x1, x2 = _unit_s2_call(subs.astype(jnp.bfloat16), params)
    else:
        ch = c // 2
        x1 = _unit_s1_call(x[..., :ch].astype(jnp.bfloat16), params)
        x2 = x[..., ch:]                                           # HalfSplit (glue)

    out = jnp.concatenate([x1, x2], axis=-1)
    # channel shuffle (glue; fuses with the final NHWC->NCHW transpose)
    nb, hh, ww, cc = out.shape
    out = out.reshape(nb, hh, ww, groups, cc // groups)
    out = jnp.transpose(out, (0, 1, 2, 4, 3)).reshape(nb, hh, ww, cc)
    return jnp.transpose(out, (0, 3, 1, 2))                        # back to NCHW


# ------------------------- parameter construction ---------------------------

def _bn_fold(gamma, beta, mean, var):
    scale = gamma / jnp.sqrt(var + EPS)
    return scale, beta - mean * scale


def _bn_params(keys, c):
    gamma = 1.0 + 0.1 * jax.random.normal(keys[0], (c,), jnp.float32)
    beta = 0.1 * jax.random.normal(keys[1], (c,), jnp.float32)
    mean = 0.1 * jax.random.normal(keys[2], (c,), jnp.float32)
    var = jnp.abs(1.0 + 0.1 * jax.random.normal(keys[3], (c,), jnp.float32))
    return _bn_fold(gamma, beta, mean, var)


def make_pw(key, cin, cout):
    """Conv1x1 (bias) + BN folded.  Returns (w[Cin,Cout] bf16, b[Cout] f32, OIHW f32)."""
    ks = jax.random.split(key, 6)
    w = 0.2 * jax.random.normal(ks[0], (cin, cout), jnp.float32)
    b = 0.1 * jax.random.normal(ks[1], (cout,), jnp.float32)
    scale, shift = _bn_params(ks[2:6], cout)
    w_q = (w * scale[None, :]).astype(jnp.bfloat16)        # bf16 effective weights
    b_f = b * scale + shift
    w_oihw = jnp.transpose(w_q.astype(jnp.float32), (1, 0))[:, :, None, None]
    return w_q, b_f, w_oihw


def make_3x3(key, cin, cout, groups):
    """Grouped Conv3x3 (bias) + BN folded.
    Returns (w[9*Cin,Cout] bf16 block-diag taps, b[Cout] f32, OIHW f32)."""
    cin_g, cout_g = cin // groups, cout // groups
    ks = jax.random.split(key, 6)
    w = 0.2 * jax.random.normal(ks[0], (3, 3, groups, cin_g, cout_g), jnp.float32)
    b = 0.1 * jax.random.normal(ks[1], (cout,), jnp.float32)
    scale, shift = _bn_params(ks[2:6], cout)
    w_f = w * scale.reshape(groups, cout_g)[None, None, :, None, :]
    w_q = w_f.astype(jnp.bfloat16)                         # shared bf16 rounding
    w_bd = jnp.zeros((3, 3, cin, cout), jnp.bfloat16)      # block-diag over groups
    for g in range(groups):
        w_bd = w_bd.at[:, :, g * cin_g:(g + 1) * cin_g,
                       g * cout_g:(g + 1) * cout_g].set(w_q[:, :, g])
    w_kernel = w_bd.reshape(9 * cin, cout)                 # tap-major K layout
    b_f = b * scale + shift
    w_oihw = jnp.transpose(w_q.astype(jnp.float32),
                           (2, 4, 3, 0, 1)).reshape(cout, cin_g, 3, 3)
    return w_kernel, b_f, w_oihw


def make_unit_params(key, in_channels, out_channels, stride, groups):
    if stride > 1:
        mid, cin = out_channels - in_channels, in_channels
    else:
        mid = out_channels // 2
        cin = mid
    k = jax.random.split(key, 5)
    params = {
        "pw1": make_pw(k[0], cin, cin),
        "dw3": make_3x3(k[1], cin, mid, groups),
        "pw2": make_pw(k[2], mid, mid),
    }
    if stride > 1:
        params["s_dw3"] = make_3x3(k[3], in_channels, in_channels, groups)
        params["s_pw1"] = make_pw(k[4], in_channels, in_channels)
    return params


# --------------------------- pure-JAX reference ------------------------------

def _ref_conv(x, w_oihw, b, stride, groups, pad):
    y = lax.conv_general_dilated(
        x, w_oihw, (stride, stride), [(pad, pad), (pad, pad)],
        feature_group_count=groups,
        dimension_numbers=("NCHW", "OIHW", "NCHW"))
    return y + b[None, :, None, None]


def shufflenet_unit_ref(x, params, stride, groups):
    def bottleneck(xin):
        p1, p3, p2 = params["pw1"], params["dw3"], params["pw2"]
        y = jnp.clip(_ref_conv(xin, p1[2], p1[1], 1, 1, 0), 0.0, 6.0)
        y = _ref_conv(y, p3[2], p3[1], stride, groups, 1)
        y = jnp.clip(_ref_conv(y, p2[2], p2[1], 1, 1, 0), 0.0, 6.0)
        return y

    if stride > 1:
        x1 = bottleneck(x)
        s3, s1 = params["s_dw3"], params["s_pw1"]
        x2 = _ref_conv(x, s3[2], s3[1], stride, groups, 1)
        x2 = jnp.clip(_ref_conv(x2, s1[2], s1[1], 1, 1, 0), 0.0, 6.0)
    else:
        c = x.shape[1]
        x1, x2 = x[:, :c // 2], x[:, c // 2:]
        x1 = bottleneck(x1)
    out = jnp.concatenate([x1, x2], axis=1)
    n, c, h, w = out.shape
    out = out.reshape(n, groups, c // groups, h, w)
    out = jnp.transpose(out, (0, 2, 1, 3, 4)).reshape(n, c, h, w)
    return out


# ----------------------------------- main ------------------------------------

if __name__ == "__main__":
    key = jax.random.PRNGKey(0)
    kx, kp1, kp2 = jax.random.split(key, 3)

    N, C, H, W = 2, 16, 16, 16
    groups = 2
    x = jax.random.normal(kx, (N, C, H, W), jnp.float32)
    # quantize the input once so kernel and reference see identical bf16 values
    xq = x.astype(jnp.bfloat16).astype(jnp.float32)

    # bf16 activations inside the kernel => compare at bf16-level tolerance.
    TOL = dict(rtol=5e-2, atol=5e-2)

    # Case 1: stride=1 unit (split / shuffle path), in == out channels.
    params1 = make_unit_params(kp1, C, C, stride=1, groups=groups)
    out1 = jax.block_until_ready(
        shufflenet_unit_pallas(xq, params1, stride=1, groups=groups))
    ref1 = shufflenet_unit_ref(xq, params1, 1, groups)
    assert out1.shape == (N, C, H, W)
    assert jnp.allclose(out1, ref1, **TOL), (
        f"stride=1 mismatch, max|err|={float(jnp.max(jnp.abs(out1 - ref1)))}")

    # Case 2: stride=2 unit (downsample path with shortcut branch).
    out_ch = 32
    params2 = make_unit_params(kp2, C, out_ch, stride=2, groups=groups)
    out2 = jax.block_until_ready(
        shufflenet_unit_pallas(xq, params2, stride=2, groups=groups))
    ref2 = shufflenet_unit_ref(xq, params2, 2, groups)
    assert out2.shape == (N, out_ch, H // 2, W // 2)
    assert jnp.allclose(out2, ref2, **TOL), (
        f"stride=2 mismatch, max|err|={float(jnp.max(jnp.abs(out2 - ref2)))}")

    print("KERNEL_OK")
</pallas_src>

<mosaic_0001>
module attributes {stable_mosaic.version = 11 : i64} {
  func.func @_unit_s1_kernel(%arg0: i32, %arg1: memref<1x16x16x8xbf16, #tpu.memory_space<vmem>>, %arg2: memref<8x8xbf16, #tpu.memory_space<vmem>>, %arg3: memref<1x8xf32, #tpu.memory_space<vmem>>, %arg4: memref<72x8xbf16, #tpu.memory_space<vmem>>, %arg5: memref<1x8xf32, #tpu.memory_space<vmem>>, %arg6: memref<8x8xbf16, #tpu.memory_space<vmem>>, %arg7: memref<1x8xf32, #tpu.memory_space<vmem>>, %arg8: memref<1x16x16x8xf32, #tpu.memory_space<vmem>>, %arg9: memref<18x18x8xbf16, #tpu.memory_space<vmem>>) attributes {dimension_semantics = [#tpu.dimension_semantics<parallel>], iteration_bounds = array<i64: 2>, scalar_prefetch = 0 : i64, scratch_operands = 1 : i64, tpu.core_type = #tpu.core_type<tc>, window_params = [{transform_indices = @transform_0, window_bounds = array<i64: 1, 16, 16, 8>}, {pipeline_mode = #tpu.pipeline_mode<synchronous>, transform_indices = @transform_1, window_bounds = array<i64: 8, 8>}, {pipeline_mode = #tpu.pipeline_mode<synchronous>, transform_indices = @transform_2, window_bounds = array<i64: 1, 8>}, {pipeline_mode = #tpu.pipeline_mode<synchronous>, transform_indices = @transform_3, window_bounds = array<i64: 72, 8>}, {pipeline_mode = #tpu.pipeline_mode<synchronous>, transform_indices = @transform_4, window_bounds = array<i64: 1, 8>}, {pipeline_mode = #tpu.pipeline_mode<synchronous>, transform_indices = @transform_5, window_bounds = array<i64: 8, 8>}, {pipeline_mode = #tpu.pipeline_mode<synchronous>, transform_indices = @transform_6, window_bounds = array<i64: 1, 8>}, {transform_indices = @transform_7, window_bounds = array<i64: 1, 16, 16, 8>}]} {
    %c0 = arith.constant 0 : index
    %c0_0 = arith.constant 0 : index
    %c0_1 = arith.constant 0 : index
    %c0_2 = arith.constant 0 : index
    %0 = vector.load %arg1[%c0, %c0_0, %c0_1, %c0_2] : memref<1x16x16x8xbf16, #tpu.memory_space<vmem>>, vector<1x16x16x8xbf16>
    %1 = vector.shape_cast %0 : vector<1x16x16x8xbf16> to vector<16x16x8xbf16>
    %2 = vector.shape_cast %1 : vector<16x16x8xbf16> to vector<256x8xbf16>
    %c0_3 = arith.constant 0 : index
    %c0_4 = arith.constant 0 : index
    %3 = vector.load %arg2[%c0_3, %c0_4] : memref<8x8xbf16, #tpu.memory_space<vmem>>, vector<8x8xbf16>
    %cst = arith.constant dense<0.000000e+00> : vector<256x8xf32>
    %4 = tpu.matmul %2, %3, %cst {dimension_numbers = #tpu.dot_dimension_numbers<[1], [0], [0], [1], [0, 0, 1, 1], [], []>} : vector<256x8xbf16>, vector<8x8xbf16>, vector<256x8xf32> -> vector<256x8xf32>
    %c0_5 = arith.constant 0 : index
    %c0_6 = arith.constant 0 : index
    %5 = vector.load %arg3[%c0_5, %c0_6] : memref<1x8xf32, #tpu.memory_space<vmem>>, vector<1x8xf32>
    %6 = vector.broadcast %5 : vector<1x8xf32> to vector<256x8xf32>
    %7 = arith.addf %4, %6 : vector<256x8xf32>
    %cst_7 = arith.constant 0.000000e+00 : f32
    %cst_8 = arith.constant 6.000000e+00 : f32
    %8 = vector.broadcast %cst_7 : f32 to vector<256x8xf32>
    %9 = arith.maximumf %8, %7 : vector<256x8xf32>
    %10 = vector.broadcast %cst_8 : f32 to vector<256x8xf32>
    %11 = arith.minimumf %10, %9 : vector<256x8xf32>
    %cst_9 = arith.constant 0.000000e+00 : bf16
    %12 = vector.broadcast %cst_9 : bf16 to vector<18x18x8xbf16>
    %c0_10 = arith.constant 0 : index
    %c0_11 = arith.constant 0 : index
    %c0_12 = arith.constant 0 : index
    %13 = vector.load %arg9[%c0_10, %c0_11, %c0_12] : memref<18x18x8xbf16, #tpu.memory_space<vmem>>, vector<18x18x8xbf16>
    tpu.vector_store %arg9[%c0_10, %c0_11, %c0_12], %12 {strides = array<i32>} : memref<18x18x8xbf16, #tpu.memory_space<vmem>>, vector<18x18x8xbf16>,
    %14 = vector.shape_cast %11 : vector<256x8xf32> to vector<16x16x8xf32>
    %15 = arith.truncf %14 : vector<16x16x8xf32> to vector<16x16x8xbf16>
    %c1 = arith.constant 1 : index
    %c1_13 = arith.constant 1 : index
    %c0_14 = arith.constant 0 : index
    %16 = vector.load %arg9[%c1, %c1_13, %c0_14] : memref<18x18x8xbf16, #tpu.memory_space<vmem>>, vector<16x16x8xbf16>
    tpu.vector_store %arg9[%c1, %c1_13, %c0_14], %15 {strides = array<i32>} : memref<18x18x8xbf16, #tpu.memory_space<vmem>>, vector<16x16x8xbf16>,
    %c0_15 = arith.constant 0 : index
    %c0_16 = arith.constant 0 : index
    %c0_17 = arith.constant 0 : index
    %17 = vector.load %arg9[%c0_15, %c0_16, %c0_17] : memref<18x18x8xbf16, #tpu.memory_space<vmem>>, vector<16x16x8xbf16>
    %18 = vector.shape_cast %17 : vector<16x16x8xbf16> to vector<256x8xbf16>
    %c0_18 = arith.constant 0 : index
    %c1_19 = arith.constant 1 : index
    %c0_20 = arith.constant 0 : index
    %19 = vector.load %arg9[%c0_18, %c1_19, %c0_20] : memref<18x18x8xbf16, #tpu.memory_space<vmem>>, vector<16x16x8xbf16>
    %20 = vector.shape_cast %19 : vector<16x16x8xbf16> to vector<256x8xbf16>
    %c0_21 = arith.constant 0 : index
    %c2 = arith.constant 2 : index
    %c0_22 = arith.constant 0 : index
    %21 = vector.load %arg9[%c0_21, %c2, %c0_22] : memref<18x18x8xbf16, #tpu.memory_space<vmem>>, vector<16x16x8xbf16>
    %22 = vector.shape_cast %21 : vector<16x16x8xbf16> to vector<256x8xbf16>
    %c1_23 = arith.constant 1 : index
    %c0_24 = arith.constant 0 : index
    %c0_25 = arith.constant 0 : index
    %23 = vector.load %arg9[%c1_23, %c0_24, %c0_25] : memref<18x18x8xbf16, #tpu.memory_space<vmem>>, vector<16x16x8xbf16>
    %24 = vector.shape_cast %23 : vector<16x16x8xbf16> to vector<256x8xbf16>
    %c1_26 = arith.constant 1 : index
    %c1_27 = arith.constant 1 : index
    %c0_28 = arith.constant 0 : index
    %25 = vector.load %arg9[%c1_26, %c1_27, %c0_28] : memref<18x18x8xbf16, #tpu.memory_space<vmem>>, vector<16x16x8xbf16>
    %26 = vector.shape_cast %25 : vector<16x16x8xbf16> to vector<256x8xbf16>
    %c1_29 = arith.constant 1 : index
    %c2_30 = arith.constant 2 : index
    %c0_31 = arith.constant 0 : index
    %27 = vector.load %arg9[%c1_29, %c2_30, %c0_31] : memref<18x18x8xbf16, #tpu.memory_space<vmem>>, vector<16x16x8xbf16>
    %28 = vector.shape_cast %27 : vector<16x16x8xbf16> to vector<256x8xbf16>
    %c2_32 = arith.constant 2 : index
    %c0_33 = arith.constant 0 : index
    %c0_34 = arith.constant 0 : index
    %29 = vector.load %arg9[%c2_32, %c0_33, %c0_34] : memref<18x18x8xbf16, #tpu.memory_space<vmem>>, vector<16x16x8xbf16>
    %30 = vector.shape_cast %29 : vector<16x16x8xbf16> to vector<256x8xbf16>
    %c2_35 = arith.constant 2 : index
    %c1_36 = arith.constant 1 : index
    %c0_37 = arith.constant 0 : index
    %31 = vector.load %arg9[%c2_35, %c1_36, %c0_37] : memref<18x18x8xbf16, #tpu.memory_space<vmem>>, vector<16x16x8xbf16>
    %32 = vector.shape_cast %31 : vector<16x16x8xbf16> to vector<256x8xbf16>
    %c2_38 = arith.constant 2 : index
    %c2_39 = arith.constant 2 : index
    %c0_40 = arith.constant 0 : index
    %33 = vector.load %arg9[%c2_38, %c2_39, %c0_40] : memref<18x18x8xbf16, #tpu.memory_space<vmem>>, vector<16x16x8xbf16>
    %34 = vector.shape_cast %33 : vector<16x16x8xbf16> to vector<256x8xbf16>
    %35 = tpu.concatenate %18, %20, %22, %24, %26, %28, %30, %32, %34 in 1 : vector<256x8xbf16>, vector<256x8xbf16>, vector<256x8xbf16>, vector<256x8xbf16>, vector<256x8xbf16>, vector<256x8xbf16>, vector<256x8xbf16>, vector<256x8xbf16>, vector<256x8xbf16> -> vector<256x72xbf16>
    %c0_41 = arith.constant 0 : index
    %c0_42 = arith.constant 0 : index
    %36 = vector.load %arg4[%c0_41, %c0_42] : memref<72x8xbf16, #tpu.memory_space<vmem>>, vector<72x8xbf16>
    %cst_43 = arith.constant dense<0.000000e+00> : vector<256x8xf32>
    %37 = tpu.matmul %35, %36, %cst_43 {dimension_numbers = #tpu.dot_dimension_numbers<[1], [0], [0], [1], [0, 0, 1, 1], [], []>} : vector<256x72xbf16>, vector<72x8xbf16>, vector<256x8xf32> -> vector<256x8xf32>
    %c0_44 = arith.constant 0 : index
    %c0_45 = arith.constant 0 : index
    %38 = vector.load %arg5[%c0_44, %c0_45] : memref<1x8xf32, #tpu.memory_space<vmem>>, vector<1x8xf32>
    %39 = vector.broadcast %38 : vector<1x8xf32> to vector<256x8xf32>
    %40 = arith.addf %37, %39 : vector<256x8xf32>
    %41 = arith.truncf %40 : vector<256x8xf32> to vector<256x8xbf16>
    %c0_46 = arith.constant 0 : index
    %c0_47 = arith.constant 0 : index
    %42 = vector.load %arg6[%c0_46, %c0_47] : memref<8x8xbf16, #tpu.memory_space<vmem>>, vector<8x8xbf16>
    %cst_48 = arith.constant dense<0.000000e+00> : vector<256x8xf32>
    %43 = tpu.matmul %41, %42, %cst_48 {dimension_numbers = #tpu.dot_dimension_numbers<[1], [0], [0], [1], [0, 0, 1, 1], [], []>} : vector<256x8xbf16>, vector<8x8xbf16>, vector<256x8xf32> -> vector<256x8xf32>
    %c0_49 = arith.constant 0 : index
    %c0_50 = arith.constant 0 : index
    %44 = vector.load %arg7[%c0_49, %c0_50] : memref<1x8xf32, #tpu.memory_space<vmem>>, vector<1x8xf32>
    %45 = vector.broadcast %44 : vector<1x8xf32> to vector<256x8xf32>
    %46 = arith.addf %43, %45 : vector<256x8xf32>
    %cst_51 = arith.constant 0.000000e+00 : f32
    %cst_52 = arith.constant 6.000000e+00 : f32
    %47 = vector.broadcast %cst_51 : f32 to vector<256x8xf32>
    %48 = arith.maximumf %47, %46 : vector<256x8xf32>
    %49 = vector.broadcast %cst_52 : f32 to vector<256x8xf32>
    %50 = arith.minimumf %49, %48 : vector<256x8xf32>
    %51 = vector.shape_cast %50 : vector<256x8xf32> to vector<16x16x8xf32>
    %c0_53 = arith.constant 0 : index
    %c0_54 = arith.constant 0 : index
    %c0_55 = arith.constant 0 : index
    %c0_56 = arith.constant 0 : index
    %52 = vector.load %arg8[%c0_53, %c0_54, %c0_55, %c0_56] : memref<1x16x16x8xf32, #tpu.memory_space<vmem>>, vector<1x16x16x8xf32>
    %53 = vector.shape_cast %52 : vector<1x16x16x8xf32> to vector<16x16x8xf32>
    %54 = vector.shape_cast %51 : vector<16x16x8xf32> to vector<1x16x16x8xf32>
    tpu.vector_store %arg8[%c0_53, %c0_54, %c0_55, %c0_56], %54 {strides = array<i32>} : memref<1x16x16x8xf32, #tpu.memory_space<vmem>>, vector<1x16x16x8xf32>,
    return
  }
  func.func @transform_0(%arg0: i32) -> (i32, i32, i32, i32) {
    %c0_i32 = arith.constant 0 : i32
    %c0_i32_0 = arith.constant 0 : i32
    %c0_i32_1 = arith.constant 0 : i32
    %c0_i32_2 = arith.constant 0 : i32
    return %arg0, %c0_i32, %c0_i32_0, %c0_i32_1 : i32, i32, i32, i32
  }
  func.func @transform_1(%arg0: i32) -> (i32, i32) {
    %c0_i32 = arith.constant 0 : i32
    %c0_i32_0 = arith.constant 0 : i32
    %c0_i32_1 = arith.constant 0 : i32
    return %c0_i32, %c0_i32_0 : i32, i32
  }
  func.func @transform_2(%arg0: i32) -> (i32, i32) {
    %c0_i32 = arith.constant 0 : i32
    %c0_i32_0 = arith.constant 0 : i32
    %c0_i32_1 = arith.constant 0 : i32
    return %c0_i32, %c0_i32_0 : i32, i32
  }
  func.func @transform_3(%arg0: i32) -> (i32, i32) {
    %c0_i32 = arith.constant 0 : i32
    %c0_i32_0 = arith.constant 0 : i32
    %c0_i32_1 = arith.constant 0 : i32
    return %c0_i32, %c0_i32_0 : i32, i32
  }
  func.func @transform_4(%arg0: i32) -> (i32, i32) {
    %c0_i32 = arith.constant 0 : i32
    %c0_i32_0 = arith.constant 0 : i32
    %c0_i32_1 = arith.constant 0 : i32
    return %c0_i32, %c0_i32_0 : i32, i32
  }
  func.func @transform_5(%arg0: i32) -> (i32, i32) {
    %c0_i32 = arith.constant 0 : i32
    %c0_i32_0 = arith.constant 0 : i32
    %c0_i32_1 = arith.constant 0 : i32
    return %c0_i32, %c0_i32_0 : i32, i32
  }
  func.func @transform_6(%arg0: i32) -> (i32, i32) {
    %c0_i32 = arith.constant 0 : i32
    %c0_i32_0 = arith.constant 0 : i32
    %c0_i32_1 = arith.constant 0 : i32
    return %c0_i32, %c0_i32_0 : i32, i32
  }
  func.func @transform_7(%arg0: i32) -> (i32, i32, i32, i32) {
    %c0_i32 = arith.constant 0 : i32
    %c0_i32_0 = arith.constant 0 : i32
    %c0_i32_1 = arith.constant 0 : i32
    %c0_i32_2 = arith.constant 0 : i32
    return %arg0, %c0_i32, %c0_i32_0, %c0_i32_1 : i32, i32, i32, i32
  }
}

</mosaic_0001>

<bundles_post_ra>
// kernel: shufflenet_unit_pallas.1
= control target key start
LH: loop header
LB: loop body
LE: loop exit
PB: predicated region body
PF: predicated region fallthrough
CT: control target
= control target key end

     0   :  { %s5429_s24 = smov 0   ;;  %s7849_s0 = inlined_call_operand.vmem [shape: bf16[2,16,16,8], index: 0, kind: input, shape index: {}]   ;;  %s7850_s1 = inlined_call_operand.vmem [shape: bf16[8,8], index: 1, kind: input, shape index: {}]   ;;  %s7851_s2 = inlined_call_operand.vmem [shape: f32[1,8], index: 2, kind: input, shape index: {}]   ;;  %s7852_s3 = inlined_call_operand.vmem [shape: bf16[72,8], index: 3, kind: input, shape index: {}]   ;;  %s7853_s4 = inlined_call_operand.vmem [shape: f32[1,8], index: 4, kind: input, shape index: {}]   ;;  %s7854_s5 = inlined_call_operand.vmem [shape: bf16[8,8], index: 5, kind: input, shape index: {}]   ;;  %s7855_s6 = inlined_call_operand.vmem [shape: f32[1,8], index: 6, kind: input, shape index: {}]   ;;  %s7856_s7 = inlined_call_operand.vmem [shape: f32[2,16,16,8], index: 7, kind: output, shape index: {}]  }
   0x1 LB: > { %s4744_s25 = sadd.s32 4294967295, %s5378_s24   ;;  %p4748_p0 = scmp.ge.s32.totalorder %s5378_s24, 1  ;;  %s5378_s24 = sphi %s5429_s24, %s17_s24  }
   0x2   : > { %p237_p1 = scmp.lt.s32.totalorder %s5378_s24, 3 }
   0x4   : > { %p238_p2 = pnand %p4748_p0, %p237_p1 }
   0x6   : > { %241 = sbr.rel (%p238_p2) target bundleno = 1190 (0x4a6), region = 48 }
   0xd   : > { %v312_v0 = vld [vmem:[%s7850_s1] sm:$0xf]  ;;  %vm449_vm0 = vcmask 1043456   ;;  %p269_p3 = scmp.lt.s32.totalorder %s4744_s25, 1  ;;  %vm400_vm1 = vcmask 64512   ;;  %vm678_vm2 = vcmask 60416  }
   0xe   : > { %5252 = vmatprep.subr.msk.bf16.mxu0 %vm449_vm0, %v312_v0  ;;  %5253 = vmatprep.subr.msk.bf16.mxu1 %vm449_vm0, %v312_v0  ;;  %v451_v1 = vsel %vm449_vm0, %v312_v0, 0  ;;  %v5380_v18 = vmov 0   ;;  %vm681_vm3 = vcmask 57344   ;;  %vm1770_vm4 = vcmask 1042432   ;;  %s5381_s9 = smov 16   ;;  %s5382_s10 = smov 8  }
   0xf   : > { %5141 = vmatpush3.bf16.msra.mxu0 %v451_v1  ;;  %5251 = vmatpush3.bf16.msra.mxu1 %v451_v1  ;;  %s8113_s25 = smov (!%p269_p3, %s4744_s25), 1  ;;  %686 = vst.msk [vmem:[#allocation2 + $0x18] sm:$0xf] %vm678_vm2, %v5380_v18  ;;  %679 = vst.msk [vmem:[#allocation2] sm:$0xf] %vm678_vm2, %v5380_v18  ;;  %vm1771_vm5 = vcmask 1046532  }
  0x10   : > { %s5051_s28 = sshll.u32 %s8113_s25, 7  ;;  %680 = vst.msk [vmem:[#allocation2 + $0x4] sm:$0xf] %vm678_vm2, %v5380_v18  ;;  %683 = vst.msk [vmem:[#allocation2 + $0xc] sm:$0xf] %vm678_vm2, %v5380_v18  ;;  %s5383_s13 = smov 48  }
  0x11   : > { %s5449_s8 = scalar_lea.vmem %s7849_s0, %s5051_s28  ;;  %684 = vst.msk [vmem:[#allocation2 + $0x10] sm:$0xf] %vm678_vm2, %v5380_v18  ;;  %687 = vst.msk [vmem:[#allocation2 + $0x1c] sm:$0xf] %vm678_vm2, %v5380_v18  ;;  %vm1319_vm7 = vsmask.f32 3328 }
  0x12   : > { %v5273_v2 = vld [vmem:[%s5449_s8] sm:$0xff]   ;;  %v5275_v4 = vld [vmem:[%s5449_s8 + $0x8] sm:$0xff]   ;;  %v5277_v6 = vld [vmem:[%s5449_s8 + $0x10] sm:$0xff]   ;;  %689 = vst.msk [vmem:[#allocation2 + $0x24] sm:$0xf] %vm678_vm2, %v5380_v18  ;;  %s5384_s14 = smov 24  }
  0x13   : > { %v5274_v3 = vld [vmem:[%s5449_s8 + $0x40] sm:$0xff]   ;;  %5142 = vmatprep.mubr.msk.bf16.mxu0 %vm400_vm1, %v5273_v2  ;;  %v5276_v5 = vld [vmem:[%s5449_s8 + $0x48] sm:$0xff]   ;;  %v5279_v7 = vld [vmem:[%s5449_s8 + $0x50] sm:$0xff]   ;;  %690 = vst.msk [vmem:[#allocation2 + $0x28] sm:$0xf] %vm678_vm2, %v5380_v18  ;;  %s5385_s15 = smov 40  }
  0x14   : > { %5158 = vmatprep.mubr.msk.bf16.mxu1 %vm400_vm1, %v5274_v3  ;;  %5143 = vmatmul.mubr.msk.bf16.vlgmr.msra.gmra.mrb[0].mxu0 %vm400_vm1, %v5275_v4  ;;  %v5278_v8 = vld [vmem:[%s5449_s8 + $0x18] sm:$0xff]   ;;  %v5281_v10 = vld [vmem:[%s5449_s8 + $0x20] sm:$0xff]   ;;  %v5282_v12 = vld [vmem:[%s5449_s8 + $0x28] sm:$0xff]   ;;  %692 = vst.msk [vmem:[#allocation2 + $0x30] sm:$0xf] %vm678_vm2, %v5380_v18  ;;  %s5386_s16 = smov 64  }
  0x15   : > { %5159 = vmatmul.mubr.msk.bf16.vlgmr.msra.gmra.mrb[0].mxu1 %vm400_vm1, %v5276_v5  ;;  %5146 = vmatprep.mubr.msk.bf16.mxu0 %vm400_vm1, %v5277_v6  ;;  %v5280_v9 = vld [vmem:[%s5449_s8 + $0x58] sm:$0xff]   ;;  %v5283_v11 = vld [vmem:[%s5449_s8 + $0x60] sm:$0xff]   ;;  %v5284_v13 = vld [vmem:[%s5449_s8 + $0x68] sm:$0xff]   ;;  %693 = vst.msk [vmem:[#allocation2 + $0x34] sm:$0xf] %vm678_vm2, %v5380_v18  ;;  %s5387_s17 = smov 32  }
  0x16   : > { %5162 = vmatprep.mubr.msk.bf16.mxu1 %vm400_vm1, %v5279_v7  ;;  %v5285_v14 = vld [vmem:[%s5449_s8 + $0x30] sm:$0xff]   ;;  %v5286_v16 = vld [vmem:[%s5449_s8 + $0x38] sm:$0xff]   ;;  %695 = vst.msk [vmem:[#allocation2 + $0x3c] sm:$0xf] %vm678_vm2, %v5380_v18  ;;  %696 = vst.msk [vmem:[#allocation2 + $0x40] sm:$0xf] %vm678_vm2, %v5380_v18 }
  0x17   : > { %v5287_v15 = vld [vmem:[%s5449_s8 + $0x70] sm:$0xff]   ;;  %v5288_v17 = vld [vmem:[%s5449_s8 + $0x78] sm:$0xff]   ;;  %698 = vst.msk [vmem:[#allocation2 + $0x48] sm:$0xf] %vm678_vm2, %v5380_v18  ;;  %699 = vst.msk [vmem:[#allocation2 + $0x4c] sm:$0xf] %vm678_vm2, %v5380_v18 }
  0x18   : > { %701 = vst.msk [vmem:[#allocation2 + $0x54] sm:$0xf] %vm678_vm2, %v5380_v18  ;;  %702 = vst.msk [vmem:[#allocation2 + $0x58] sm:$0xf] %vm678_vm2, %v5380_v18  ;;  %v1272_v19 = vld [vmem:[#allocation2 + $0x4] sm:$0xf] }
  0x19   : > { %704 = vst.msk [vmem:[#allocation2 + $0x60] sm:$0xf] %vm678_vm2, %v5380_v18  ;;  %705 = vst.msk [vmem:[#allocation2 + $0x64] sm:$0xf] %vm678_vm2, %v5380_v18  ;;  %v1271_v20 = vld [vmem:[#allocation2] sm:$0xf] }
  0x1a   : > { %707 = vst.msk [vmem:[#allocation2 + $0x6c] sm:$0xf] %vm678_vm2, %v5380_v18  ;;  %708 = vst.msk [vmem:[#allocation2 + $0x70] sm:$0xf] %vm678_vm2, %v5380_v18  ;;  %v1323_v21 = vshrl.u32 %v1271_v20, 16  ;;  %v1326_v22 = vshll.u32 %v1271_v20, 16 }
  0x1b   : > { %710 = vst.msk [vmem:[#allocation2 + $0x78] sm:$0xf] %vm678_vm2, %v5380_v18  ;;  %711 = vst.msk [vmem:[#allocation2 + $0x7c] sm:$0xf] %vm678_vm2, %v5380_v18  ;;  %v1332_v23 = vshll.u32 %v1272_v19, 16  ;;  %v1336_v24 = vshrl.u32 %v1272_v19, 16 }
  0x1c   : > { %5147 = vmatmul.mubr.msk.bf16.gmra.mrb[4].mxu0 %vm400_vm1, %v5278_v8  ;;  %713 = vst.msk [vmem:[#allocation2 + $0x84] sm:$0xf] %vm678_vm2, %v5380_v18  ;;  %714 = vst.msk [vmem:[#allocation2 + $0x88] sm:$0xf] %vm678_vm2, %v5380_v18  ;;  %v1325_v25 = vrot.slane %v1323_v21, 4  ;;  %v1328_v26 = vrot.slane %v1326_v22, 5 }
  0x1d   : > { %5163 = vmatmul.mubr.msk.bf16.gmra.mrb[4].mxu1 %vm400_vm1, %v5280_v9  ;;  %5150 = vmatprep.mubr.msk.bf16.mxu0 %vm400_vm1, %v5281_v10  ;;  %716 = vst.msk [vmem:[#allocation2 + $0x90] sm:$0xf] %vm678_vm2, %v5380_v18  ;;  %717 = vst.msk [vmem:[#allocation2 + $0x94] sm:$0xf] %vm678_vm2, %v5380_v18  ;;  %v1334_v27 = vrot.slane %v1332_v23, 5  ;;  %v1338_v28 = vrot.slane %v1336_v24, 4 }
  0x1e   : > { %5166 = vmatprep.mubr.msk.bf16.mxu1 %vm400_vm1, %v5283_v11  ;;  %719 = vst.msk [vmem:[#allocation2 + $0x9c] sm:$0xf] %vm678_vm2, %v5380_v18  ;;  %720 = vst.msk [vmem:[#allocation2 + $0xa0] sm:$0xf] %vm678_vm2, %v5380_v18  ;;  %v1775_v30 = vrot.slane %v1272_v19, 5  ;;  %v1329_v31 = vor.u32 %v1328_v26, %v1325_v25  ;;  %s5388_s20 = smov 56  }
  0x1f   : > { %722 = vst.msk [vmem:[#allocation2 + $0xa8] sm:$0xf] %vm678_vm2, %v5380_v18  ;;  %723 = vst.msk [vmem:[#allocation2 + $0xac] sm:$0xf] %vm678_vm2, %v5380_v18  ;;  %v1339_v32 = vor.u32 %v1338_v28, %v1334_v27  ;;  %v1706_v34 = vld [vmem:[#allocation2] sm:$0xe] }
  0x20   : > { %725 = vst.msk [vmem:[#allocation2 + $0xb4] sm:$0xf] %vm678_vm2, %v5380_v18  ;;  %726 = vst.msk [vmem:[#allocation2 + $0xb8] sm:$0xf] %vm678_vm2, %v5380_v18  ;;  %v4818_v35 = vrot.slane %v1706_v34, 9  ;;  %v1777_v36 = vrot.slane %v1775_v30, 4 }
  0x21   : > { %728 = vst.msk [vmem:[#allocation2 + $0xc0] sm:$0xf] %vm678_vm2, %v5380_v18  ;;  %729 = vst.msk [vmem:[#allocation2 + $0xc4] sm:$0xf] %vm678_vm2, %v5380_v18  ;;  %vm1320_vm8 = vsmask.f32 7440 }
  0x22   : > { %731 = vst.msk [vmem:[#allocation2 + $0xcc] sm:$0xf] %vm678_vm2, %v5380_v18  ;;  %732 = vst.msk [vmem:[#allocation2 + $0xd0] sm:$0xf] %vm678_vm2, %v5380_v18  ;;  %v1330_v39 = vrot.slane %v1329_v31, 4  ;;  %v1340_v42 = vrot.slane %v1339_v32, 4 }
  0x23   : > { %688 = vst.msk [vmem:[#allocation2 + $0x20] sm:$0x1] %vm681_vm3, %v5380_v18  ;;  %682 = vst.msk [vmem:[#allocation2 + $0x8] sm:$0x1] %vm681_vm3, %v5380_v18  ;;  %v5558_v49 = vld [vmem:[%s7851_s2] ss:$0 sm:$0xff] }
  0x24   : > { %5151 = vmatmul.mubr.msk.bf16.gmra.mrb[8].mxu0 %vm400_vm1, %v5282_v12  ;;  %685 = vst.msk [vmem:[#allocation2 + $0x14] sm:$0x1] %vm681_vm3, %v5380_v18  ;;  %691 = vst.msk [vmem:[#allocation2 + $0x2c] sm:$0x1] %vm681_vm3, %v5380_v18  ;;  %vm1155_vm10 = vsmask.f32 7938 }
  0x25   : > { %5167 = vmatmul.mubr.msk.bf16.gmra.mrb[8].mxu1 %vm400_vm1, %v5284_v13  ;;  %5154 = vmatprep.mubr.msk.bf16.mxu0 %vm400_vm1, %v5285_v14  ;;  %694 = vst.msk [vmem:[#allocation2 + $0x38] sm:$0x1] %vm681_vm3, %v5380_v18  ;;  %697 = vst.msk [vmem:[#allocation2 + $0x44] sm:$0x1] %vm681_vm3, %v5380_v18  ;;  %vm830_vm11 = vsmask.f32 256 }
  0x26   : > { %5170 = vmatprep.mubr.msk.bf16.mxu1 %vm400_vm1, %v5287_v15  ;;  %700 = vst.msk [vmem:[#allocation2 + $0x50] sm:$0x1] %vm681_vm3, %v5380_v18  ;;  %703 = vst.msk [vmem:[#allocation2 + $0x5c] sm:$0x1] %vm681_vm3, %v5380_v18  ;;  %vm831_vm12 = vsmask.f32 4368 }
  0x27   : > { %706 = vst.msk [vmem:[#allocation2 + $0x68] sm:$0x1] %vm681_vm3, %v5380_v18  ;;  %709 = vst.msk [vmem:[#allocation2 + $0x74] sm:$0x1] %vm681_vm3, %v5380_v18 }
  0x28   : > { %712 = vst.msk [vmem:[#allocation2 + $0x80] sm:$0x1] %vm681_vm3, %v5380_v18  ;;  %715 = vst.msk [vmem:[#allocation2 + $0x8c] sm:$0x1] %vm681_vm3, %v5380_v18 }
  0x29   : > { %718 = vst.msk [vmem:[#allocation2 + $0x98] sm:$0x1] %vm681_vm3, %v5380_v18  ;;  %721 = vst.msk [vmem:[#allocation2 + $0xa4] sm:$0x1] %vm681_vm3, %v5380_v18 }
  0x2a   : > { %724 = vst.msk [vmem:[#allocation2 + $0xb0] sm:$0x1] %vm681_vm3, %v5380_v18  ;;  %727 = vst.msk [vmem:[#allocation2 + $0xbc] sm:$0x1] %vm681_vm3, %v5380_v18  ;;  %v1303_v29 = vld [vmem:[#allocation2 + $0x8] sm:$0x1] }
  0x2b   : > { %730 = vst.msk [vmem:[#allocation2 + $0xc8] sm:$0x1] %vm681_vm3, %v5380_v18  ;;  %733 = vst.msk [vmem:[#allocation2 + $0xd4] sm:$0x1] %vm681_vm3, %v5380_v18  ;;  %v1342_v33 = vshll.u32 %v1303_v29, 16  ;;  %v1778_v38 = vrot.slane %v1303_v29, 5 }
  0x2c   : > { %5155 = vmatmul.mubr.msk.bf16.gmra.mrb[12].mxu0 %vm400_vm1, %v5286_v16  ;;  %vm5537_vm6 = vmor %vm1770_vm4, %vm1771_vm5  ;;  %vm3919_vm4 = vcmask 195584   ;;  %vm3985_vm5 = vcmask 326656  }
  0x2d   : > { %5171 = vmatmul.mubr.msk.bf16.gmra.mrb[12].mxu1 %vm400_vm1, %v5288_v17  ;;  %v1776_v40 = vsel %vm5537_vm6, %v4818_v35, %v1775_v30  ;;  %vm5543_vm9 = vmor %vm1319_vm7, %vm1320_vm8  ;;  %v1344_v43 = vrot.slane %v1342_v33, 5  ;;  %v1779_v44 = vsel %vm5537_vm6, %v1777_v36, %v1778_v38  ;;  %vm4018_vm7 = vcmask 392192  }
  0x2e   : > { %v1335_v45 = vsel %vm5543_vm9, %v1330_v39, %v1334_v27  ;;  %v4898_v46 = vcombine.low %v1776_v40, %v1779_v44  ;;  %v1166_v27 = vld [vmem:[#allocation2 + $0x18] sm:$0xf]  ;;  %vm5585_vm13 = vmand %vm678_vm2, %vm1155_vm10  ;;  %vm4051_vm8 = vcmask 457728   ;;  %vm4084_vm10 = vcmask 523264  }
  0x2f   : > { %v1345_v47 = vsel %vm5543_vm9, %v1340_v42, %v1344_v43  ;;  %v1222_v44 = vld [vmem:[#allocation2 + $0x78] sm:$0xf]  ;;  %vm5603_vm14 = vmor %vm830_vm11, %vm831_vm12 }
  0x30   : > { %v4882_v48 = vcombine.low %v1335_v45, %v1345_v47  ;;  %3294 = vrot.lane.b32.xlu1 %v4898_v46, %s5381_s9  ;;  %vm5613_vm15 = vmand %vm681_vm3, %vm830_vm11  ;;  %vm3886_vm3 = vcmask 130048   ;;  %v5321_v42 = vld [vmem:[%s7852_s3 + $0x18] sm:$0xff]   ;;  %vm4160_vm11 = vcmask 588800  }
  0x32   : > { %3214 = vrot.lane.b32.xlu0 %v4882_v48, %s5382_s10 }
  0xe7   : > { %v5144_v50 = vpop.f32.mrb[0].mxu0 }
  0xe8   : > { %v496_v51 = vadd.f32 %v5144_v50, %v5558_v49  ;;  %v5160_v52 = vpop.f32.mrb[0].mxu1  ;;  %v487_v53 = vpop.f32.mrb[1].mxu0 }
  0xe9   : > { %v560_v54 = vadd.f32 %v5160_v52, %v5558_v49  ;;  %v488_v55 = vadd.f32 %v5558_v49, %v487_v53  ;;  %v551_v56 = vpop.f32.mrb[1].mxu1  ;;  %v5145_v57 = vpop.f32.mrb[2].mxu0  ;;  %v1157_v52 = vld [vmem:[#allocation2 + $0xc] sm:$0xf] }
  0xea   : > { %v616_v58 = vmax.f32 %v496_v51, 0.0  ;;  %v552_v59 = vadd.f32 %v5558_v49, %v551_v56  ;;  %v499_v60 = vadd.f32 %v5145_v57, %v5558_v49  ;;  %v5161_v61 = vpop.f32.mrb[2].mxu1  ;;  %v490_v62 = vpop.f32.mrb[3].mxu0 }
  0xeb   : > { %v632_v63 = vmax.f32 %v560_v54, 0.0  ;;  %v614_v0 = vmax.f32 %v488_v55, 0.0  ;;  %v563_v1 = vadd.f32 %v5161_v61, %v5558_v49  ;;  %v491_v2 = vadd.f32 %v5558_v49, %v490_v62  ;;  %v554_v3 = vpop.f32.mrb[3].mxu1 }
  0xec   : > { %v648_v4 = vmin.f32 %v616_v58, 6.0  ;;  %v630_v5 = vmax.f32 %v552_v59, 0.0  ;;  %v617_v6 = vmax.f32 %v499_v60, 0.0  ;;  %v5568_v7 = vadd.f32 %v5558_v49, %v554_v3  ;;  %v1215_v59 = vld [vmem:[#allocation2 + $0x6c] sm:$0xf] }
  0xed   : > { %v664_v8 = vmin.f32 %v632_v63, 6.0  ;;  %v646_v9 = vmin.f32 %v614_v0, 6.0  ;;  %v633_v10 = vmax.f32 %v563_v1, 0.0  ;;  %v615_v11 = vmax.f32 %v491_v2, 0.0  ;;  %v1170_v2 = vld [vmem:[#allocation2 + $0x20] sm:$0x1] }
  0xee   : > { %v5055_v12 = vpack.c.bf16 %v648_v4, %v648_v4  ;;  %v662_v13 = vmin.f32 %v630_v5, 6.0  ;;  %v649_v14 = vmin.f32 %v617_v6, 6.0  ;;  %v631_v15 = vmax.f32 %v5568_v7, 0.0 }
  0xef   : > { %v5071_v16 = vpack.c.bf16 %v664_v8, %v664_v8  ;;  %v5053_v17 = vpack.c.bf16 %v646_v9, %v646_v9  ;;  %v665_v18 = vmin.f32 %v633_v10, 6.0  ;;  %v647_v19 = vmin.f32 %v615_v11, 6.0  ;;  %v5571_v20 = vpop.f32.mrb[4].mxu0 }
  0xf0   : > { %v851_v21 = vshrl.u32 %v5055_v12, 16  ;;  %v854_v22 = vshll.u32 %v5055_v12, 16  ;;  %v5069_v23 = vpack.c.bf16 %v662_v13, %v662_v13  ;;  %v5056_v24 = vpack.c.bf16 %v649_v14, %v649_v14  ;;  %v5573_v25 = vpop.f32.mrb[5].mxu0  ;;  %v5575_v26 = vpop.f32.mrb[4].mxu1 }
  0xf1   : > { %v987_v28 = vshrl.u32 %v5071_v16, 16  ;;  %v990_v29 = vshll.u32 %v5071_v16, 16  ;;  %v834_v30 = vshrl.u32 %v5053_v17, 16  ;;  %v837_v31 = vshll.u32 %v5053_v17, 16  ;;  %v5149_v32 = vpop.f32.mrb[6].mxu0  ;;  %v5577_v33 = vpop.f32.mrb[5].mxu1 }
  0xf2   : > { %v853_v34 = vrot.slane %v851_v21, 7  ;;  %v970_v35 = vshrl.u32 %v5069_v23, 16  ;;  %v973_v36 = vshll.u32 %v5069_v23, 16  ;;  %v859_v38 = vshrl.u32 %v5056_v24, 16  ;;  %v5579_v39 = vpop.f32.mrb[7].mxu0  ;;  %v5581_v40 = vpop.f32.mrb[6].mxu1 }
  0xf3   : > { %v5589_v43 = vrot.slane %v987_v28, 7  ;;  %v5591_v45 = vrot.slane %v834_v30, 7  ;;  %v862_v46 = vshll.u32 %v5056_v24, 16  ;;  %v5072_v47 = vpack.c.bf16 %v665_v18, %v665_v18  ;;  %v5593_v48 = vpop.f32.mrb[7].mxu1  ;;  %v1226_v23 = vld [vmem:[#allocation2 + $0x80] sm:$0x1] }
  0xf4   : > { %v856_v50 = vor.u32 %v854_v22, %v853_v34  ;;  %v857_v51 = vrot.slane %v853_v34, 4  ;;  %v5595_v53 = vrot.slane %v970_v35, 7  ;;  %v861_v54 = vrot.slane %v859_v38, 7 }
  0xf5   : > { %v992_v55 = vor.u32 %v990_v29, %v5589_v43  ;;  %v993_v56 = vrot.slane %v5589_v43, 4  ;;  %v839_v57 = vor.u32 %v837_v31, %v5591_v45  ;;  %v840_v58 = vrot.slane %v5591_v45, 4 }
  0xf6   : > { %v1167_v61 = vsel %vm5585_vm13, %v856_v50, %v1166_v27  ;;  %v975_v62 = vor.u32 %v973_v36, %v5595_v53  ;;  %v976_v63 = vrot.slane %v5595_v53, 4  ;;  %v864_v0 = vor.u32 %v862_v46, %v861_v54  ;;  %v1163_v46 = vld [vmem:[#allocation2 + $0x14] sm:$0x1] }
  0xf7   : > { %1168 = vst [vmem:[#allocation2 + $0x18] sm:$0xf] %v1167_v61  ;;  %v1223_v3 = vsel %vm5585_vm13, %v992_v55, %v1222_v44  ;;  %v1158_v4 = vsel %vm5585_vm13, %v839_v57, %v1157_v52  ;;  %v866_v5 = vrot.slane %v861_v54, 4  ;;  %v995_v6 = vshrl.u32 %v5072_v47, 16  ;;  %v5621_v8 = vpop.f32.mrb[8].mxu0 }
  0xf8   : > { %1224 = vst [vmem:[#allocation2 + $0x78] sm:$0xf] %v1223_v3  ;;  %1159 = vst [vmem:[#allocation2 + $0xc] sm:$0xf] %v1158_v4  ;;  %v1216_v9 = vsel %vm5585_vm13, %v975_v62, %v1215_v59  ;;  %v865_v10 = vsel %vm5603_vm14, %v857_v51, %v864_v0  ;;  %v998_v11 = vshll.u32 %v5072_v47, 16  ;;  %v5054_v12 = vpack.c.bf16 %v647_v19, %v647_v19  ;;  %v5627_v13 = vpop.f32.mrb[9].mxu0 }
  0xf9   : > { %v5629_v14 = vpop.f32.mrb[8].mxu1  ;;  %1217 = vst [vmem:[#allocation2 + $0x6c] sm:$0xf] %v1216_v9  ;;  %1169 = vst.msk [vmem:[#allocation2 + $0x1c] sm:$0xf] %vm678_vm2, %v865_v10  ;;  %v1171_v16 = vsel %vm5613_vm15, %v866_v5, %v1170_v2  ;;  %v997_v17 = vrot.slane %v995_v6, 7  ;;  %v512_v21 = vadd.f32 %v5571_v20, %v5558_v49  ;;  %v504_v28 = vadd.f32 %v5558_v49, %v5573_v25 }
  0xfa   : > { %v663_v18 = vmin.f32 %v631_v15, 6.0  ;;  %v5638_v22 = vpop.f32.mrb[10].mxu0  ;;  %v5640_v19 = vpop.f32.mrb[9].mxu1  ;;  %1172 = vst [vmem:[#allocation2 + $0x20] sm:$0x1] %v1171_v16  ;;  %v842_v24 = vshrl.u32 %v5054_v12, 16  ;;  %v515_v29 = vadd.f32 %v5149_v32, %v5558_v49  ;;  %v507_v44 = vadd.f32 %v5558_v49, %v5579_v39 }
  0xfb   : > { %v845_v27 = vshll.u32 %v5054_v12, 16  ;;  %v5645_v30 = vpop.f32.mrb[11].mxu0  ;;  %v5647_v7 = vpop.f32.mrb[10].mxu1  ;;  %v1000_v15 = vor.u32 %v998_v11, %v997_v17  ;;  %v1002_v31 = vrot.slane %v997_v17, 4  ;;  %v620_v34 = vmax.f32 %v512_v21, 0.0 }
  0xfc   : > { %v5070_v20 = vpack.c.bf16 %v663_v18, %v663_v18  ;;  %v5649_v35 = vpop.f32.mrb[11].mxu1  ;;  %v844_v36 = vrot.slane %v842_v24, 7  ;;  %v618_v38 = vmax.f32 %v504_v28, 0.0  ;;  %v621_v43 = vmax.f32 %v515_v29, 0.0  ;;  %v1219_v0 = vld [vmem:[#allocation2 + $0x74] sm:$0x1] }
  0xfd   : > { %v1001_v25 = vsel %vm5603_vm14, %v993_v56, %v1000_v15  ;;  %v1227_v32 = vsel %vm5613_vm15, %v1002_v31, %v1226_v23  ;;  %v652_v54 = vmin.f32 %v620_v34, 6.0  ;;  %v619_v61 = vmax.f32 %v507_v44, 0.0  ;;  %v1173_v28 = vld [vmem:[#allocation2 + $0x24] sm:$0xf] }
  0xfe   : > { %v978_v47 = vshrl.u32 %v5070_v20, 16  ;;  %v981_v50 = vshll.u32 %v5070_v20, 16  ;;  %1225 = vst.msk [vmem:[#allocation2 + $0x7c] sm:$0xf] %vm678_vm2, %v1001_v25  ;;  %1228 = vst [vmem:[#allocation2 + $0x80] sm:$0x1] %v1227_v32  ;;  %v847_v51 = vor.u32 %v845_v27, %v844_v36  ;;  %v576_v39 = vadd.f32 %v5575_v26, %v5558_v49 }
  0xff   : > { %v849_v52 = vrot.slane %v844_v36, 4  ;;  %v650_v55 = vmin.f32 %v618_v38, 6.0  ;;  %v653_v59 = vmin.f32 %v621_v43, 6.0  ;;  %v5059_v2 = vpack.c.bf16 %v652_v54, %v652_v54  ;;  %v1180_v27 = vld [vmem:[#allocation2 + $0x30] sm:$0xf] }
 0x100   : > { %v980_v57 = vrot.slane %v978_v47, 7  ;;  %v848_v56 = vsel %vm5603_vm14, %v840_v58, %v847_v51  ;;  %v651_v9 = vmin.f32 %v619_v61, 6.0  ;;  %v636_v24 = vmax.f32 %v576_v39, 0.0  ;;  %v1184_v38 = vld [vmem:[#allocation2 + $0x38] sm:$0x1] }
 0x101   : > { %v1164_v62 = vsel %vm5613_vm15, %v849_v52, %v1163_v46  ;;  %v5057_v3 = vpack.c.bf16 %v650_v55, %v650_v55  ;;  %1160 = vst.msk [vmem:[#allocation2 + $0x10] sm:$0xf] %vm678_vm2, %v848_v56  ;;  %v5060_v6 = vpack.c.bf16 %v653_v59, %v653_v59  ;;  %v885_v10 = vshrl.u32 %v5059_v2, 16  ;;  %v1177_v54 = vld [vmem:[#allocation2 + $0x2c] sm:$0x1] }
 0x102   : > { %1165 = vst [vmem:[#allocation2 + $0x14] sm:$0x1] %v1164_v62  ;;  %v983_v4 = vor.u32 %v981_v50, %v980_v57  ;;  %v985_v5 = vrot.slane %v980_v57, 4  ;;  %v888_v26 = vshll.u32 %v5059_v2, 16  ;;  %v5058_v23 = vpack.c.bf16 %v651_v9, %v651_v9 }
 0x103   : > { %v868_v11 = vshrl.u32 %v5057_v3, 16  ;;  %v871_v45 = vshll.u32 %v5057_v3, 16  ;;  %v893_v16 = vshrl.u32 %v5060_v6, 16  ;;  %v896_v17 = vshll.u32 %v5060_v6, 16 }
 0x104   : > { %v984_v58 = vsel %vm5603_vm14, %v976_v63, %v983_v4  ;;  %v1220_v12 = vsel %vm5613_vm15, %v985_v5, %v1219_v0  ;;  %v887_v18 = vrot.slane %v885_v10, 7  ;;  %v568_v53 = vadd.f32 %v5558_v49, %v5577_v33  ;;  %v5689_v4 = vld [vmem:[#allocation2 + $0x1c] sm:$0xf] }
 0x105   : > { %1218 = vst.msk [vmem:[#allocation2 + $0x70] sm:$0xf] %vm678_vm2, %v984_v58  ;;  %1221 = vst [vmem:[#allocation2 + $0x74] sm:$0x1] %v1220_v12  ;;  %v870_v21 = vrot.slane %v868_v11, 7  ;;  %v895_v29 = vrot.slane %v893_v16, 7  ;;  %v579_v63 = vadd.f32 %v5581_v40, %v5558_v49  ;;  %v571_v15 = vadd.f32 %v5558_v49, %v5593_v48 }
 0x106   : > { %v890_v31 = vor.u32 %v888_v26, %v887_v18  ;;  %v891_v20 = vrot.slane %v887_v18, 4  ;;  %v876_v25 = vshrl.u32 %v5058_v23, 16  ;;  %v879_v32 = vshll.u32 %v5058_v23, 16  ;;  %v2494_v58 = vld [vmem:[#allocation2 + $0x18] sm:$0xf] }
 0x107   : > { %v873_v34 = vor.u32 %v871_v45, %v870_v21  ;;  %v874_v36 = vrot.slane %v870_v21, 4  ;;  %v898_v43 = vor.u32 %v896_v17, %v895_v29  ;;  %v900_v44 = vrot.slane %v895_v29, 4  ;;  %v1236_v12 = vld [vmem:[#allocation2 + $0x90] sm:$0xf] }
 0x108   : > { %v1181_v46 = vsel %vm5585_vm13, %v890_v31, %v1180_v27  ;;  %v668_v47 = vmin.f32 %v636_v24, 6.0  ;;  %v634_v40 = vmax.f32 %v568_v53, 0.0  ;;  %v878_v51 = vrot.slane %v876_v25, 7  ;;  %v1229_v24 = vld [vmem:[#allocation2 + $0x84] sm:$0xf] }
 0x109   : > { %v1174_v33 = vsel %vm5585_vm13, %v873_v34, %v1173_v28  ;;  %1182 = vst [vmem:[#allocation2 + $0x30] sm:$0xf] %v1181_v46  ;;  %v899_v48 = vsel %vm5603_vm14, %v891_v20, %v898_v43  ;;  %v1185_v50 = vsel %vm5613_vm15, %v900_v44, %v1184_v38  ;;  %v637_v52 = vmax.f32 %v579_v63, 0.0  ;;  %v5698_v63 = vld [vmem:[#allocation2 + $0x1c] sm:$0xf] }
 0x10a   : > { %1175 = vst [vmem:[#allocation2 + $0x24] sm:$0xf] %v1174_v33  ;;  %1183 = vst.msk [vmem:[#allocation2 + $0x34] sm:$0xf] %vm678_vm2, %v899_v48  ;;  %v5075_v55 = vpack.c.bf16 %v668_v47, %v668_v47  ;;  %v666_v57 = vmin.f32 %v634_v40, 6.0  ;;  %v635_v59 = vmax.f32 %v571_v15, 0.0  ;;  %v881_v61 = vor.u32 %v879_v32, %v878_v51 }
 0x10b   : > { %1186 = vst [vmem:[#allocation2 + $0x38] sm:$0x1] %v1185_v50  ;;  %v883_v39 = vrot.slane %v878_v51, 4  ;;  %v669_v56 = vmin.f32 %v637_v52, 6.0  ;;  %v4962_v18 = vcombine.low %v2494_v58, %v5689_v4  ;;  %v1240_v34 = vld [vmem:[#allocation2 + $0x98] sm:$0x1] }
 0x10c   : > { %v1021_v62 = vshrl.u32 %v5075_v55, 16  ;;  %v1024_v0 = vshll.u32 %v5075_v55, 16  ;;  %v5073_v2 = vpack.c.bf16 %v666_v57, %v666_v57  ;;  %v667_v3 = vmin.f32 %v635_v59, 6.0  ;;  %v1233_v44 = vld [vmem:[#allocation2 + $0x8c] sm:$0x1] }
 0x10d   : > { %v882_v5 = vsel %vm5603_vm14, %v874_v36, %v881_v61  ;;  %v1178_v6 = vsel %vm5613_vm15, %v883_v39, %v1177_v54  ;;  %v5076_v9 = vpack.c.bf16 %v669_v56, %v669_v56  ;;  %3646 = vrot.lane.b32.xlu0 %v4962_v18, %s5383_s13  ;;  %v1887_v25 = vld [vmem:[#allocation2 + $0x18] sm:$0xf]  ;;  %v5705_v48 = vld [vmem:[#allocation2 + $0x7c] sm:$0xf]  ;;  %v2543_v52 = vshrl.u32 %v2494_v58, 16 }
 0x10e   : > { %1176 = vst.msk [vmem:[#allocation2 + $0x28] sm:$0xf] %vm678_vm2, %v882_v5  ;;  %1179 = vst [vmem:[#allocation2 + $0x2c] sm:$0x1] %v1178_v6  ;;  %v1023_v10 = vrot.slane %v1021_v62, 7  ;;  %v1004_v26 = vshrl.u32 %v5073_v2, 16  ;;  %v5074_v45 = vpack.c.bf16 %v667_v3, %v667_v3  ;;  %v4915_v47 = vcombine.low %v1887_v25, %v5698_v63 }
 0x10f   : > { %v1007_v11 = vshll.u32 %v5073_v2, 16  ;;  %v1029_v16 = vshrl.u32 %v5076_v9, 16  ;;  %v1032_v17 = vshll.u32 %v5076_v9, 16  ;;  %v2510_v40 = vld [vmem:[#allocation2 + $0x78] sm:$0xf]  ;;  %v2546_v54 = vshll.u32 %v2494_v58, 16 }
 0x110   : > { %v1026_v21 = vor.u32 %v1024_v0, %v1023_v10  ;;  %v1006_v23 = vrot.slane %v1004_v26, 7  ;;  %v1012_v27 = vshrl.u32 %v5074_v45, 16  ;;  %v1027_v28 = vrot.slane %v1023_v10, 4  ;;  %v5711_v55 = vld [vmem:[#allocation2 + $0x7c] sm:$0xf]  ;;  %3392 = vrot.lane.b32.xlu1 %v4915_v47, %s5384_s14 }
 0x111   : > { %v1031_v29 = vrot.slane %v1029_v16, 7  ;;  %v1015_v53 = vshll.u32 %v5074_v45, 16  ;;  %v1958_v61 = vshrl.u32 %v1887_v25, 16  ;;  %v1961_v39 = vshll.u32 %v1887_v25, 16  ;;  %v1903_v56 = vld [vmem:[#allocation2 + $0x78] sm:$0xf] }
 0x112   : > { %v1237_v15 = vsel %vm5585_vm13, %v1026_v21, %v1236_v12  ;;  %v1009_v31 = vor.u32 %v1007_v11, %v1006_v23  ;;  %v1010_v20 = vrot.slane %v1006_v23, 4  ;;  %v1014_v36 = vrot.slane %v1012_v27, 7  ;;  %v5722_v5 = vld [vmem:[#allocation2 + $0x6c] sm:$0xf]  ;;  %v5726_v9 = vld [vmem:[#allocation2 + $0x10] sm:$0xf] }
 0x113   : > { %1238 = vst [vmem:[#allocation2 + $0x90] sm:$0xf] %v1237_v15  ;;  %v1034_v38 = vor.u32 %v1032_v17, %v1031_v29  ;;  %v1036_v43 = vrot.slane %v1031_v29, 4  ;;  %v2735_v62 = vshrl.u32 %v2510_v40, 16  ;;  %v4970_v0 = vcombine.low %v2510_v40, %v5705_v48  ;;  %v5724_v6 = vld [vmem:[#allocation2 + $0xc] sm:$0xf] }
 0x114   : > { %v1230_v32 = vsel %vm5585_vm13, %v1009_v31, %v1229_v24  ;;  %v1017_v46 = vor.u32 %v1015_v53, %v1014_v36  ;;  %v1019_v33 = vrot.slane %v1014_v36, 4  ;;  %v2738_v2 = vshll.u32 %v2510_v40, 16  ;;  %7891 = vst [vmem:[#allocation3_spill] sm:$0xff] %v5726_v9  ;;  %v5731_v45 = vld [vmem:[#allocation2 + $0x70] sm:$0xf]  ;;  %v5820_v25 = vpop.f32.mrb[12].mxu0 }
 0x115   : > { %1231 = vst [vmem:[#allocation2 + $0x84] sm:$0xf] %v1230_v32  ;;  %v1035_v50 = vsel %vm5603_vm14, %v1027_v28, %v1034_v38  ;;  %v1241_v51 = vsel %vm5613_vm15, %v1036_v43, %v1240_v34  ;;  %v4923_v3 = vcombine.low %v1903_v56, %v5711_v55  ;;  %v5728_v10 = vrot.slane %v2543_v52, 4  ;;  %3662 = vrot.lane.b32.xlu0 %v4970_v0, %s5383_s13  ;;  %v5733_v58 = vld [vmem:[#allocation2 + $0x20] sm:$0x1] }
 0x116   : > { %1239 = vst.msk [vmem:[#allocation2 + $0x94] sm:$0xf] %vm678_vm2, %v1035_v50  ;;  %1242 = vst [vmem:[#allocation2 + $0x98] sm:$0x1] %v1241_v51  ;;  %v1018_v57 = vsel %vm5603_vm14, %v1010_v20, %v1017_v46  ;;  %v1234_v59 = vsel %vm5613_vm15, %v1019_v33, %v1233_v44  ;;  %v2150_v26 = vshrl.u32 %v1903_v56, 16  ;;  %v2153_v11 = vshll.u32 %v1903_v56, 16 }
 0x117   : > { %1232 = vst.msk [vmem:[#allocation2 + $0x88] sm:$0xf] %vm678_vm2, %v1018_v57  ;;  %1235 = vst [vmem:[#allocation2 + $0x8c] sm:$0x1] %v1234_v59  ;;  %v2318_v12 = vld [vmem:[#allocation2 + $0x18] sm:$0xe]  ;;  %3408 = vrot.lane.b32.xlu1 %v4923_v3, %s5384_s14  ;;  %v4914_v29 = vcombine.low %v5724_v6, %v5726_v9  ;;  %v4969_v20 = vcombine.low %v5722_v5, %v5731_v45 }
 0x118   : > { %v5735_v16 = vrot.slane %v2546_v54, 5  ;;  %v5738_v18 = vrot.slane %v1958_v61, 4  ;;  %v5740_v21 = vrot.slane %v1961_v39, 5  ;;  %v5743_v23 = vld [vmem:[#allocation2 + $0x80] sm:$0x1]  ;;  %v5746_v27 = vrot.slane %v2735_v62, 4 }
 0x119   : > { %v2326_v53 = vld [vmem:[#allocation2 + $0x78] sm:$0xe]  ;;  %v5751_v15 = vrot.slane %v2738_v2, 5  ;;  %v2390_v34 = vrot.slane %v5698_v63, 5  ;;  %v5757_v36 = vld [vmem:[#allocation2 + $0x6c] sm:$0xf]  ;;  %3390 = vrot.lane.b32.xlu0 %v4914_v29, %s5384_s14 }
 0x11a   : > { %v5759_v38 = vld [vmem:[#allocation2 + $0x70] sm:$0xf]  ;;  %v5761_v43 = vrot.slane %v2150_v26, 4  ;;  %v5763_v44 = vrot.slane %v2153_v11, 5  ;;  %v5768_v46 = vld [vmem:[#allocation2 + $0x20] sm:$0x1] }
 0x11b   : > { %7892 = vst [vmem:[#allocation4_spill] sm:$0xff] %v5759_v38  ;;  %3660 = vrot.lane.b32.xlu1 %v4969_v20, %s5383_s13  ;;  %v4835_v47 = vrot.slane %v2318_v12, 9  ;;  %v2392_v40 = vrot.slane %v2390_v34, 4  ;;  %v2393_v50 = vrot.slane %v5733_v58, 5  ;;  %v2926_v51 = vld [vmem:[#allocation2 + $0x18] sm:$0xe]  ;;  %v4922_v52 = vcombine.low %v5757_v36, %v5759_v38 }
 0x11c   : > { %v4843_v54 = vrot.slane %v2326_v53, 9  ;;  %v2446_v57 = vrot.slane %v5711_v55, 5  ;;  %v2449_v59 = vrot.slane %v5743_v23, 5  ;;  %v5777_v61 = vld [vmem:[#allocation2 + $0x1c] sm:$0xf]  ;;  %v2992_v0 = vrot.slane %v5689_v4, 5 }
 0x11d   : > { %v2391_v56 = vsel %vm5537_vm6, %v4835_v47, %v2390_v34  ;;  %v2394_v62 = vsel %vm5537_vm6, %v2392_v40, %v2393_v50  ;;  %v1708_v2 = vld [vmem:[#allocation2 + $0x18] sm:$0xe]  ;;  %v5785_v3 = vld [vmem:[#allocation2 + $0x10] sm:$0xf]  ;;  %3406 = vrot.lane.b32.xlu0 %v4922_v52, %s5384_s14  ;;  %v5790_v53 = vld [vmem:[#allocation2 + $0x20] sm:$0x1] }
 0x11e   : > { %7893 = vst [vmem:[#allocation5_spill] sm:$0xff] %v5785_v3  ;;  %v4947_v12 = vcombine.low %v2391_v56, %v2394_v62  ;;  %v2448_v29 = vrot.slane %v2446_v57, 4  ;;  %v4850_v20 = vrot.slane %v2926_v51, 9  ;;  %v2994_v34 = vrot.slane %v2992_v0, 4  ;;  %v5794_v50 = vld [vmem:[#allocation2 + $0x14] sm:$0x1] }
 0x11f   : > { %v2995_v47 = vrot.slane %v5768_v46, 5  ;;  %v1789_v40 = vrot.slane %v5777_v61, 5  ;;  %7894 = vst [vmem:[#allocation6_spill] sm:$0xff] %v5794_v50  ;;  %v2447_v39 = vsel %vm5537_vm6, %v4843_v54, %v2446_v57  ;;  %v4820_v56 = vrot.slane %v1708_v2, 9  ;;  %v1707_v62 = vld [vmem:[#allocation2 + $0xc] sm:$0xe] }
 0x120   : > { %3552 = vrot.lane.b32.xlu1 %v4947_v12, %s5385_s15  ;;  %v2450_v52 = vsel %vm5537_vm6, %v2448_v29, %v2449_v59  ;;  %v1782_v51 = vrot.slane %v5785_v3, 5  ;;  %v5802_v33 = vld [vmem:[#allocation2 + $0x80] sm:$0x1]  ;;  %v2993_v28 = vsel %vm5537_vm6, %v4850_v20, %v2992_v0  ;;  %v1792_v12 = vrot.slane %v5790_v53, 5  ;;  %v5809_v24 = vld [vmem:[#allocation2 + $0x70] sm:$0xf] }
 0x121   : > { %7895 = vst [vmem:[#allocation7_spill] sm:$0xff] %v5802_v33  ;;  %v2996_v17 = vsel %vm5537_vm6, %v2994_v34, %v2995_v47  ;;  %v1791_v31 = vrot.slane %v1789_v40, 4  ;;  %7896 = vst [vmem:[#allocation8_spill] sm:$0xff] %v5809_v24  ;;  %v5811_v54 = vld [vmem:[#allocation2 + $0x74] sm:$0x1]  ;;  %v4955_v57 = vcombine.low %v2447_v39, %v2450_v52  ;;  %v1785_v29 = vrot.slane %v5794_v50, 5 }
 0x122   : > { %7897 = vst [vmem:[#allocation9_spill] sm:$0xff] %v5811_v54  ;;  %v4994_v59 = vcombine.low %v2993_v28, %v2996_v17  ;;  %v1784_v2 = vrot.slane %v1782_v51, 4  ;;  %v2934_v11 = vld [vmem:[#allocation2 + $0x78] sm:$0xe]  ;;  %v1715_v26 = vld [vmem:[#allocation2 + $0x6c] sm:$0xe]  ;;  %v1790_v17 = vsel %vm5537_vm6, %v4820_v56, %v1789_v40 }
 0x123   : > { %v1793_v0 = vsel %vm5537_vm6, %v1791_v31, %v1792_v12  ;;  %v4819_v20 = vrot.slane %v1707_v62, 9  ;;  %v3048_v34 = vrot.slane %v5705_v48, 5  ;;  %v3051_v47 = vrot.slane %v5802_v33, 5  ;;  %v5818_v32 = vld [vmem:[#allocation2 + $0x7c] sm:$0xf]  ;;  %7898 = vst [vmem:[#allocation10_spill] sm:$0xff] %v5820_v25 }
 0x124   : > { %3568 = vrot.lane.b32.xlu1 %v4955_v57, %s5385_s15  ;;  %3806 = vrot.lane.b32.xlu0 %v4994_v59, %s5386_s16  ;;  %v1786_v28 = vsel %vm5537_vm6, %v1784_v2, %v1785_v29  ;;  %v1838_v31 = vrot.slane %v5809_v24, 5  ;;  %v1841_v39 = vrot.slane %v5811_v54, 5  ;;  %v5830_v52 = vld [vmem:[#allocation2 + $0x80] sm:$0x1]  ;;  %v4858_v12 = vrot.slane %v2934_v11, 9 }
 0x125   : > { %v1783_v62 = vsel %vm5537_vm6, %v4819_v20, %v1782_v51  ;;  %v3050_v57 = vrot.slane %v3048_v34, 4  ;;  %v4827_v25 = vrot.slane %v1715_v26, 9  ;;  %v4900_v50 = vcombine.low %v1790_v17, %v1793_v0  ;;  %v1716_v33 = vld [vmem:[#allocation2 + $0x78] sm:$0xe]  ;;  %v5852_v17 = vpop.f32.mrb[13].mxu0 }
 0x126   : > { %v4899_v59 = vcombine.low %v1783_v62, %v1786_v28  ;;  %v1840_v3 = vrot.slane %v1838_v31, 4  ;;  %v1845_v40 = vrot.slane %v5818_v32, 5  ;;  %v2126_v56 = vshrl.u32 %v5757_v36, 16  ;;  %7901 = vst [vmem:[#allocation11_spill] sm:$0xff] %v5852_v17  ;;  %v5868_v17 = vld [vmem:[#allocation2 + $0x14] sm:$0x1] }
 0x127   : > { %v2129_v2 = vshll.u32 %v5757_v36, 16  ;;  %v3052_v29 = vsel %vm5537_vm6, %v3050_v57, %v3051_v47  ;;  %v1848_v54 = vrot.slane %v5830_v52, 5  ;;  %v7899_v51 = vshrl.u32 %v5722_v5, 16  ;;  %7907 = vst [vmem:[#allocation15_spill] sm:$0xff] %v5868_v17 }
 0x128   : > { %v7900_v26 = vshll.u32 %v5722_v5, 16  ;;  %3298 = vrot.lane.b32.xlu0 %v4900_v50, %s5381_s9  ;;  %3296 = vrot.lane.b32.xlu1 %v4899_v59, %s5381_s9  ;;  %v1842_v36 = vsel %vm5537_vm6, %v1840_v3, %v1841_v39  ;;  %v1847_v20 = vrot.slane %v1845_v40, 4  ;;  %v7902_v47 = vshrl.u32 %v5724_v6, 16  ;;  %v1891_v50 = vld [vmem:[#allocation2 + $0x30] sm:$0xf] }
 0x129   : > { %v5842_v11 = vrot.slane %v7899_v51, 4  ;;  %v3049_v62 = vsel %vm5537_vm6, %v4858_v12, %v3048_v34  ;;  %v1839_v5 = vsel %vm5537_vm6, %v4827_v25, %v1838_v31  ;;  %v4828_v57 = vrot.slane %v1716_v33, 9  ;;  %v5862_v51 = vld [vmem:[#allocation2 + $0x34] sm:$0xf]  ;;  %v2317_v31 = vld [vmem:[#allocation2 + $0xc] sm:$0xe] }
 0x12a   : > { %v5846_v0 = vrot.slane %v7900_v26, 5  ;;  %v5856_v28 = vrot.slane %v7902_v47, 4  ;;  %7904 = vst [vmem:[#allocation13_spill] sm:$0xff] %v5862_v51  ;;  %v7905_v59 = vshll.u32 %v5724_v6, 16  ;;  %v5002_v39 = vcombine.low %v3049_v62, %v3052_v29  ;;  %v5881_v62 = vld [vmem:[#allocation2 + $0x74] sm:$0x1] }
 0x12b   : > { %v4907_v26 = vcombine.low %v1839_v5, %v1842_v36  ;;  %v2383_v47 = vrot.slane %v5726_v9, 5  ;;  %v5873_v34 = vrot.slane %v2129_v2, 5  ;;  %v1849_v33 = vsel %vm5537_vm6, %v1847_v20, %v1848_v54  ;;  %v1907_v54 = vld [vmem:[#allocation2 + $0x90] sm:$0xf]  ;;  %v2325_v9 = vld [vmem:[#allocation2 + $0x6c] sm:$0xe] }
 0x12c   : > { %7903 = vst [vmem:[#allocation12_spill] sm:$0xff] %v5856_v28  ;;  %v5866_v3 = vrot.slane %v7905_v59, 5  ;;  %v5871_v28 = vrot.slane %v2126_v56, 4  ;;  %3822 = vrot.lane.b32.xlu0 %v5002_v39, %s5386_s16  ;;  %v2006_v6 = vshrl.u32 %v1891_v50, 16  ;;  %v2009_v12 = vshll.u32 %v1891_v50, 16 }
 0x12d   : > { %7909 = vst [vmem:[#allocation17_spill] sm:$0xff] %v5873_v34  ;;  %3312 = vrot.lane.b32.xlu1 %v4907_v26, %s5381_s9  ;;  %v2385_v36 = vrot.slane %v2383_v47, 4  ;;  %v1846_v56 = vsel %vm5537_vm6, %v4828_v57, %v1845_v40  ;;  %v4917_v2 = vcombine.low %v1891_v50, %v5862_v51  ;;  %v2386_v5 = vrot.slane %v5868_v17, 5  ;;  %v2933_v39 = vld [vmem:[#allocation2 + $0x6c] sm:$0xe] }
 0x12e   : > { %7906 = vst [vmem:[#allocation14_spill] sm:$0xff] %v5866_v3  ;;  %7908 = vst [vmem:[#allocation16_spill] sm:$0xff] %v5871_v28  ;;  %v3041_v20 = vrot.slane %v5731_v45, 5  ;;  %v4908_v59 = vcombine.low %v1846_v56, %v1849_v33  ;;  %v1964_v26 = vor.u32 %v5740_v21, %v5738_v18  ;;  %v1967_v29 = vshll.u32 %v5698_v63, 16  ;;  %v5896_v17 = vld [vmem:[#allocation2 + $0x74] sm:$0x1] }
 0x12f   : > { %v7910_v25 = vshrl.u32 %v5698_v63, 16  ;;  %v4834_v28 = vrot.slane %v2317_v31, 9  ;;  %v2387_v40 = vsel %vm5537_vm6, %v2385_v36, %v2386_v5  ;;  %v3044_v50 = vrot.slane %v5881_v62, 5  ;;  %v5900_v33 = vld [vmem:[#allocation2 + $0x94] sm:$0xf]  ;;  %v5907_v3 = vpop.f32.mrb[14].mxu0 }
 0x130   : > { %v3043_v57 = vrot.slane %v3041_v20, 4  ;;  %3314 = vrot.lane.b32.xlu0 %v4908_v59, %s5381_s9  ;;  %v2198_v18 = vshrl.u32 %v1907_v54, 16  ;;  %v1969_v21 = vrot.slane %v1967_v29, 5  ;;  %v1977_v63 = vshll.u32 %v5733_v58, 16  ;;  %7911 = vst [vmem:[#allocation18_spill] sm:$0xff] %v5907_v3 }
 0x131   : > { %v1973_v34 = vrot.slane %v7910_v25, 4  ;;  %3396 = vrot.lane.b32.xlu1 %v4917_v2, %s5384_s14  ;;  %v2439_v25 = vrot.slane %v5759_v38, 5  ;;  %v2384_v31 = vsel %vm5537_vm6, %v4834_v28, %v2383_v47  ;;  %v2201_v36 = vshll.u32 %v1907_v54, 16  ;;  %v5910_v29 = vld [vmem:[#allocation2 + $0x24] sm:$0xf] }
 0x132   : > { %v4925_v56 = vcombine.low %v1907_v54, %v5900_v33  ;;  %v4857_v5 = vrot.slane %v2933_v39, 9  ;;  %v4946_v59 = vcombine.low %v2384_v31, %v2387_v40  ;;  %v1965_v2 = vrot.slane %v1964_v26, 4  ;;  %v1275_v54 = vld [vmem:[#allocation2 + $0x18] sm:$0xf]  ;;  %v5921_v31 = vpop.f32.mrb[15].mxu0 }
 0x133   : > { %v1974_v51 = vor.u32 %v1973_v34, %v1969_v21  ;;  %v2442_v24 = vrot.slane %v5896_v17, 5  ;;  %v5912_v58 = vrot.slane %v2006_v6, 4  ;;  %v5914_v38 = vrot.slane %v2009_v12, 5 }
 0x134   : > { %v3045_v28 = vsel %vm5537_vm6, %v3043_v57, %v3044_v50  ;;  %v2441_v47 = vrot.slane %v2439_v25, 4  ;;  %3550 = vrot.lane.b32.xlu0 %v4946_v59, %s5385_s15  ;;  %v1979_v26 = vrot.slane %v1977_v63, 5  ;;  %v4842_v40 = vrot.slane %v2325_v9, 9 }
 0x135   : > { %3412 = vrot.lane.b32.xlu1 %v4925_v56, %s5384_s14  ;;  %v1975_v34 = vrot.slane %v1974_v51, 4  ;;  %v5923_v6 = vrot.slane %v2198_v18, 4  ;;  %v5925_v12 = vrot.slane %v2201_v36, 5  ;;  %v3042_v57 = vsel %vm5537_vm6, %v4857_v5, %v3041_v20  ;;  %v5940_v5 = vld [vmem:[#allocation2 + $0x28] sm:$0xf] }
 0x136   : > { %v2567_v50 = vshrl.u32 %v5910_v29, 16  ;;  %v5001_v3 = vcombine.low %v3042_v57, %v3045_v28  ;;  %v1970_v59 = vsel %vm5543_vm9, %v1965_v2, %v1969_v21  ;;  %v2443_v9 = vsel %vm5537_vm6, %v2441_v47, %v2442_v24  ;;  %v5949_v47 = vld [vmem:[#allocation2 + $0x30] sm:$0xf] }
 0x137   : > { %v1980_v51 = vsel %vm5543_vm9, %v1975_v34, %v1979_v26  ;;  %v1371_v18 = vshrl.u32 %v1275_v54, 16  ;;  %v1374_v56 = vshll.u32 %v1275_v54, 16  ;;  %v1380_v36 = vshll.u32 %v5777_v61, 16 }
 0x138   : > { %v4931_v63 = vcombine.low %v1970_v59, %v1980_v51  ;;  %3820 = vrot.lane.b32.xlu0 %v5001_v3, %s5386_s16  ;;  %v2440_v20 = vsel %vm5537_vm6, %v4842_v40, %v2439_v25  ;;  %v1384_v21 = vshrl.u32 %v5777_v61, 16  ;;  %v1390_v2 = vshll.u32 %v5790_v53, 16  ;;  %v5952_v40 = vld [vmem:[#allocation2 + $0x34] sm:$0xf] }
 0x139   : > { %v528_v28 = vadd.f32 %v5621_v8, %v5558_v49  ;;  %v5947_v24 = vrot.slane %v2567_v50, 4  ;;  %v1373_v3 = vrot.slane %v1371_v18, 4  ;;  %v1376_v54 = vrot.slane %v1374_v56, 5 }
 0x13a   : > { %3472 = vrot.lane.b32.xlu1 %v4931_v63, %s5387_s17  ;;  %v1382_v34 = vrot.slane %v1380_v36, 5  ;;  %v4954_v25 = vcombine.low %v2440_v20, %v2443_v9  ;;  %v2570_v26 = vshll.u32 %v5910_v29, 16  ;;  %v1386_v61 = vrot.slane %v1384_v21, 4  ;;  %v5963_v36 = vld [vmem:[#allocation2 + $0x90] sm:$0xf] }
 0x13b   : > { %v624_v53 = vmax.f32 %v528_v28, 0.0  ;;  %v4963_v8 = vcombine.low %v5910_v29, %v5940_v5  ;;  %v4964_v57 = vcombine.low %v5949_v47, %v5952_v40  ;;  %v1377_v50 = vor.u32 %v1376_v54, %v1373_v3 }
 0x13c   : > { %v1392_v59 = vrot.slane %v1390_v2, 5  ;;  %3566 = vrot.lane.b32.xlu0 %v4954_v25, %s5385_s15  ;;  %v1387_v51 = vor.u32 %v1386_v61, %v1382_v34  ;;  %v2156_v9 = vor.u32 %v5763_v44, %v5761_v43  ;;  %v2159_v18 = vshll.u32 %v5711_v55, 16  ;;  %v5970_v25 = vld [vmem:[#allocation2 + $0x94] sm:$0xf] }
 0x13d   : > { %v656_v63 = vmin.f32 %v624_v53, 6.0  ;;  %v1378_v56 = vrot.slane %v1377_v50, 4  ;;  %v7912_v20 = vshrl.u32 %v5711_v55, 16  ;;  %v2169_v28 = vshll.u32 %v5743_v23, 16  ;;  %7913 = vst [vmem:[#allocation19_spill] sm:$0xff] %v5970_v25 }
 0x13e   : > { %3648 = vrot.lane.b32.xlu1 %v4963_v8, %s5383_s13  ;;  %v520_v2 = vadd.f32 %v5558_v49, %v5627_v13  ;;  %v1388_v3 = vrot.slane %v1387_v51, 4  ;;  %v2157_v43 = vrot.slane %v2156_v9, 4  ;;  %v2161_v44 = vrot.slane %v2159_v18, 5 }
 0x13f   : > { %v2165_v21 = vrot.slane %v7912_v20, 4  ;;  %v5063_v54 = vpack.c.bf16 %v656_v63, %v656_v63  ;;  %v1383_v61 = vsel %vm5543_vm9, %v1378_v56, %v1382_v34  ;;  %v4972_v53 = vcombine.low %v5963_v36, %v5970_v25 }
 0x140   : > { %v622_v8 = vmax.f32 %v520_v2, 0.0  ;;  %v531_v55 = vadd.f32 %v5638_v22, %v5558_v49  ;;  %3650 = vrot.lane.b32.xlu0 %v4964_v57, %s5383_s13  ;;  %v1393_v13 = vsel %vm5543_vm9, %v1388_v3, %v1392_v59  ;;  %v2171_v51 = vrot.slane %v2169_v28, 5  ;;  %v1194_v57 = vld [vmem:[#allocation2 + $0x48] sm:$0xf] }
 0x141   : > { %v919_v23 = vshrl.u32 %v5063_v54, 16  ;;  %v922_v50 = vshll.u32 %v5063_v54, 16  ;;  %v4884_v63 = vcombine.low %v1383_v61, %v1393_v13  ;;  %v2166_v9 = vor.u32 %v2165_v21, %v2161_v44 }
 0x142   : > { %v654_v18 = vmin.f32 %v622_v8, 6.0  ;;  %v625_v20 = vmax.f32 %v531_v55, 0.0  ;;  %v2162_v56 = vsel %vm5543_vm9, %v2157_v43, %v2161_v44  ;;  %v523_v2 = vadd.f32 %v5558_v49, %v5645_v30 }
 0x143   : > { %v921_v34 = vrot.slane %v919_v23, 7  ;;  %v592_v22 = vadd.f32 %v5629_v14, %v5558_v49  ;;  %3218 = vrot.lane.b32.xlu1 %v4884_v63, %s5382_s10  ;;  %v2167_v59 = vrot.slane %v2166_v9, 4  ;;  %v2549_v21 = vor.u32 %v5735_v16, %v5728_v10  ;;  %v1187_v9 = vld [vmem:[#allocation2 + $0x3c] sm:$0xf] }
 0x144   : > { %v5061_v3 = vpack.c.bf16 %v654_v18, %v654_v18  ;;  %v657_v28 = vmin.f32 %v625_v20, 6.0  ;;  %3666 = vrot.lane.b32.xlu0 %v4972_v53, %s5383_s13  ;;  %v623_v61 = vmax.f32 %v523_v2, 0.0  ;;  %v2552_v44 = vshll.u32 %v5689_v4, 16 }
 0x145   : > { %v924_v54 = vor.u32 %v922_v50, %v921_v34  ;;  %v640_v43 = vmax.f32 %v592_v22, 0.0  ;;  %v2172_v30 = vsel %vm5543_vm9, %v2167_v59, %v2171_v51  ;;  %v7914_v2 = vshrl.u32 %v5689_v4, 16 }
 0x146   : > { %v902_v49 = vshrl.u32 %v5061_v3, 16  ;;  %v905_v14 = vshll.u32 %v5061_v3, 16  ;;  %v5064_v8 = vpack.c.bf16 %v657_v28, %v657_v28  ;;  %v4939_v13 = vcombine.low %v2162_v56, %v2172_v30  ;;  %v6000_v28 = vpop.f32.mrb[12].mxu1 }
 0x147   : > { %v1195_v55 = vsel %vm5585_vm13, %v924_v54, %v1194_v57  ;;  %v655_v23 = vmin.f32 %v623_v61, 6.0  ;;  %v672_v63 = vmin.f32 %v640_v43, 6.0  ;;  %v2554_v20 = vrot.slane %v2552_v44, 5  ;;  %7915 = vst [vmem:[#allocation20_spill] sm:$0xff] %v6000_v28  ;;  %v1198_v54 = vld [vmem:[#allocation2 + $0x50] sm:$0x1] }
 0x148   : > { %1196 = vst [vmem:[#allocation2 + $0x48] sm:$0xf] %v1195_v55  ;;  %v904_v16 = vrot.slane %v902_v49, 7  ;;  %v927_v53 = vshrl.u32 %v5064_v8, 16  ;;  %v930_v50 = vshll.u32 %v5064_v8, 16  ;;  %3488 = vrot.lane.b32.xlu1 %v4939_v13, %s5387_s17  ;;  %v2558_v22 = vrot.slane %v7914_v2, 4 }
 0x149   : > { %v5062_v18 = vpack.c.bf16 %v655_v23, %v655_v23  ;;  %v5079_v51 = vpack.c.bf16 %v672_v63, %v672_v63  ;;  %v925_v59 = vrot.slane %v921_v34, 4  ;;  %v2550_v3 = vrot.slane %v2549_v21, 4  ;;  %v1279_v28 = vld [vmem:[#allocation2 + $0x30] sm:$0xf] }
 0x14a   : > { %v907_v57 = vor.u32 %v905_v14, %v904_v16  ;;  %v929_v56 = vrot.slane %v927_v53, 7  ;;  %v2562_v44 = vshll.u32 %v5768_v46, 16  ;;  %v908_v4 = vrot.slane %v904_v16, 4 }
 0x14b   : > { %v910_v61 = vshrl.u32 %v5062_v18, 16  ;;  %v913_v43 = vshll.u32 %v5062_v18, 16  ;;  %v1055_v30 = vshrl.u32 %v5079_v51, 16  ;;  %v1058_v49 = vshll.u32 %v5079_v51, 16  ;;  %v1250_v18 = vld [vmem:[#allocation2 + $0xa8] sm:$0xf] }
 0x14c   : > { %v1188_v8 = vsel %vm5585_vm13, %v907_v57, %v1187_v9  ;;  %v932_v55 = vor.u32 %v930_v50, %v929_v56  ;;  %v934_v13 = vrot.slane %v929_v56, 4  ;;  %v2559_v21 = vor.u32 %v2558_v22, %v2554_v20  ;;  %v1191_v50 = vld [vmem:[#allocation2 + $0x44] sm:$0x1] }
 0x14d   : > { %1189 = vst [vmem:[#allocation2 + $0x3c] sm:$0xf] %v1188_v8  ;;  %v912_v34 = vrot.slane %v910_v61, 7  ;;  %v6005_v14 = vrot.slane %v1055_v30, 7  ;;  %v2591_v23 = vshrl.u32 %v5949_v47, 16  ;;  %v2594_v63 = vshll.u32 %v5949_v47, 16 }
 0x14e   : > { %v933_v53 = vsel %vm5603_vm14, %v925_v59, %v932_v55  ;;  %v1199_v9 = vsel %vm5613_vm15, %v934_v13, %v1198_v54  ;;  %v6015_v46 = vrot.slane %v2570_v26, 5  ;;  %v6019_v47 = vld [vmem:[#allocation2 + $0x84] sm:$0xf]  ;;  %v2555_v59 = vsel %vm5543_vm9, %v2550_v3, %v2554_v20  ;;  %v6024_v54 = vld [vmem:[#allocation2 + $0x88] sm:$0xf]  ;;  %v6034_v30 = vpop.f32.mrb[13].mxu1 }
 0x14f   : > { %1197 = vst.msk [vmem:[#allocation2 + $0x4c] sm:$0xf] %vm678_vm2, %v933_v53  ;;  %1200 = vst [vmem:[#allocation2 + $0x50] sm:$0x1] %v1199_v9  ;;  %v915_v16 = vor.u32 %v913_v43, %v912_v34  ;;  %v917_v51 = vrot.slane %v912_v34, 4  ;;  %v1060_v2 = vor.u32 %v1058_v49, %v6005_v14  ;;  %v2560_v57 = vrot.slane %v2559_v21, 4 }
 0x150   : > { %v2564_v56 = vrot.slane %v2562_v44, 5  ;;  %v4971_v43 = vcombine.low %v6019_v47, %v6024_v54  ;;  %7916 = vst [vmem:[#allocation21_spill] sm:$0xff] %v6034_v30  ;;  %v6042_v3 = vld [vmem:[%s7851_s2] ss:$0 sm:$0xff]  ;;  %v1291_v13 = vld [vmem:[#allocation2 + $0x78] sm:$0xf] }
 0x151   : > { %v916_v29 = vsel %vm5603_vm14, %v908_v4, %v915_v16  ;;  %v1192_v26 = vsel %vm5613_vm15, %v917_v51, %v1191_v50  ;;  %v1251_v61 = vsel %vm5585_vm13, %v1060_v2, %v1250_v18  ;;  %v584_v49 = vadd.f32 %v6042_v3, %v5640_v19  ;;  %v6050_v44 = vpop.f32.mrb[14].mxu1  ;;  %v6058_v9 = vld [vmem:[#allocation2 + $0x24] sm:$0xf] }
 0x152   : > { %1190 = vst.msk [vmem:[#allocation2 + $0x40] sm:$0xf] %vm678_vm2, %v916_v29  ;;  %1193 = vst [vmem:[#allocation2 + $0x44] sm:$0x1] %v1192_v26  ;;  %v2565_v20 = vsel %vm5543_vm9, %v2560_v57, %v2564_v56  ;;  %v595_v8 = vadd.f32 %v6042_v3, %v5647_v7  ;;  %v587_v55 = vadd.f32 %v6042_v3, %v5649_v35  ;;  %v6052_v4 = vrot.slane %v2591_v23, 4 }
 0x153   : > { %1252 = vst [vmem:[#allocation2 + $0xa8] sm:$0xf] %v1251_v61  ;;  %7917 = vst [vmem:[#allocation22_spill] sm:$0xff] %v6050_v44  ;;  %v6054_v34 = vrot.slane %v2594_v63, 5  ;;  %v2783_v21 = vshrl.u32 %v5963_v36, 16  ;;  %v4978_v53 = vcombine.low %v2555_v59, %v2565_v20  ;;  %3664 = vrot.lane.b32.xlu1 %v4971_v43, %s5383_s13  ;;  %v638_v7 = vmax.f32 %v584_v49, 0.0 }
 0x154   : > { %v641_v50 = vmax.f32 %v595_v8, 0.0  ;;  %v639_v18 = vmax.f32 %v587_v55, 0.0  ;;  %v6061_v35 = vld [vmem:[#allocation2 + $0x28] sm:$0xf]  ;;  %v1563_v16 = vshrl.u32 %v1291_v13, 16  ;;  %v1566_v51 = vshll.u32 %v1291_v13, 16 }
 0x155   : > { %3726 = vrot.lane.b32.xlu0 %v4978_v53, %s5388_s20  ;;  %v4916_v63 = vcombine.low %v6058_v9, %v6061_v35  ;;  %v670_v2 = vmin.f32 %v638_v7, 6.0  ;;  %v1572_v56 = vshll.u32 %v5818_v32, 16  ;;  %v1576_v61 = vshrl.u32 %v5818_v32, 16 }
 0x156   : > { %v673_v59 = vmin.f32 %v641_v50, 6.0  ;;  %v671_v57 = vmin.f32 %v639_v18, 6.0  ;;  %v1565_v29 = vrot.slane %v1563_v16, 4  ;;  %v1568_v26 = vrot.slane %v1566_v51, 5  ;;  %v6707_v60 = vld [vmem:[#allocation2 + $0x50] sm:$0x1] }
 0x157   : > { %v1582_v43 = vshll.u32 %v5830_v52, 16  ;;  %v5077_v20 = vpack.c.bf16 %v670_v2, %v670_v2  ;;  %v1574_v55 = vrot.slane %v1572_v56, 5  ;;  %v1061_v53 = vrot.slane %v6005_v14, 4  ;;  %v6072_v52 = vpop.f32.mrb[15].mxu1  ;;  %v1254_v56 = vld [vmem:[#allocation2 + $0xb0] sm:$0x1] }
 0x158   : > { %v5080_v49 = vpack.c.bf16 %v673_v59, %v673_v59  ;;  %v5078_v8 = vpack.c.bf16 %v671_v57, %v671_v57  ;;  %v1569_v13 = vor.u32 %v1568_v26, %v1565_v29  ;;  %v1578_v7 = vrot.slane %v1576_v61, 4  ;;  %7918 = vst [vmem:[#allocation23_spill] sm:$0xff] %v6072_v52  ;;  %v1243_v59 = vld [vmem:[#allocation2 + $0x9c] sm:$0xf] }
 0x159   : > { %3394 = vrot.lane.b32.xlu0 %v4916_v63, %s5384_s14  ;;  %v1584_v50 = vrot.slane %v1582_v43, 5  ;;  %v1038_v18 = vshrl.u32 %v5077_v20, 16  ;;  %v1041_v22 = vshll.u32 %v5077_v20, 16  ;;  %v2741_v14 = vor.u32 %v5751_v15, %v5746_v27 }
 0x15a   : > { %v1063_v10 = vshrl.u32 %v5080_v49, 16  ;;  %v1066_v16 = vshll.u32 %v5080_v49, 16  ;;  %v1046_v51 = vshrl.u32 %v5078_v8, 16  ;;  %v1049_v39 = vshll.u32 %v5078_v8, 16 }
 0x15b   : > { %v1570_v32 = vrot.slane %v1569_v13, 4  ;;  %v1579_v23 = vor.u32 %v1578_v7, %v1574_v55  ;;  %v1040_v2 = vrot.slane %v1038_v18, 7  ;;  %v2744_v63 = vshll.u32 %v5705_v48, 16  ;;  %v1247_v18 = vld [vmem:[#allocation2 + $0xa4] sm:$0x1] }
 0x15c   : > { %v1065_v57 = vrot.slane %v1063_v10, 7  ;;  %v1048_v29 = vrot.slane %v1046_v51, 7  ;;  %v7919_v43 = vshrl.u32 %v5705_v48, 16 }
 0x15d   : > { %v1575_v26 = vsel %vm5543_vm9, %v1570_v32, %v1574_v55  ;;  %v1580_v61 = vrot.slane %v1579_v23, 4  ;;  %v1043_v49 = vor.u32 %v1041_v22, %v1040_v2  ;;  %v1044_v8 = vrot.slane %v1040_v2, 4 }
 0x15e   : > { %v2750_v20 = vrot.slane %v7919_v43, 4  ;;  %v1068_v13 = vor.u32 %v1066_v16, %v1065_v57  ;;  %v1070_v7 = vrot.slane %v1065_v57, 4  ;;  %v1051_v10 = vor.u32 %v1049_v39, %v1048_v29  ;;  %v7931_v43 = vld [vmem:[#allocation3_spill] sm:$0xff] }
 0x15f   : > { %v1053_v19 = vrot.slane %v1048_v29, 4  ;;  %v1585_v27 = vsel %vm5543_vm9, %v1580_v61, %v1584_v50  ;;  %v2746_v15 = vrot.slane %v2744_v63, 5  ;;  %v1244_v51 = vsel %vm5585_vm13, %v1043_v49, %v1243_v59  ;;  %v1289_v61 = vld [vmem:[#allocation2 + $0x6c] sm:$0xf]  ;;  %v6112_v49 = vld [vmem:[#allocation2 + $0x84] sm:$0xf] }
 0x160   : > { %v1069_v23 = vsel %vm5603_vm14, %v1061_v53, %v1068_v13  ;;  %v1255_v48 = vsel %vm5613_vm15, %v1070_v7, %v1254_v56  ;;  %v4892_v22 = vcombine.low %v1575_v26, %v1585_v27  ;;  %1245 = vst [vmem:[#allocation2 + $0x9c] sm:$0xf] %v1244_v51  ;;  %v1052_v39 = vsel %vm5603_vm14, %v1044_v8, %v1051_v10  ;;  %v7920_v53 = vld [vmem:[#allocation7_spill] sm:$0xff]  ;;  %v6121_v7 = vld [vmem:[#allocation2 + $0x88] sm:$0xf] }
 0x161   : > { %1253 = vst.msk [vmem:[#allocation2 + $0xac] sm:$0xf] %vm678_vm2, %v1069_v23  ;;  %1256 = vst [vmem:[#allocation2 + $0xb0] sm:$0x1] %v1255_v48  ;;  %v1248_v55 = vsel %vm5613_vm15, %v1053_v19, %v1247_v18  ;;  %v2742_v50 = vrot.slane %v2741_v14, 4  ;;  %v2751_v16 = vor.u32 %v2750_v20, %v2746_v15  ;;  %v2754_v32 = vshll.u32 %v7920_v53, 16 }
 0x162   : > { %1246 = vst.msk [vmem:[#allocation2 + $0xa0] sm:$0xf] %vm678_vm2, %v1052_v39  ;;  %1249 = vst [vmem:[#allocation2 + $0xa4] sm:$0x1] %v1248_v55  ;;  %3234 = vrot.lane.b32.xlu1 %v4892_v22, %s5382_s10  ;;  %v2717_v2 = vor.u32 %v5846_v0, %v5842_v11  ;;  %v2720_v59 = vshll.u32 %v5731_v45, 16  ;;  %v7921_v57 = vshrl.u32 %v5731_v45, 16  ;;  %v4924_v10 = vcombine.low %v6112_v49, %v6121_v7 }
 0x163   : > { %v6104_v19 = vrot.slane %v2783_v21, 4  ;;  %v7922_v14 = vshll.u32 %v5963_v36, 16  ;;  %v2752_v29 = vrot.slane %v2751_v16, 4  ;;  %v2730_v26 = vshll.u32 %v5881_v62, 16  ;;  %v2320_v51 = vld [vmem:[#allocation2 + $0x30] sm:$0xe] }
 0x164   : > { %v2726_v63 = vrot.slane %v7921_v57, 4  ;;  %v2756_v11 = vrot.slane %v2754_v32, 5  ;;  %v2718_v0 = vrot.slane %v2717_v2, 4  ;;  %v2722_v20 = vrot.slane %v2720_v59, 5  ;;  %v7924_v22 = vld [vmem:[#allocation8_spill] sm:$0xff]  ;;  %v7925_v32 = vld [vmem:[#allocation9_spill] sm:$0xff] }
 0x165   : > { %v6108_v56 = vrot.slane %v7922_v14, 5  ;;  %v7923_v45 = vshrl.u32 %v6019_v47, 16  ;;  %v2747_v36 = vsel %vm5543_vm9, %v2742_v50, %v2746_v15  ;;  %v2732_v13 = vrot.slane %v2730_v26, 5  ;;  %v1273_v16 = vld [vmem:[#allocation2 + $0xc] sm:$0xf] }
 0x166   : > { %v2757_v62 = vsel %vm5543_vm9, %v2752_v29, %v2756_v11  ;;  %v2727_v18 = vor.u32 %v2726_v63, %v2722_v20  ;;  %v1539_v27 = vshrl.u32 %v1289_v61, 16  ;;  %v1542_v48 = vshll.u32 %v1289_v61, 16  ;;  %v6132_v59 = vld [vmem:[#allocation2 + $0x38] sm:$0x1]  ;;  %v7926_v29 = vld [vmem:[#allocation13_spill] sm:$0xff] }
 0x167   : > { %v6116_v8 = vrot.slane %v7923_v45, 4  ;;  %v4986_v23 = vcombine.low %v2747_v36, %v2757_v62  ;;  %v1548_v39 = vshll.u32 %v7924_v22, 16  ;;  %v1552_v55 = vshrl.u32 %v7924_v22, 16  ;;  %v7935_v21 = vld [vmem:[#allocation17_spill] sm:$0xff] }
 0x168   : > { %v2723_v15 = vsel %vm5543_vm9, %v2718_v0, %v2722_v20  ;;  %v2728_v50 = vrot.slane %v2727_v18, 4  ;;  %v1541_v53 = vrot.slane %v1539_v27, 4  ;;  %v1558_v2 = vshll.u32 %v7925_v32, 16  ;;  %v2328_v27 = vld [vmem:[#allocation2 + $0x90] sm:$0xe] }
 0x169   : > { %3742 = vrot.lane.b32.xlu0 %v4986_v23, %s5388_s20  ;;  %v1544_v57 = vrot.slane %v1542_v48, 5  ;;  %v1550_v63 = vrot.slane %v1548_v39, 5  ;;  %v1554_v14 = vrot.slane %v1552_v55, 4  ;;  %v2404_v26 = vrot.slane %v7926_v29, 5  ;;  %v7927_v48 = vld [vmem:[#allocation5_spill] sm:$0xff] }
 0x16a   : > { %v2733_v61 = vsel %vm5543_vm9, %v2728_v50, %v2732_v13  ;;  %v1560_v11 = vrot.slane %v1558_v2, 5  ;;  %v4837_v45 = vrot.slane %v2320_v51, 9  ;;  %v1347_v36 = vshrl.u32 %v1273_v16, 16  ;;  %v7928_v50 = vld [vmem:[#allocation6_spill] sm:$0xff] }
 0x16b   : > { %v4985_v0 = vcombine.low %v2723_v15, %v2733_v61  ;;  %v1545_v20 = vor.u32 %v1544_v57, %v1541_v53  ;;  %v1555_v62 = vor.u32 %v1554_v14, %v1550_v63  ;;  %v2407_v18 = vrot.slane %v6132_v59, 5  ;;  %v6146_v14 = vld [vmem:[#allocation2 + $0x98] sm:$0x1] }
 0x16c   : > { %v2406_v22 = vrot.slane %v2404_v26, 4  ;;  %v1349_v32 = vrot.slane %v1347_v36, 4  ;;  %v1350_v23 = vshll.u32 %v1273_v16, 16  ;;  %v1356_v39 = vshll.u32 %v7927_v48, 16 }
 0x16d   : > { %3740 = vrot.lane.b32.xlu1 %v4985_v0, %s5388_s20  ;;  %3410 = vrot.lane.b32.xlu0 %v4924_v10, %s5384_s14  ;;  %v1546_v55 = vrot.slane %v1545_v20, 4  ;;  %v1556_v13 = vrot.slane %v1555_v62, 4  ;;  %v1360_v51 = vshrl.u32 %v7927_v48, 16  ;;  %v1366_v15 = vshll.u32 %v7928_v50, 16 }
 0x16e   : > { %v2405_v53 = vsel %vm5537_vm6, %v4837_v45, %v2404_v26  ;;  %v1352_v2 = vrot.slane %v1350_v23, 5  ;;  %v1358_v57 = vrot.slane %v1356_v39, 5  ;;  %v4845_v16 = vrot.slane %v2328_v27, 9  ;;  %v7929_v39 = vld [vmem:[#allocation12_spill] sm:$0xff]  ;;  %v7930_v27 = vld [vmem:[#allocation14_spill] sm:$0xff] }
 0x16f   : > { %v1551_v61 = vsel %vm5543_vm9, %v1546_v55, %v1550_v63  ;;  %v1561_v10 = vsel %vm5543_vm9, %v1556_v13, %v1560_v11  ;;  %v2408_v36 = vsel %vm5537_vm6, %v2406_v22, %v2407_v18  ;;  %v1362_v0 = vrot.slane %v1360_v51, 4  ;;  %v1709_v55 = vld [vmem:[#allocation2 + $0x24] sm:$0xe] }
 0x170   : > { %v4891_v20 = vcombine.low %v1551_v61, %v1561_v10  ;;  %v1353_v62 = vor.u32 %v1352_v2, %v1349_v32  ;;  %v1368_v48 = vrot.slane %v1366_v15, 5  ;;  %v2460_v26 = vrot.slane %v5900_v33, 5  ;;  %v7933_v61 = vld [vmem:[#allocation15_spill] sm:$0xff] }
 0x171   : > { %v1363_v45 = vor.u32 %v1362_v0, %v1358_v57  ;;  %v2463_v23 = vrot.slane %v6146_v14, 5  ;;  %v1940_v50 = vor.u32 %v7930_v27, %v7929_v39  ;;  %v1943_v63 = vshll.u32 %v7931_v43, 16  ;;  %v6165_v0 = vld [vmem:[#allocation2 + $0x28] sm:$0xf] }
 0x172   : > { %3232 = vrot.lane.b32.xlu1 %v4891_v20, %s5382_s10  ;;  %v1354_v11 = vrot.slane %v1353_v62, 4  ;;  %v2461_v18 = vsel %vm5537_vm6, %v4845_v16, %v2460_v26  ;;  %v2462_v22 = vrot.slane %v2460_v26, 4  ;;  %v7932_v32 = vshrl.u32 %v7931_v43, 16  ;;  %v6169_v20 = vld [vmem:[#allocation2 + $0x2c] sm:$0x1] }
 0x173   : > { %v1364_v51 = vrot.slane %v1363_v45, 4  ;;  %v1941_v15 = vrot.slane %v1940_v50, 4  ;;  %v1945_v2 = vrot.slane %v1943_v63, 5  ;;  %v1953_v10 = vshll.u32 %v7933_v61, 16  ;;  %v1717_v63 = vld [vmem:[#allocation2 + $0x84] sm:$0xe] }
 0x174   : > { %v1949_v13 = vrot.slane %v7932_v32, 4  ;;  %v4949_v39 = vcombine.low %v2405_v53, %v2408_v36  ;;  %v2464_v27 = vsel %vm5537_vm6, %v2462_v22, %v2463_v23  ;;  %v4821_v62 = vrot.slane %v1709_v55, 9  ;;  %v7934_v61 = vld [vmem:[#allocation16_spill] sm:$0xff] }
 0x175   : > { %v1796_v16 = vrot.slane %v6165_v0, 5  ;;  %v1359_v43 = vsel %vm5543_vm9, %v1354_v11, %v1358_v57  ;;  %v1369_v26 = vsel %vm5543_vm9, %v1364_v51, %v1368_v48  ;;  %v4957_v45 = vcombine.low %v2461_v18, %v2464_v27  ;;  %v7936_v11 = vld [vmem:[#allocation4_spill] sm:$0xff]  ;;  %v6183_v48 = vld [vmem:[#allocation2 + $0x88] sm:$0xf] }
 0x176   : > { %v1950_v50 = vor.u32 %v1949_v13, %v1945_v2  ;;  %3556 = vrot.lane.b32.xlu1 %v4949_v39, %s5385_s15  ;;  %v4883_v53 = vcombine.low %v1359_v43, %v1369_v26  ;;  %v1946_v36 = vsel %vm5543_vm9, %v1941_v15, %v1945_v2  ;;  %v1955_v23 = vrot.slane %v1953_v10, 5  ;;  %v6190_v15 = vld [vmem:[#allocation2 + $0x8c] sm:$0x1]  ;;  %v6198_v26 = vld [vmem:[#allocation2 + $0x38] sm:$0x1] }
 0x177   : > { %v1798_v22 = vrot.slane %v1796_v16, 4  ;;  %v1799_v32 = vrot.slane %v6169_v20, 5  ;;  %v2132_v57 = vor.u32 %v7935_v21, %v7934_v61  ;;  %v2135_v52 = vshll.u32 %v7936_v11, 16 }
 0x178   : > { %v1951_v55 = vrot.slane %v1950_v50, 4  ;;  %3216 = vrot.lane.b32.xlu0 %v4883_v53, %s5382_s10  ;;  %v1797_v18 = vsel %vm5537_vm6, %v4821_v62, %v1796_v16  ;;  %v7937_v13 = vshrl.u32 %v7936_v11, 16  ;;  %v4829_v2 = vrot.slane %v1717_v63, 9  ;;  %v2928_v62 = vld [vmem:[#allocation2 + $0x30] sm:$0xe] }
 0x179   : > { %v1852_v10 = vrot.slane %v6183_v48, 5  ;;  %v1800_v39 = vsel %vm5537_vm6, %v1798_v22, %v1799_v32  ;;  %v2137_v27 = vrot.slane %v2135_v52, 5  ;;  %v2145_v43 = vshll.u32 %v5896_v17, 16 }
 0x17a   : > { %v2141_v51 = vrot.slane %v7937_v13, 4  ;;  %v1956_v21 = vsel %vm5543_vm9, %v1951_v55, %v1955_v23  ;;  %v7938_v16 = vshll.u32 %v6019_v47, 16  ;;  %v1982_v63 = vshrl.u32 %v6058_v9, 16  ;;  %3572 = vrot.lane.b32.xlu1 %v4957_v45, %s5385_s15  ;;  %v1710_v13 = vld [vmem:[#allocation2 + $0x30] sm:$0xe] }
 0x17b   : > { %v4930_v53 = vcombine.low %v1946_v36, %v1956_v21  ;;  %v2133_v61 = vrot.slane %v2132_v57, 4  ;;  %v4901_v23 = vcombine.low %v1797_v18, %v1800_v39  ;;  %v1854_v11 = vrot.slane %v1852_v10, 4 }
 0x17c   : > { %v6202_v50 = vrot.slane %v7938_v16, 5  ;;  %v2142_v55 = vor.u32 %v2141_v51, %v2137_v27  ;;  %v1855_v52 = vrot.slane %v6190_v15, 5  ;;  %v1853_v17 = vsel %vm5537_vm6, %v4829_v2, %v1852_v10  ;;  %v6215_v51 = vld [vmem:[#allocation2 + $0x38] sm:$0x1] }
 0x17d   : > { %3470 = vrot.lane.b32.xlu0 %v4930_v53, %s5387_s17  ;;  %v4852_v22 = vrot.slane %v2928_v62, 9  ;;  %v3006_v47 = vrot.slane %v5952_v40, 5  ;;  %v3009_v32 = vrot.slane %v6198_v26, 5  ;;  %v1985_v45 = vshll.u32 %v6058_v9, 16  ;;  %v6222_v62 = vpop.permute.xlu0 %3214  ;;  %v6228_v53 = vld [vmem:[#allocation2 + $0x34] sm:$0xf] }
 0x17e   : > { %v2143_v36 = vrot.slane %v2142_v55, 4  ;;  %v2147_v57 = vrot.slane %v2145_v43, 5  ;;  %v1856_v18 = vsel %vm5537_vm6, %v1854_v11, %v1855_v52  ;;  %3300 = vrot.lane.b32.xlu1 %v4901_v23, %s5381_s9  ;;  %v2138_v2 = vsel %vm5543_vm9, %v2133_v61, %v2137_v27  ;;  %v6230_v11 = vld [vmem:[#allocation2 + $0x98] sm:$0x1]  ;;  %v6234_v27 = vld [vmem:[#allocation2 + $0x48] sm:$0xf] }
 0x17f   : > { %v3008_v10 = vrot.slane %v3006_v47, 4  ;;  %v4909_v43 = vcombine.low %v1853_v17, %v1856_v18  ;;  %v3007_v16 = vsel %vm5537_vm6, %v4852_v22, %v3006_v47  ;;  %v4822_v55 = vrot.slane %v1710_v13, 9  ;;  %7939 = vst [vmem:[#allocation7_spill] sm:$0xff] %v6230_v11  ;;  %v6238_v17 = vpop.permute.xlu1 %3294  ;;  %v6246_v18 = vld [vmem:[#allocation2 + $0x4c] sm:$0xf] }
 0x180   : > { %v2148_v9 = vsel %vm5543_vm9, %v2143_v36, %v2147_v57  ;;  %v1803_v61 = vrot.slane %v6228_v53, 5  ;;  %v1806_v39 = vrot.slane %v6215_v51, 5  ;;  %v2936_v36 = vld [vmem:[#allocation2 + $0x90] sm:$0xe]  ;;  %7940 = vst [vmem:[#allocation8_spill] sm:$0xff] %v6238_v17  ;;  %v6240_v57 = vrot.slane %v1982_v63, 4 }
 0x181   : > { %v4938_v52 = vcombine.low %v2138_v2, %v2148_v9  ;;  %v3010_v23 = vsel %vm5537_vm6, %v3008_v10, %v3009_v32  ;;  %v6242_v22 = vrot.slane %v1985_v45, 5  ;;  %v2174_v47 = vshrl.u32 %v6112_v49, 16  ;;  %7943 = vst [vmem:[#allocation5_spill] sm:$0xff] %v6246_v18  ;;  %v6274_v17 = vld [vmem:[#allocation2 + $0xa8] sm:$0xf] }
 0x182   : > { %7941 = vst [vmem:[#allocation9_spill] sm:$0xff] %v6240_v57  ;;  %v2177_v13 = vshll.u32 %v6112_v49, 16  ;;  %3316 = vrot.lane.b32.xlu1 %v4909_v43, %s5381_s9  ;;  %v4996_v2 = vcombine.low %v3007_v16, %v3010_v23  ;;  %v4919_v10 = vcombine.low %v6234_v27, %v6246_v18  ;;  %v1805_v63 = vrot.slane %v1803_v61, 4  ;;  %v6266_v57 = vld [vmem:[#allocation2 + $0x98] sm:$0x1] }
 0x183   : > { %7942 = vst [vmem:[#allocation13_spill] sm:$0xff] %v6242_v22  ;;  %3486 = vrot.lane.b32.xlu0 %v4938_v52, %s5387_s17  ;;  %v1804_v45 = vsel %vm5537_vm6, %v4822_v55, %v1803_v61  ;;  %v4860_v9 = vrot.slane %v2936_v36, 9  ;;  %v3062_v21 = vrot.slane %v5970_v25, 5  ;;  %v3065_v49 = vrot.slane %v6230_v11, 5  ;;  %v6257_v22 = vld [vmem:[#allocation2 + $0x94] sm:$0xf]  ;;  %v6268_v61 = vpop.permute.xlu0 %3646 }
 0x184   : > { %v1807_v52 = vsel %vm5537_vm6, %v1805_v63, %v1806_v39  ;;  %v2012_v43 = vor.u32 %v5914_v38, %v5912_v58  ;;  %v2015_v16 = vshll.u32 %v7926_v29, 16  ;;  %v7944_v23 = vshrl.u32 %v7926_v29, 16  ;;  %v1718_v55 = vld [vmem:[#allocation2 + $0x90] sm:$0xe]  ;;  %7945 = vst [vmem:[#allocation6_spill] sm:$0xff] %v6268_v61  ;;  %v6283_v61 = vpop.permute.xlu1 %3392 }
 0x185   : > { %v6270_v36 = vrot.slane %v2174_v47, 4  ;;  %v6272_v44 = vrot.slane %v2177_v13, 5  ;;  %v3064_v39 = vrot.slane %v3062_v21, 4  ;;  %v2025_v63 = vshll.u32 %v6132_v59, 16  ;;  %v6280_v58 = vld [vmem:[#allocation2 + $0xac] sm:$0xf] }
 0x186   : > { %v2021_v32 = vrot.slane %v7944_v23, 4  ;;  %3400 = vrot.lane.b32.xlu1 %v4919_v10, %s5384_s14  ;;  %v2013_v29 = vrot.slane %v2012_v43, 4  ;;  %v2017_v23 = vrot.slane %v2015_v16, 5  ;;  %v1859_v47 = vrot.slane %v6257_v22, 5  ;;  %7948 = vst [vmem:[#allocation3_spill] sm:$0xff] %v6283_v61 }
 0x187   : > { %7946 = vst [vmem:[#allocation12_spill] sm:$0xff] %v6270_v36  ;;  %7947 = vst [vmem:[#allocation14_spill] sm:$0xff] %v6272_v44  ;;  %3810 = vrot.lane.b32.xlu0 %v4996_v2, %s5386_s16  ;;  %v4902_v13 = vcombine.low %v1804_v45, %v1807_v52  ;;  %v4927_v44 = vcombine.low %v6274_v17, %v6280_v58  ;;  %v3063_v59 = vsel %vm5537_vm6, %v4860_v9, %v3062_v21  ;;  %v2927_v36 = vld [vmem:[#allocation2 + $0x24] sm:$0xe]  ;;  %v6292_v16 = vld [vmem:[#allocation2 + $0x2c] sm:$0x1] }
 0x188   : > { %v4830_v2 = vrot.slane %v1718_v55, 9  ;;  %v3066_v10 = vsel %vm5537_vm6, %v3064_v39, %v3065_v49  ;;  %v2022_v38 = vor.u32 %v2021_v32, %v2017_v23  ;;  %v2027_v30 = vrot.slane %v2025_v63, 5  ;;  %v6302_v55 = vpop.permute.xlu0 %3662  ;;  %v6306_v52 = vld [vmem:[#allocation2 + $0x3c] sm:$0xf]  ;;  %v6308_v61 = vld [vmem:[#allocation2 + $0x40] sm:$0xf] }
 0x189   : > { %v1862_v43 = vrot.slane %v6266_v57, 5  ;;  %v1861_v11 = vrot.slane %v1859_v47, 4  ;;  %v2018_v21 = vsel %vm5543_vm9, %v2013_v29, %v2017_v23  ;;  %v4851_v9 = vrot.slane %v2927_v36, 9  ;;  %7949 = vst [vmem:[#allocation15_spill] sm:$0xff] %v6302_v55  ;;  %v6311_v45 = vpop.permute.xlu1 %3408  ;;  %v6320_v18 = vld [vmem:[#allocation2 + $0x2c] sm:$0x1] }
 0x18a   : > { %3416 = vrot.lane.b32.xlu1 %v4927_v44, %s5384_s14  ;;  %v2023_v32 = vrot.slane %v2022_v38, 4  ;;  %v2999_v49 = vrot.slane %v5940_v5, 5  ;;  %v5004_v39 = vcombine.low %v3063_v59, %v3066_v10  ;;  %v1860_v63 = vsel %vm5537_vm6, %v4830_v2, %v1859_v47  ;;  %7950 = vst [vmem:[#allocation16_spill] sm:$0xff] %v6311_v45  ;;  %v2319_v47 = vld [vmem:[#allocation2 + $0x24] sm:$0xe] }
 0x18b   : > { %3302 = vrot.lane.b32.xlu0 %v4902_v13, %s5381_s9  ;;  %v3002_v13 = vrot.slane %v6292_v16, 5  ;;  %v1419_v44 = vshrl.u32 %v1279_v28, 16  ;;  %v1863_v38 = vsel %vm5537_vm6, %v1861_v11, %v1862_v43  ;;  %v4965_v29 = vcombine.low %v6306_v52, %v6308_v61 }
 0x18c   : > { %v2028_v36 = vsel %vm5543_vm9, %v2023_v32, %v2027_v30  ;;  %v3001_v23 = vrot.slane %v2999_v49, 4  ;;  %v1422_v10 = vshll.u32 %v1279_v28, 16  ;;  %v1428_v55 = vshll.u32 %v6228_v53, 16 }
 0x18d   : > { %v4933_v59 = vcombine.low %v2018_v21, %v2028_v36  ;;  %v1421_v2 = vrot.slane %v1419_v44, 4  ;;  %v3000_v30 = vsel %vm5537_vm6, %v4851_v9, %v2999_v49  ;;  %v1432_v43 = vshrl.u32 %v6228_v53, 16  ;;  %v2935_v49 = vld [vmem:[#allocation2 + $0x84] sm:$0xe] }
 0x18e   : > { %v3003_v11 = vsel %vm5537_vm6, %v3001_v23, %v3002_v13  ;;  %v1438_v32 = vshll.u32 %v6215_v51, 16  ;;  %v1424_v21 = vrot.slane %v1422_v10, 5  ;;  %v1430_v28 = vrot.slane %v1428_v55, 5  ;;  %v6334_v13 = vpop.permute.xlu0 %3390  ;;  %v6337_v10 = vpop.permute.xlu1 %3660 }
 0x18f   : > { %3826 = vrot.lane.b32.xlu0 %v5004_v39, %s5386_s16  ;;  %3476 = vrot.lane.b32.xlu1 %v4933_v59, %s5387_s17  ;;  %v4836_v44 = vrot.slane %v2319_v47, 9  ;;  %v2397_v36 = vrot.slane %v6061_v35, 5  ;;  %v4910_v45 = vcombine.low %v1860_v63, %v1863_v38  ;;  %v1434_v25 = vrot.slane %v1432_v43, 4  ;;  %7951 = vst [vmem:[#allocation17_spill] sm:$0xff] %v6337_v10 }
 0x190   : > { %v2400_v39 = vrot.slane %v6320_v18, 5  ;;  %v2204_v9 = vor.u32 %v5925_v12, %v5923_v6  ;;  %v4995_v53 = vcombine.low %v3000_v30, %v3003_v11  ;;  %v1425_v23 = vor.u32 %v1424_v21, %v1421_v2  ;;  %v6343_v6 = vld [vmem:[#allocation2 + $0x8c] sm:$0x1] }
 0x191   : > { %v2399_v51 = vrot.slane %v2397_v36, 4  ;;  %v2207_v59 = vshll.u32 %v5900_v33, 16  ;;  %v1435_v55 = vor.u32 %v1434_v25, %v1430_v28  ;;  %v1440_v63 = vrot.slane %v1438_v32, 5 }
 0x192   : > { %v7952_v38 = vshrl.u32 %v5900_v33, 16  ;;  %v2217_v43 = vshll.u32 %v6146_v14, 16  ;;  %v1426_v12 = vrot.slane %v1425_v23, 4  ;;  %v2398_v2 = vsel %vm5537_vm6, %v4836_v44, %v2397_v36  ;;  %v2327_v23 = vld [vmem:[#allocation2 + $0x84] sm:$0xe] }
 0x193   : > { %3318 = vrot.lane.b32.xlu0 %v4910_v45, %s5381_s9  ;;  %3652 = vrot.lane.b32.xlu1 %v4965_v29, %s5383_s13  ;;  %v2209_v30 = vrot.slane %v2207_v59, 5  ;;  %v4859_v11 = vrot.slane %v2935_v49, 9  ;;  %v1436_v21 = vrot.slane %v1435_v55, 4  ;;  %v2401_v25 = vsel %vm5537_vm6, %v2399_v51, %v2400_v39 }
 0x194   : > { %v2213_v47 = vrot.slane %v7952_v38, 4  ;;  %v2205_v45 = vrot.slane %v2204_v9, 4  ;;  %v3055_v33 = vrot.slane %v6024_v54, 5  ;;  %v1431_v14 = vsel %vm5543_vm9, %v1426_v12, %v1430_v28  ;;  %v6365_v28 = vpop.permute.xlu0 %3406 }
 0x195   : > { %v2219_v38 = vrot.slane %v2217_v43, 5  ;;  %v3058_v29 = vrot.slane %v6343_v6, 5  ;;  %v7953_v10 = vshrl.u32 %v6234_v27, 16  ;;  %v7954_v36 = vshll.u32 %v6234_v27, 16  ;;  %7955 = vst [vmem:[#allocation4_spill] sm:$0xff] %v6365_v28  ;;  %v6372_v27 = vpop.permute.xlu1 %3552 }
 0x196   : > { %v2214_v32 = vor.u32 %v2213_v47, %v2209_v30  ;;  %v1441_v39 = vsel %vm5543_vm9, %v1436_v21, %v1440_v63  ;;  %v3057_v9 = vrot.slane %v3055_v33, 4  ;;  %v2249_v51 = vshll.u32 %v6274_v17, 16  ;;  %v6370_v47 = vld [vmem:[#allocation2 + $0x8c] sm:$0x1]  ;;  %7956 = vst [vmem:[#allocation24_spill] sm:$0xff] %v6372_v27 }
 0x197   : > { %v6356_v44 = vrot.slane %v7953_v10, 4  ;;  %v6360_v49 = vrot.slane %v7954_v36, 5  ;;  %3808 = vrot.lane.b32.xlu0 %v4995_v53, %s5386_s16  ;;  %v4886_v59 = vcombine.low %v1431_v14, %v1441_v39  ;;  %v3056_v10 = vsel %vm5537_vm6, %v4859_v11, %v3055_v33  ;;  %v1295_v21 = vld [vmem:[#allocation2 + $0x90] sm:$0xf] }
 0x198   : > { %v2215_v55 = vrot.slane %v2214_v32, 4  ;;  %v4948_v43 = vcombine.low %v2398_v2, %v2401_v25  ;;  %v2210_v53 = vsel %vm5543_vm9, %v2205_v45, %v2209_v30  ;;  %v3059_v63 = vsel %vm5537_vm6, %v3057_v9, %v3058_v29  ;;  %v7958_v33 = vld [vmem:[#allocation10_spill] sm:$0xff]  ;;  %v6396_v32 = vpop.permute.xlu0 %3806 }
 0x199   : > { %v4844_v12 = vrot.slane %v2327_v23, 9  ;;  %v7957_v36 = vshrl.u32 %v6274_v17, 16  ;;  %3222 = vrot.lane.b32.xlu1 %v4886_v59, %s5382_s10  ;;  %v2453_v2 = vrot.slane %v6121_v7, 5  ;;  %v2615_v30 = vshrl.u32 %v6306_v52, 16  ;;  %7959 = vst [vmem:[#allocation10_spill] sm:$0xff] %v6396_v32 }
 0x19a   : > { %v2220_v11 = vsel %vm5543_vm9, %v2215_v55, %v2219_v38  ;;  %v5003_v25 = vcombine.low %v3056_v10, %v3059_v63  ;;  %v2456_v45 = vrot.slane %v6370_v47, 5  ;;  %v544_v17 = vadd.f32 %v6042_v3, %v7958_v33  ;;  %v6399_v10 = vld [vmem:[#allocation2 + $0x9c] sm:$0xf] }
 0x19b   : > { %v6380_v14 = vrot.slane %v7957_v36, 4  ;;  %3554 = vrot.lane.b32.xlu0 %v4948_v43, %s5385_s15  ;;  %v4941_v29 = vcombine.low %v2210_v53, %v2220_v11  ;;  %v2455_v23 = vrot.slane %v2453_v2, 4  ;;  %v1611_v39 = vshrl.u32 %v1295_v21, 16  ;;  %v6404_v11 = vpop.permute.xlu1 %3568 }
 0x19c   : > { %v1614_v9 = vshll.u32 %v1295_v21, 16  ;;  %v2454_v59 = vsel %vm5537_vm6, %v4844_v12, %v2453_v2  ;;  %v628_v38 = vmax.f32 %v544_v17, 0.0  ;;  %v1620_v55 = vshll.u32 %v6257_v22, 16  ;;  %7960 = vst [vmem:[#allocation25_spill] sm:$0xff] %v6404_v11  ;;  %v6416_v11 = vld [vmem:[#allocation2 + $0x48] sm:$0xf] }
 0x19d   : > { %v1624_v36 = vshrl.u32 %v6257_v22, 16  ;;  %3492 = vrot.lane.b32.xlu1 %v4941_v29, %s5387_s17  ;;  %v2457_v43 = vsel %vm5537_vm6, %v2455_v23, %v2456_v45  ;;  %v1613_v53 = vrot.slane %v1611_v39, 4  ;;  %v1630_v21 = vshll.u32 %v6266_v57, 16  ;;  %v6409_v22 = vld [vmem:[#allocation2 + $0xa0] sm:$0xf] }
 0x19e   : > { %v1616_v63 = vrot.slane %v1614_v9, 5  ;;  %v6406_v12 = vrot.slane %v2249_v51, 5  ;;  %v660_v2 = vmin.f32 %v628_v38, 6.0  ;;  %v1622_v33 = vrot.slane %v1620_v55, 5  ;;  %v7961_v55 = vld [vmem:[#allocation11_spill] sm:$0xff] }
 0x19f   : > { %3824 = vrot.lane.b32.xlu0 %v5003_v25, %s5386_s16  ;;  %v1626_v17 = vrot.slane %v1624_v36, 4  ;;  %v6411_v29 = vrot.slane %v2615_v30, 4  ;;  %v2618_v28 = vshll.u32 %v6306_v52, 16  ;;  %v4973_v45 = vcombine.low %v6399_v10, %v6409_v22  ;;  %v6418_v25 = vld [vmem:[#allocation2 + $0x4c] sm:$0xf]  ;;  %v6437_v38 = vpop.permute.xlu1 %3296 }
 0x1a0   : > { %v1617_v23 = vor.u32 %v1616_v63, %v1613_v53  ;;  %v4956_v57 = vcombine.low %v2454_v59, %v2457_v43  ;;  %v5067_v39 = vpack.c.bf16 %v660_v2, %v660_v2  ;;  %v1632_v51 = vrot.slane %v1630_v21, 5  ;;  %v7962_v63 = vld [vmem:[#allocation18_spill] sm:$0xff]  ;;  %v6429_v2 = vpop.permute.xlu0 %3298 }
 0x1a1   : > { %v1627_v9 = vor.u32 %v1626_v17, %v1622_v33  ;;  %3668 = vrot.lane.b32.xlu1 %v4973_v45, %s5383_s13  ;;  %v4966_v52 = vcombine.low %v6416_v11, %v6418_v25  ;;  %v536_v36 = vadd.f32 %v6042_v3, %v7961_v55  ;;  %v547_v21 = vadd.f32 %v6042_v3, %v7962_v63  ;;  %v5334_v63 = vld [vmem:[#allocation2 + $0x28] sm:$0xf] }
 0x1a2   : > { %v1618_v30 = vrot.slane %v1617_v23, 4  ;;  %v953_v59 = vshrl.u32 %v5067_v39, 16  ;;  %v956_v43 = vshll.u32 %v5067_v39, 16  ;;  %7963 = vst [vmem:[#allocation11_spill] sm:$0xff] %v6429_v2  ;;  %v539_v23 = vadd.f32 %v6042_v3, %v5921_v31  ;;  %7964 = vst [vmem:[#allocation18_spill] sm:$0xff] %v6437_v38 }
 0x1a3   : > { %3570 = vrot.lane.b32.xlu0 %v4956_v57, %s5385_s15  ;;  %v1628_v53 = vrot.slane %v1627_v9, 4  ;;  %v626_v45 = vmax.f32 %v536_v36, 0.0  ;;  %v2573_v55 = vor.u32 %v6015_v46, %v5947_v24  ;;  %v629_v9 = vmax.f32 %v547_v21, 0.0  ;;  %v1205_v38 = vld [vmem:[#allocation2 + $0x5c] sm:$0x1] }
 0x1a4   : > { %v1623_v17 = vsel %vm5543_vm9, %v1618_v30, %v1622_v33  ;;  %v6439_v57 = vrot.slane %v953_v59, 7  ;;  %v2576_v27 = vshll.u32 %v5334_v63, 16  ;;  %v6443_v2 = vrot.slane %v2618_v28, 5  ;;  %v1208_v33 = vld [vmem:[#allocation2 + $0x60] sm:$0xf] }
 0x1a5   : > { %v1633_v39 = vsel %vm5543_vm9, %v1628_v53, %v1632_v51  ;;  %v658_v36 = vmin.f32 %v626_v45, 6.0  ;;  %v627_v32 = vmax.f32 %v539_v23, 0.0  ;;  %v661_v24 = vmin.f32 %v629_v9, 6.0  ;;  %v6455_v23 = vpop.permute.xlu0 %3822  ;;  %v6457_v9 = vpop.permute.xlu1 %3312 }
 0x1a6   : > { %7965 = vst [vmem:[#allocation26_spill] sm:$0xff] %v6443_v2  ;;  %v4894_v30 = vcombine.low %v1623_v17, %v1633_v39  ;;  %v958_v31 = vor.u32 %v956_v43, %v6439_v57  ;;  %v2574_v46 = vrot.slane %v2573_v55, 4  ;;  %v2578_v3 = vrot.slane %v2576_v27, 5  ;;  %7967 = vst [vmem:[#allocation27_spill] sm:$0xff] %v6455_v23  ;;  %v6467_v2 = vld [vmem:[#allocation2 + $0xa8] sm:$0xf] }
 0x1a7   : > { %3654 = vrot.lane.b32.xlu0 %v4966_v52, %s5383_s13  ;;  %v5065_v59 = vpack.c.bf16 %v658_v36, %v658_v36  ;;  %v659_v51 = vmin.f32 %v627_v32, 6.0  ;;  %v7966_v53 = vshrl.u32 %v5940_v5, 16  ;;  %v2586_v28 = vshll.u32 %v6292_v16, 16  ;;  %7968 = vst [vmem:[#allocation28_spill] sm:$0xff] %v6457_v9 }
 0x1a8   : > { %3238 = vrot.lane.b32.xlu1 %v4894_v30, %s5382_s10  ;;  %v2807_v17 = vshrl.u32 %v6399_v10, 16  ;;  %v1209_v43 = vsel %vm5585_vm13, %v958_v31, %v1208_v33  ;;  %v5068_v52 = vpack.c.bf16 %v661_v24, %v661_v24  ;;  %v2579_v16 = vsel %vm5543_vm9, %v2574_v46, %v2578_v3 }
 0x1a9   : > { %v2582_v21 = vrot.slane %v7966_v53, 4  ;;  %1210 = vst [vmem:[#allocation2 + $0x60] sm:$0xf] %v1209_v43  ;;  %v936_v27 = vshrl.u32 %v5065_v59, 16  ;;  %v939_v55 = vshll.u32 %v5065_v59, 16  ;;  %v5066_v39 = vpack.c.bf16 %v659_v51, %v659_v51 }
 0x1aa   : > { %v961_v5 = vshrl.u32 %v5068_v52, 16  ;;  %v964_v63 = vshll.u32 %v5068_v52, 16  ;;  %v2588_v30 = vrot.slane %v2586_v28, 5  ;;  %v1201_v53 = vld [vmem:[#allocation2 + $0x54] sm:$0xf]  ;;  %v6461_v24 = vrot.slane %v2807_v17, 4 }
 0x1ab   : > { %v2583_v32 = vor.u32 %v2582_v21, %v2578_v3  ;;  %v938_v36 = vrot.slane %v936_v27, 7  ;;  %v944_v45 = vshrl.u32 %v5066_v39, 16  ;;  %v947_v33 = vshll.u32 %v5066_v39, 16  ;;  %v1212_v21 = vld [vmem:[#allocation2 + $0x68] sm:$0x1] }
 0x1ac   : > { %7969 = vst [vmem:[#allocation29_spill] sm:$0xff] %v6461_v24  ;;  %v959_v59 = vrot.slane %v6439_v57, 4  ;;  %v963_v51 = vrot.slane %v961_v5, 7  ;;  %v1277_v3 = vld [vmem:[#allocation2 + $0x24] sm:$0xf]  ;;  %v6471_v57 = vpop.permute.xlu0 %3314  ;;  %v2193_v1 = vshll.u32 %v6370_v47, 16 }
 0x1ad   : > { %v2584_v31 = vrot.slane %v2583_v32, 4  ;;  %v941_v23 = vor.u32 %v939_v55, %v938_v36  ;;  %v942_v9 = vrot.slane %v938_v36, 4  ;;  %v946_v52 = vrot.slane %v944_v45, 7  ;;  %v5335_v28 = vld [vmem:[#allocation2 + $0x4] sm:$0xf]  ;;  %v6477_v36 = vpop.permute.xlu1 %3396 }
 0x1ae   : > { %v5336_v27 = vld [vmem:[#allocation2] sm:$0xf]  ;;  %v966_v32 = vor.u32 %v964_v63, %v963_v51  ;;  %v968_v17 = vrot.slane %v963_v51, 4  ;;  %v6469_v43 = vld [vmem:[#allocation2 + $0xac] sm:$0xf]  ;;  %7970 = vst [vmem:[#allocation30_spill] sm:$0xff] %v6477_v36 }
 0x1af   : > { %v2589_v46 = vsel %vm5543_vm9, %v2584_v31, %v2588_v30  ;;  %v4866_v39 = vcombine.low %v5336_v27, %v5335_v28  ;;  %v1202_v45 = vsel %vm5585_vm13, %v941_v23, %v1201_v53  ;;  %v949_v55 = vor.u32 %v947_v33, %v946_v52  ;;  %v5337_v28 = vld [vmem:[#allocation2 + $0x34] sm:$0xf] }
 0x1b0   : > { %v4979_v24 = vcombine.low %v2579_v16, %v2589_v46  ;;  %v951_v5 = vrot.slane %v946_v52, 4  ;;  %v4974_v30 = vcombine.low %v6467_v2, %v6469_v43  ;;  %1203 = vst [vmem:[#allocation2 + $0x54] sm:$0xf] %v1202_v45  ;;  %v967_v63 = vsel %vm5603_vm14, %v959_v59, %v966_v32 }
 0x1b1   : > { %v1213_v16 = vsel %vm5613_vm15, %v968_v17, %v1212_v21  ;;  %v1395_v31 = vshrl.u32 %v1277_v3, 16  ;;  %v1398_v51 = vshll.u32 %v1277_v3, 16  ;;  %1211 = vst.msk [vmem:[#allocation2 + $0x64] sm:$0xf] %vm678_vm2, %v967_v63  ;;  %v950_v23 = vsel %vm5603_vm14, %v942_v9, %v949_v55 }
 0x1b2   : > { %3728 = vrot.lane.b32.xlu1 %v4979_v24, %s5388_s20  ;;  %1214 = vst [vmem:[#allocation2 + $0x68] sm:$0x1] %v1213_v16  ;;  %v1206_v53 = vsel %vm5613_vm15, %v951_v5, %v1205_v38  ;;  %3670 = vrot.lane.b32.xlu0 %v4974_v30, %s5383_s13  ;;  %v1404_v33 = vshll.u32 %v6165_v0, 16  ;;  %v1408_v59 = vshrl.u32 %v6165_v0, 16  ;;  %1204 = vst.msk [vmem:[#allocation2 + $0x58] sm:$0xf] %vm678_vm2, %v950_v23  ;;  %v6507_v5 = vpop.permute.xlu0 %3550  ;;  %v6509_v16 = vpop.permute.xlu1 %3412 }
 0x1b3   : > { %1207 = vst [vmem:[#allocation2 + $0x5c] sm:$0x1] %v1206_v53  ;;  %v1397_v24 = vrot.slane %v1395_v31, 4  ;;  %v1400_v21 = vrot.slane %v1398_v51, 5  ;;  %v1414_v52 = vshll.u32 %v6169_v20, 16  ;;  %v2597_v46 = vor.u32 %v6054_v34, %v6052_v4  ;;  %7973 = vst [vmem:[#allocation31_spill] sm:$0xff] %v6507_v5 }
 0x1b4   : > { %v1406_v9 = vrot.slane %v1404_v33, 5  ;;  %v1410_v3 = vrot.slane %v1408_v59, 4  ;;  %v2600_v38 = vshll.u32 %v5337_v28, 16  ;;  %v7971_v27 = vshrl.u32 %v5952_v40, 16  ;;  %7974 = vst [vmem:[#allocation32_spill] sm:$0xff] %v6509_v16 }
 0x1b5   : > { %v7972_v17 = vshll.u32 %v6399_v10, 16  ;;  %v6504_v45 = vsel %vm400_vm1, %v4866_v39, %v6222_v62  ;;  %v1401_v55 = vor.u32 %v1400_v21, %v1397_v24  ;;  %v2610_v20 = vshll.u32 %v6198_v26, 16  ;;  %v5338_v59 = vld [vmem:[#allocation2 + $0x88] sm:$0xf]  ;;  %v6684_v5 = vld [vmem:[#allocation2 + $0xa4] sm:$0x1] }
 0x1b6   : > { %v2606_v32 = vrot.slane %v7971_v27, 4  ;;  %v1411_v4 = vor.u32 %v1410_v3, %v1406_v9  ;;  %v1416_v34 = vrot.slane %v1414_v52, 5  ;;  %v2598_v30 = vrot.slane %v2597_v46, 4  ;;  %v1293_v3 = vld [vmem:[#allocation2 + $0x84] sm:$0xf] }
 0x1b7   : > { %v6500_v0 = vrot.slane %v7972_v17, 5  ;;  %v2602_v63 = vrot.slane %v2600_v38, 5  ;;  %v2639_v40 = vshrl.u32 %v6416_v11, 16  ;;  %v2642_v10 = vshll.u32 %v6416_v11, 16 }
 0x1b8   : > { %v1402_v31 = vrot.slane %v1401_v55, 4  ;;  %v2765_v62 = vor.u32 %v6202_v50, %v6116_v8  ;;  %v2831_v39 = vshrl.u32 %v6467_v2, 16  ;;  %v1412_v51 = vrot.slane %v1411_v4, 4 }
 0x1b9   : > { %v2607_v26 = vor.u32 %v2606_v32, %v2602_v63  ;;  %v2612_v23 = vrot.slane %v2610_v20, 5  ;;  %v2768_v24 = vshll.u32 %v5338_v59, 16  ;;  %v7975_v21 = vshrl.u32 %v6024_v54, 16  ;;  %v6528_v32 = vld [vmem:[#allocation2 + $0x3c] sm:$0xf]  ;;  %v6530_v54 = vpop.permute.xlu0 %3820 }
 0x1ba   : > { %v1407_v53 = vsel %vm5543_vm9, %v1402_v31, %v1406_v9  ;;  %v2766_v33 = vrot.slane %v2765_v62, 4  ;;  %v1417_v11 = vsel %vm5543_vm9, %v1412_v51, %v1416_v34  ;;  %v2603_v8 = vsel %vm5543_vm9, %v2598_v30, %v2602_v63  ;;  %7976 = vst [vmem:[#allocation33_spill] sm:$0xff] %v6530_v54  ;;  %v6540_v34 = vpop.permute.xlu1 %3472  ;;  %v5339_v59 = vld [vmem:[#allocation2 + $0x94] sm:$0xf] }
 0x1bb   : > { %v2774_v52 = vrot.slane %v7975_v21, 4  ;;  %v2608_v50 = vrot.slane %v2607_v26, 4  ;;  %v2778_v46 = vshll.u32 %v6343_v6, 16  ;;  %v6525_v28 = vrot.slane %v2639_v40, 4  ;;  %v6538_v6 = vld [vmem:[#allocation2 + $0x40] sm:$0xf] }
 0x1bc   : > { %v4885_v38 = vcombine.low %v1407_v53, %v1417_v11  ;;  %v2770_v27 = vrot.slane %v2768_v24, 5  ;;  %v6532_v17 = vrot.slane %v2642_v10, 5  ;;  %v6534_v55 = vrot.slane %v2831_v39, 4  ;;  %7977 = vst [vmem:[#allocation34_spill] sm:$0xff] %v6540_v34  ;;  %v7988_v9 = vld [vmem:[#allocation22_spill] sm:$0xff] }
 0x1bd   : > { %v2613_v20 = vsel %vm5543_vm9, %v2608_v50, %v2612_v23  ;;  %v2780_v4 = vrot.slane %v2778_v46, 5  ;;  %v4918_v10 = vcombine.low %v6528_v32, %v6538_v6  ;;  %v1587_v31 = vshrl.u32 %v1293_v3, 16 }
 0x1be   : > { %3220 = vrot.lane.b32.xlu1 %v4885_v38, %s5382_s10  ;;  %v4980_v30 = vcombine.low %v2603_v8, %v2613_v20  ;;  %v2771_v63 = vsel %vm5543_vm9, %v2766_v33, %v2770_v27  ;;  %v2775_v40 = vor.u32 %v2774_v52, %v2770_v27  ;;  %v1590_v62 = vshll.u32 %v1293_v3, 16  ;;  %v2322_v3 = vld [vmem:[#allocation2 + $0x48] sm:$0xe]  ;;  %v6555_v38 = vpop.permute.xlu0 %3566 }
 0x1bf   : > { %v1596_v39 = vshll.u32 %v6183_v48, 16  ;;  %v1600_v51 = vshrl.u32 %v6183_v48, 16  ;;  %v1606_v23 = vshll.u32 %v6190_v15, 16  ;;  %v2789_v53 = vor.u32 %v6108_v56, %v6104_v19  ;;  %7978 = vst [vmem:[#allocation35_spill] sm:$0xff] %v6555_v38 }
 0x1c0   : > { %3730 = vrot.lane.b32.xlu0 %v4980_v30, %s5388_s20  ;;  %v2776_v26 = vrot.slane %v2775_v40, 4  ;;  %v2792_v33 = vshll.u32 %v5339_v59, 16  ;;  %v1589_v24 = vrot.slane %v1587_v31, 4  ;;  %v1592_v21 = vrot.slane %v1590_v62, 5  ;;  %v7979_v30 = vld [vmem:[#allocation19_spill] sm:$0xff]  ;;  %v6559_v40 = vpop.permute.xlu1 %3648 }
 0x1c1   : > { %v1598_v52 = vrot.slane %v1596_v39, 5  ;;  %v1602_v11 = vrot.slane %v1600_v51, 4  ;;  %v1608_v50 = vrot.slane %v1606_v23, 5  ;;  %v2790_v46 = vrot.slane %v2789_v53, 4  ;;  %7981 = vst [vmem:[#allocation19_spill] sm:$0xff] %v6559_v40  ;;  %v7983_v51 = vld [vmem:[#allocation20_spill] sm:$0xff] }
 0x1c2   : > { %v2781_v8 = vsel %vm5543_vm9, %v2776_v26, %v2780_v4  ;;  %v2794_v48 = vrot.slane %v2792_v33, 5  ;;  %v1593_v15 = vor.u32 %v1592_v21, %v1589_v24  ;;  %v7980_v19 = vshrl.u32 %v7979_v30, 16  ;;  %v7982_v4 = vld [vmem:[#allocation7_spill] sm:$0xff]  ;;  %v5340_v39 = vld [vmem:[%s7851_s2] ss:$0 sm:$0xff]  ;;  %v7984_v26 = vld [vmem:[#allocation21_spill] sm:$0xff] }
 0x1c3   : > { %v4987_v27 = vcombine.low %v2771_v63, %v2781_v8  ;;  %v1603_v20 = vor.u32 %v1602_v11, %v1598_v52  ;;  %v2802_v62 = vshll.u32 %v7982_v4, 16  ;;  %v608_v63 = vadd.f32 %v5340_v39, %v7983_v51  ;;  %v6570_v53 = vld [vmem:[#allocation2 + $0x50] sm:$0x1]  ;;  %v6650_v40 = vld [vmem:[#allocation2 + $0x44] sm:$0x1] }
 0x1c4   : > { %v2798_v56 = vrot.slane %v7980_v19, 4  ;;  %3398 = vrot.lane.b32.xlu0 %v4918_v10, %s5384_s14  ;;  %v2795_v31 = vsel %vm5543_vm9, %v2790_v46, %v2794_v48  ;;  %v600_v23 = vadd.f32 %v5340_v39, %v7984_v26  ;;  %v1594_v59 = vrot.slane %v1593_v15, 4  ;;  %v7985_v46 = vld [vmem:[#allocation5_spill] sm:$0xff] }
 0x1c5   : > { %3744 = vrot.lane.b32.xlu1 %v4987_v27, %s5388_s20  ;;  %v1604_v33 = vrot.slane %v1603_v20, 4  ;;  %v4839_v24 = vrot.slane %v2322_v3, 9  ;;  %v2804_v21 = vrot.slane %v2802_v62, 5  ;;  %v644_v11 = vmax.f32 %v608_v63, 0.0  ;;  %v5317_v3 = vld [vmem:[%s7852_s3] sm:$0xff]  }
 0x1c6   : > { %v2799_v10 = vor.u32 %v2798_v56, %v2794_v48  ;;  %v642_v8 = vmax.f32 %v600_v23, 0.0  ;;  %v2418_v30 = vrot.slane %v7985_v46, 5  ;;  %v1599_v19 = vsel %vm5543_vm9, %v1594_v59, %v1598_v52  ;;  %v6579_v48 = vpop.permute.xlu0 %3650  ;;  %v2330_v63 = vld [vmem:[#allocation2 + $0xa8] sm:$0xe]  ;;  %v6589_v23 = vpop.permute.xlu1 %3218  ;;  %5174 = vmatprep.subr.bf16.mxu1 %v5317_v3  ;;  %v7989_v56 = vld [vmem:[#allocation23_spill] sm:$0xff] }
 0x1c7   : > { %v1609_v4 = vsel %vm5543_vm9, %v1604_v33, %v1608_v50  ;;  %v2421_v26 = vrot.slane %v6570_v53, 5  ;;  %v676_v15 = vmin.f32 %v644_v11, 6.0  ;;  %7986 = vst [vmem:[#allocation7_spill] sm:$0xff] %v6579_v48  ;;  %5175 = vmatpush3.bf16.msra.mxu1 %v5317_v3  ;;  %v603_v54 = vadd.f32 %v5340_v39, %v7989_v56  ;;  %v7991_v56 = vld [vmem:[#allocation9_spill] sm:$0xff] }
 0x1c8   : > { %v2800_v51 = vrot.slane %v2799_v10, 4  ;;  %v4893_v27 = vcombine.low %v1599_v19, %v1609_v4  ;;  %v674_v20 = vmin.f32 %v642_v8, 6.0  ;;  %v2419_v50 = vsel %vm5537_vm6, %v4839_v24, %v2418_v30  ;;  %v6593_v8 = vld [vmem:[#allocation2 + $0x9c] sm:$0xf]  ;;  %v6595_v19 = vld [vmem:[#allocation2 + $0xa0] sm:$0xf] }
 0x1c9   : > { %v2420_v62 = vrot.slane %v2418_v30, 4  ;;  %v5083_v10 = vpack.c.bf16 %v676_v15, %v676_v15  ;;  %v5318_v24 = vld [vmem:[%s7852_s3 + $0x8] sm:$0xff]   ;;  %v611_v4 = vadd.f32 %v5340_v39, %v7988_v9  ;;  %v2474_v3 = vrot.slane %v6280_v58, 5 }
 0x1ca   : > { %v2805_v52 = vsel %vm5543_vm9, %v2800_v51, %v2804_v21  ;;  %3236 = vrot.lane.b32.xlu1 %v4893_v27, %s5382_s10  ;;  %v5081_v11 = vpack.c.bf16 %v674_v20, %v674_v20  ;;  %v7987_v21 = vld [vmem:[#allocation8_spill] sm:$0xff]  ;;  %v4926_v51 = vcombine.low %v6593_v8, %v6595_v19  ;;  %v6610_v27 = vld [vmem:[#allocation2 + $0xb0] sm:$0x1]  ;;  %5176 = vmatprep.subr.bf16.mxu1 %v5318_v24  ;;  %v6621_v16 = vpop.permute.xlu0 %3666  ;;  %v643_v39 = vmax.f32 %v603_v54, 0.0 }
 0x1cb   : > { %v4988_v33 = vcombine.low %v2795_v31, %v2805_v52  ;;  %v6603_v30 = vsel %vm3886_vm3, %v6504_v45, %v7987_v21  ;;  %v2422_v31 = vsel %vm5537_vm6, %v2420_v62, %v2421_v26  ;;  %v1089_v15 = vshrl.u32 %v5083_v10, 16  ;;  %v1264_v45 = vld [vmem:[#allocation2 + $0xc0] sm:$0xf]  ;;  %7990 = vst [vmem:[#allocation20_spill] sm:$0xff] %v6621_v16  ;;  %5177 = vmatpush3.bf16.msra.mxu1 %v5318_v24 }
 0x1cc   : > { %v1092_v20 = vshll.u32 %v5083_v10, 16  ;;  %v1072_v52 = vshrl.u32 %v5081_v11, 16  ;;  %v1075_v59 = vshll.u32 %v5081_v11, 16  ;;  %v4951_v21 = vcombine.low %v2419_v50, %v2422_v31  ;;  %v5320_v10 = vld [vmem:[%s7852_s3 + $0x10] sm:$0xff]   ;;  %v5341_v31 = vld [vmem:[#allocation2 + $0x28] sm:$0xf] }
 0x1cd   : > { %3746 = vrot.lane.b32.xlu0 %v4988_v33, %s5388_s20  ;;  %v4847_v26 = vrot.slane %v2330_v63, 9  ;;  %v6615_v62 = vrot.slane %v1089_v15, 7  ;;  %v2477_v33 = vrot.slane %v6610_v27, 5  ;;  %v1257_v50 = vld [vmem:[#allocation2 + $0xb4] sm:$0xf]  ;;  %v645_v9 = vmax.f32 %v611_v4, 0.0  ;;  %5178 = vmatprep.subr.bf16.mxu1 %v5320_v10 }
 0x1ce   : > { %v6617_v38 = vrot.slane %v1072_v52, 7  ;;  %3560 = vrot.lane.b32.xlu1 %v4951_v21, %s5385_s15  ;;  %v7992_v63 = vld [vmem:[#allocation13_spill] sm:$0xff]  ;;  %v1991_v15 = vshll.u32 %v5341_v31, 16  ;;  %v6629_v52 = vpop.permute.xlu1 %3488  ;;  %v675_v4 = vmin.f32 %v643_v39, 6.0 }
 0x1cf   : > { %v1988_v11 = vor.u32 %v7992_v63, %v7991_v56  ;;  %7993 = vst [vmem:[#allocation21_spill] sm:$0xff] %v6629_v52  ;;  %v1094_v36 = vor.u32 %v1092_v20, %v6615_v62  ;;  %v677_v54 = vmin.f32 %v645_v9, 6.0  ;;  %v2475_v21 = vsel %vm5537_vm6, %v4847_v26, %v2474_v3  ;;  %v1711_v63 = vld [vmem:[#allocation2 + $0x3c] sm:$0xe]  ;;  %5179 = vmatpush3.bf16.msra.mxu1 %v5320_v10 }
 0x1d0   : > { %v1077_v48 = vor.u32 %v1075_v59, %v6617_v38  ;;  %v2476_v56 = vrot.slane %v2474_v3, 4  ;;  %v6644_v59 = vrot.slane %v1991_v15, 5  ;;  %v5082_v9 = vpack.c.bf16 %v675_v4, %v675_v4  ;;  %5180 = vmatprep.subr.bf16.mxu1 %v5321_v42 }
 0x1d1   : > { %3414 = vrot.lane.b32.xlu0 %v4926_v51, %s5384_s14  ;;  %v1265_v24 = vsel %vm5585_vm13, %v1094_v36, %v1264_v45  ;;  %v6642_v31 = vrot.slane %v1988_v11, 4  ;;  %v5084_v51 = vpack.c.bf16 %v677_v54, %v677_v54  ;;  %v7994_v26 = vshrl.u32 %v6061_v35, 16  ;;  %v6662_v54 = vld [vmem:[#allocation2 + $0x40] sm:$0xf] }
 0x1d2   : > { %v1258_v20 = vsel %vm5585_vm13, %v1077_v48, %v1257_v50  ;;  %1266 = vst [vmem:[#allocation2 + $0xc0] sm:$0xf] %v1265_v24  ;;  %v2478_v39 = vsel %vm5537_vm6, %v2476_v56, %v2477_v33  ;;  %v2001_v45 = vshll.u32 %v6320_v18, 16  ;;  %v4823_v50 = vrot.slane %v1711_v63, 9  ;;  %v6660_v33 = vpop.permute.xlu0 %3726  ;;  %v6664_v4 = vpop.permute.xlu1 %3664 }
 0x1d3   : > { %1259 = vst [vmem:[#allocation2 + $0xb4] sm:$0xf] %v1258_v20  ;;  %v1997_v3 = vrot.slane %v7994_v26, 4  ;;  %v4959_v36 = vcombine.low %v2475_v21, %v2478_v39  ;;  %v1994_v48 = vsel %vm5543_vm9, %v6642_v31, %v6644_v59  ;;  %7995 = vst [vmem:[#allocation5_spill] sm:$0xff] %v6660_v33  ;;  %v1097_v35 = vshrl.u32 %v5084_v51, 16  ;;  %v7998_v39 = vld [vmem:[#allocation14_spill] sm:$0xff]  ;;  %5181 = vmatpush3.bf16.msra.mxu1 %v5321_v42 }
 0x1d4   : > { %v1100_v11 = vshll.u32 %v5084_v51, 16  ;;  %v1080_v15 = vshrl.u32 %v5082_v9, 16  ;;  %v1083_v10 = vshll.u32 %v5082_v9, 16  ;;  %7996 = vst [vmem:[#allocation8_spill] sm:$0xff] %v6664_v4  ;;  %v1268_v21 = vld [vmem:[#allocation2 + $0xc8] sm:$0x1] }
 0x1d5   : > { %3576 = vrot.lane.b32.xlu1 %v4959_v36, %s5385_s15  ;;  %v1998_v56 = vor.u32 %v1997_v3, %v6644_v59  ;;  %v2003_v24 = vrot.slane %v2001_v45, 5  ;;  %v1810_v18 = vrot.slane %v6662_v54, 5  ;;  %v1813_v63 = vrot.slane %v6650_v40, 5  ;;  %v7997_v51 = vld [vmem:[#allocation12_spill] sm:$0xff]  ;;  %v5342_v26 = vld [vmem:[#allocation2 + $0x88] sm:$0xf] }
 0x1d6   : > { %v1099_v20 = vrot.slane %v1097_v35, 7  ;;  %v1082_v31 = vrot.slane %v1080_v15, 7  ;;  %v2180_v9 = vor.u32 %v7998_v39, %v7997_v51  ;;  %v2183_v16 = vshll.u32 %v5342_v26, 16  ;;  %v5323_v4 = vld [vmem:[%s7852_s3 + $0x20] ss:$0 sps:$4 sm:$0xff]  }
 0x1d7   : > { %v1261_v36 = vld [vmem:[#allocation2 + $0xbc] sm:$0x1]  ;;  %v1999_v52 = vrot.slane %v1998_v56, 4  ;;  %v1811_v59 = vsel %vm5537_vm6, %v4823_v50, %v1810_v18  ;;  %v1812_v3 = vrot.slane %v1810_v18, 4  ;;  %v7999_v45 = vshrl.u32 %v6121_v7, 16  ;;  %5254 = vmatprep.subr.msk.bf16.mxu1 %vm449_vm0, %v5323_v4  ;;  %v6686_v18 = vpop.permute.xlu0 %3394 }
 0x1d8   : > { %v1102_v15 = vor.u32 %v1100_v11, %v1099_v20  ;;  %v1104_v34 = vrot.slane %v1099_v20, 4  ;;  %v1085_v33 = vor.u32 %v1083_v10, %v1082_v31  ;;  %v1087_v51 = vrot.slane %v1082_v31, 4  ;;  %v1719_v50 = vld [vmem:[#allocation2 + $0x9c] sm:$0xe]  ;;  %8000 = vst [vmem:[#allocation22_spill] sm:$0xff] %v6686_v18 }
 0x1d9   : > { %v2189_v35 = vrot.slane %v7999_v45, 4  ;;  %v2004_v42 = vsel %vm5543_vm9, %v1999_v52, %v2003_v24  ;;  %v1814_v39 = vsel %vm5537_vm6, %v1812_v3, %v1813_v63  ;;  %v2181_v56 = vrot.slane %v2180_v9, 4  ;;  %v2930_v24 = vld [vmem:[#allocation2 + $0x48] sm:$0xe]  ;;  %v6700_v63 = vpop.permute.xlu1 %3234 }
 0x1da   : > { %v2185_v26 = vrot.slane %v2183_v16, 5  ;;  %v8001_v7 = vrot.slane %v6615_v62, 4  ;;  %v1269_v10 = vsel %vm5613_vm15, %v1104_v34, %v1268_v21  ;;  %v8002_v52 = vrot.slane %v6617_v38, 4  ;;  %v6705_v21 = vld [vmem:[#allocation2 + $0xa0] sm:$0xf] }
 0x1db   : > { %v1262_v16 = vsel %vm5613_vm15, %v1087_v51, %v1261_v36  ;;  %v2033_v20 = vshll.u32 %v6528_v32, 16  ;;  %1270 = vst [vmem:[#allocation2 + $0xc8] sm:$0x1] %v1269_v10  ;;  %v4932_v34 = vcombine.low %v1994_v48, %v2004_v42  ;;  %v4903_v62 = vcombine.low %v1811_v59, %v1814_v39 }
 0x1dc   : > { %v1103_v11 = vsel %vm5603_vm14, %v8001_v7, %v1102_v15  ;;  %v1086_v4 = vsel %vm5603_vm14, %v8002_v52, %v1085_v33  ;;  %1263 = vst [vmem:[#allocation2 + $0xbc] sm:$0x1] %v1262_v16  ;;  %v2190_v38 = vor.u32 %v2189_v35, %v2185_v26  ;;  %v4831_v33 = vrot.slane %v1719_v50, 9  ;;  %v1899_v50 = vld [vmem:[#allocation2 + $0x60] sm:$0xf]  ;;  %v6730_v7 = vpop.permute.xlu0 %3742 }
 0x1dd   : > { %1267 = vst.msk [vmem:[#allocation2 + $0xc4] sm:$0xf] %vm678_vm2, %v1103_v11  ;;  %1260 = vst.msk [vmem:[#allocation2 + $0xb8] sm:$0xf] %vm678_vm2, %v1086_v4  ;;  %v1866_v31 = vrot.slane %v6705_v21, 5  ;;  %v1869_v9 = vrot.slane %v6684_v5, 5  ;;  %3474 = vrot.lane.b32.xlu0 %v4932_v34, %s5387_s17  ;;  %3304 = vrot.lane.b32.xlu1 %v4903_v62, %s5381_s9  ;;  %v2186_v48 = vsel %vm5543_vm9, %v2181_v56, %v2185_v26 }
 0x1de   : > { %v2191_v36 = vrot.slane %v2190_v38, 4  ;;  %v4854_v59 = vrot.slane %v2930_v24, 9  ;;  %v3020_v3 = vrot.slane %v6418_v25, 5  ;;  %v2195_v45 = vrot.slane %v2193_v1, 5  ;;  %8004 = vst [vmem:[#allocation23_spill] sm:$0xff] %v6730_v7 }
 0x1df   : > { %v1867_v47 = vsel %vm5537_vm6, %v4831_v33, %v1866_v31  ;;  %v1868_v35 = vrot.slane %v1866_v31, 4  ;;  %v3023_v15 = vrot.slane %v6707_v60, 5  ;;  %v8003_v51 = vshll.u32 %v6467_v2, 16  ;;  %v6741_v16 = vld [vmem:[#allocation2 + $0x50] sm:$0x1] }
 0x1e0   : > { %v6728_v56 = vsel %vm3919_vm4, %v6603_v30, %v6334_v13  ;;  %v3022_v26 = vrot.slane %v3020_v3, 4  ;;  %v8005_v11 = vshrl.u32 %v6528_v32, 16  ;;  %v2196_v2 = vsel %vm5543_vm9, %v2191_v36, %v2195_v45  ;;  %v1712_v13 = vld [vmem:[#allocation2 + $0x48] sm:$0xe]  ;;  %v6743_v30 = vpop.permute.xlu1 %3740  ;;  %v6755_v36 = vld [vmem:[#allocation2 + $0x44] sm:$0x1] }
 0x1e1   : > { %v6722_v42 = vrot.slane %v8003_v51, 5  ;;  %v1870_v4 = vsel %vm5537_vm6, %v1868_v35, %v1869_v9  ;;  %8006 = vst [vmem:[#allocation9_spill] sm:$0xff] %v6743_v30  ;;  %v6745_v24 = vrot.slane %v2033_v20, 5  ;;  %v2222_v34 = vshrl.u32 %v6593_v8, 16  ;;  %v6753_v9 = vld [vmem:[#allocation2 + $0x4c] sm:$0xf] }
 0x1e2   : > { %v6734_v10 = vrot.slane %v8005_v11, 4  ;;  %v4940_v32 = vcombine.low %v2186_v48, %v2196_v2  ;;  %v4911_v62 = vcombine.low %v1867_v47, %v1870_v4  ;;  %v2225_v38 = vshll.u32 %v6593_v8, 16  ;;  %v2929_v47 = vld [vmem:[#allocation2 + $0x3c] sm:$0xe]  ;;  %v5343_v35 = vld [vmem:[#allocation2 + $0x4c] sm:$0xf] }
 0x1e3   : > { %v3021_v1 = vsel %vm5537_vm6, %v4854_v59, %v3020_v3  ;;  %v3024_v33 = vsel %vm5537_vm6, %v3022_v26, %v3023_v15  ;;  %v2102_v31 = vshrl.u32 %v1899_v50, 16  ;;  %v2105_v20 = vshll.u32 %v1899_v50, 16  ;;  %v6761_v59 = vld [vmem:[#allocation2 + $0x64] sm:$0xf] }
 0x1e4   : > { %3490 = vrot.lane.b32.xlu0 %v4940_v32, %s5387_s17  ;;  %3320 = vrot.lane.b32.xlu1 %v4911_v62, %s5381_s9  ;;  %v4824_v48 = vrot.slane %v1712_v13, 9  ;;  %v1817_v45 = vrot.slane %v6753_v9, 5  ;;  %v1820_v8 = vrot.slane %v6741_v16, 5  ;;  %v2060_v3 = vor.u32 %v6360_v49, %v6356_v44  ;;  %v6771_v62 = vpop.permute.xlu0 %3410  ;;  %v6773_v39 = vpop.permute.xlu1 %3232 }
 0x1e5   : > { %v2063_v15 = vshll.u32 %v5343_v35, 16  ;;  %v8007_v51 = vshrl.u32 %v7985_v46, 16  ;;  %v2073_v11 = vshll.u32 %v6570_v53, 16  ;;  %v4998_v2 = vcombine.low %v3021_v1, %v3024_v33  ;;  %8008 = vst [vmem:[#allocation13_spill] sm:$0xff] %v6773_v39  ;;  %v6776_v46 = vld [vmem:[#allocation2 + $0x54] sm:$0xf] }
 0x1e6   : > { %v4921_v4 = vcombine.low %v1899_v50, %v6761_v59  ;;  %v1818_v13 = vsel %vm5537_vm6, %v4824_v48, %v1817_v45  ;;  %v1819_v32 = vrot.slane %v1817_v45, 4  ;;  %v2061_v52 = vrot.slane %v2060_v3, 4 }
 0x1e7   : > { %v2069_v26 = vrot.slane %v8007_v51, 4  ;;  %v2065_v44 = vrot.slane %v2063_v15, 5  ;;  %v4853_v49 = vrot.slane %v2929_v47, 9  ;;  %v3013_v35 = vrot.slane %v6308_v61, 5  ;;  %v2321_v15 = vld [vmem:[#allocation2 + $0x3c] sm:$0xe] }
 0x1e8   : > { %3814 = vrot.lane.b32.xlu0 %v4998_v2, %s5386_s16  ;;  %v2111_v50 = vshll.u32 %v6761_v59, 16  ;;  %3404 = vrot.lane.b32.xlu1 %v4921_v4, %s5384_s14  ;;  %v1821_v1 = vsel %vm5537_vm6, %v1819_v32, %v1820_v8  ;;  %v3016_v33 = vrot.slane %v6755_v36, 5  ;;  %v6785_v48 = vrot.slane %v2102_v31, 4  ;;  %v6792_v30 = vpop.permute.xlu1 %3556  ;;  %v1283_v32 = vld [vmem:[#allocation2 + $0x48] sm:$0xf] }
 0x1e9   : > { %v6787_v45 = vrot.slane %v2105_v20, 5  ;;  %v2070_v47 = vor.u32 %v2069_v26, %v2065_v44  ;;  %v2075_v3 = vrot.slane %v2073_v11, 5  ;;  %v6789_v51 = vrot.slane %v2222_v34, 4  ;;  %8010 = vst [vmem:[#allocation14_spill] sm:$0xff] %v6792_v30  ;;  %v6800_v26 = vld [vmem:[#allocation2 + $0x44] sm:$0x1] }
 0x1ea   : > { %v4904_v53 = vcombine.low %v1818_v13, %v1821_v1  ;;  %v3015_v2 = vrot.slane %v3013_v35, 4  ;;  %v2663_v7 = vshrl.u32 %v6776_v46, 16  ;;  %v6794_v4 = vrot.slane %v2225_v38, 5  ;;  %v6808_v1 = vpop.permute.xlu0 %3216  ;;  %v6821_v34 = vld [vmem:[#allocation2 + $0x58] sm:$0xf] }
 0x1eb   : > { %8009 = vst [vmem:[#allocation12_spill] sm:$0xff] %v6789_v51  ;;  %v2066_v8 = vsel %vm5543_vm9, %v2061_v52, %v2065_v44  ;;  %v2071_v31 = vrot.slane %v2070_v47, 4  ;;  %v3014_v20 = vsel %vm5537_vm6, %v4853_v49, %v3013_v35  ;;  %v6802_v11 = vrot.slane %v2111_v50, 5  ;;  %8013 = vst [vmem:[#allocation38_spill] sm:$0xff] %v6808_v1  ;;  %v2329_v51 = vld [vmem:[#allocation2 + $0x9c] sm:$0xe] }
 0x1ec   : > { %8011 = vst [vmem:[#allocation36_spill] sm:$0xff] %v6794_v4  ;;  %3306 = vrot.lane.b32.xlu0 %v4904_v53, %s5381_s9  ;;  %v3017_v13 = vsel %vm5537_vm6, %v3015_v2, %v3016_v33  ;;  %v4838_v38 = vrot.slane %v2321_v15, 9  ;;  %v2666_v49 = vshll.u32 %v6776_v46, 16  ;;  %v2411_v35 = vrot.slane %v6538_v6, 5  ;;  %v2937_v15 = vld [vmem:[#allocation2 + $0x9c] sm:$0xe]  ;;  %v6819_v2 = vpop.permute.xlu1 %3572 }
 0x1ed   : > { %8012 = vst [vmem:[#allocation37_spill] sm:$0xff] %v6802_v11  ;;  %v2076_v44 = vsel %vm5543_vm9, %v2071_v31, %v2075_v3  ;;  %v4997_v47 = vcombine.low %v3014_v20, %v3017_v13  ;;  %v6816_v53 = vrot.slane %v2663_v7, 4  ;;  %v2414_v33 = vrot.slane %v6800_v26, 5  ;;  %8014 = vst [vmem:[#allocation39_spill] sm:$0xff] %v6819_v2 }
 0x1ee   : > { %v4935_v50 = vcombine.low %v2066_v8, %v2076_v44  ;;  %v2412_v52 = vsel %vm5537_vm6, %v4838_v38, %v2411_v35  ;;  %v2413_v30 = vrot.slane %v2411_v35, 4  ;;  %v1467_v3 = vshrl.u32 %v1283_v32, 16  ;;  %v6832_v44 = vld [vmem:[#allocation2 + $0xa4] sm:$0x1] }
 0x1ef   : > { %v1470_v31 = vshll.u32 %v1283_v32, 16  ;;  %v4967_v7 = vcombine.low %v6776_v46, %v6821_v34  ;;  %v1476_v8 = vshll.u32 %v6753_v9, 16  ;;  %v1480_v20 = vshrl.u32 %v6753_v9, 16  ;;  %v6834_v2 = vpop.permute.xlu0 %3470 }
 0x1f0   : > { %3480 = vrot.lane.b32.xlu1 %v4935_v50, %s5387_s17  ;;  %3812 = vrot.lane.b32.xlu0 %v4997_v47, %s5386_s16  ;;  %v1486_v13 = vshll.u32 %v6741_v16, 16  ;;  %v2415_v38 = vsel %vm5537_vm6, %v2413_v30, %v2414_v33  ;;  %v1469_v32 = vrot.slane %v1467_v3, 4  ;;  %v4861_v50 = vrot.slane %v2937_v15, 9  ;;  %v6838_v1 = vpop.permute.xlu1 %3300 }
 0x1f1   : > { %v1472_v35 = vrot.slane %v1470_v31, 5  ;;  %v4950_v47 = vcombine.low %v2412_v52, %v2415_v38  ;;  %v1478_v18 = vrot.slane %v1476_v8, 5  ;;  %v1482_v39 = vrot.slane %v1480_v20, 4  ;;  %8015 = vst [vmem:[#allocation40_spill] sm:$0xff] %v6838_v1  ;;  %v5344_v52 = vld [vmem:[#allocation2 + $0xac] sm:$0xf] }
 0x1f2   : > { %v1488_v46 = vrot.slane %v1486_v13, 5  ;;  %v3069_v9 = vrot.slane %v6409_v22, 5  ;;  %v3072_v16 = vrot.slane %v6832_v44, 5  ;;  %v2252_v4 = vor.u32 %v6406_v12, %v6380_v14  ;;  %v6849_v8 = vld [vmem:[#allocation2 + $0xa4] sm:$0x1] }
 0x1f3   : > { %v1473_v11 = vor.u32 %v1472_v35, %v1469_v32  ;;  %v1483_v30 = vor.u32 %v1482_v39, %v1478_v18  ;;  %v2255_v33 = vshll.u32 %v5344_v52, 16  ;;  %v8016_v15 = vshrl.u32 %v6280_v58, 16 }
 0x1f4   : > { %3656 = vrot.lane.b32.xlu1 %v4967_v7, %s5383_s13  ;;  %3558 = vrot.lane.b32.xlu0 %v4950_v47, %s5385_s15  ;;  %v2265_v31 = vshll.u32 %v6610_v27, 16  ;;  %v2668_v20 = vrot.slane %v2666_v49, 5  ;;  %v3070_v14 = vsel %vm5537_vm6, %v4861_v50, %v3069_v9  ;;  %v3071_v12 = vrot.slane %v3069_v9, 4  ;;  %v6855_v47 = vpop.permute.xlu1 %3316 }
 0x1f5   : > { %v2261_v3 = vrot.slane %v8016_v15, 4  ;;  %v1474_v13 = vrot.slane %v1473_v11, 4  ;;  %v1484_v38 = vrot.slane %v1483_v30, 4  ;;  %v2253_v7 = vrot.slane %v2252_v4, 4  ;;  %v6853_v39 = vpop.permute.xlu0 %3486  ;;  %8018 = vst [vmem:[#allocation42_spill] sm:$0xff] %v6855_v47 }
 0x1f6   : > { %v2257_v32 = vrot.slane %v2255_v33, 5  ;;  %v4846_v35 = vrot.slane %v2329_v51, 9  ;;  %8017 = vst [vmem:[#allocation41_spill] sm:$0xff] %v6853_v39  ;;  %v3073_v27 = vsel %vm5537_vm6, %v3071_v12, %v3072_v16  ;;  %v2467_v11 = vrot.slane %v6595_v19, 5  ;;  %v2520_v30 = vld [vmem:[#allocation2 + $0xb4] sm:$0xf] }
 0x1f7   : > { %v1479_v58 = vsel %vm5543_vm9, %v1474_v13, %v1478_v18  ;;  %v2470_v49 = vrot.slane %v6849_v8, 5  ;;  %v1489_v50 = vsel %vm5543_vm9, %v1484_v38, %v1488_v46  ;;  %v5005_v4 = vcombine.low %v3070_v14, %v3073_v27  ;;  %v6868_v13 = vld [vmem:[#allocation2 + $0xb8] sm:$0xf]  ;;  %v1281_v39 = vld [vmem:[#allocation2 + $0x3c] sm:$0xf] }
 0x1f8   : > { %v2262_v9 = vor.u32 %v2261_v3, %v2257_v32  ;;  %v2267_v51 = vrot.slane %v2265_v31, 5  ;;  %v2672_v52 = vshll.u32 %v6821_v34, 16  ;;  %v4888_v33 = vcombine.low %v1479_v58, %v1489_v50  ;;  %v2506_v31 = vld [vmem:[#allocation2 + $0x60] sm:$0xf]  ;;  %v5345_v58 = vld [vmem:[#allocation2 + $0x1c] sm:$0xf] }
 0x1f9   : > { %v2468_v18 = vsel %vm5537_vm6, %v4846_v35, %v2467_v11  ;;  %v2469_v15 = vrot.slane %v2467_v11, 4  ;;  %v2669_v16 = vor.u32 %v2668_v20, %v6816_v53  ;;  %v2676_v12 = vshrl.u32 %v6821_v34, 16  ;;  %3828 = vrot.lane.b32.xlu0 %v5005_v4, %s5386_s16  ;;  %v5346_v35 = vld [vmem:[#allocation2 + $0x18] sm:$0xf]  ;;  %v6885_v4 = vpop.permute.xlu0 %3810 }
 0x1fa   : > { %v2258_v46 = vsel %vm5543_vm9, %v2253_v7, %v2257_v32  ;;  %v2263_v3 = vrot.slane %v2262_v9, 4  ;;  %v8019_v14 = vshrl.u32 %v6761_v59, 16  ;;  %v4868_v27 = vcombine.low %v5346_v35, %v5345_v58  ;;  %3226 = vrot.lane.b32.xlu1 %v4888_v33, %s5382_s10  ;;  %8020 = vst [vmem:[#allocation43_spill] sm:$0xff] %v6885_v4  ;;  %v6887_v9 = vpop.permute.xlu1 %3400 }
 0x1fb   : > { %v2471_v53 = vsel %vm5537_vm6, %v2469_v15, %v2470_v49  ;;  %v2855_v20 = vshrl.u32 %v2520_v30, 16  ;;  %v2858_v7 = vshll.u32 %v2520_v30, 16  ;;  %v2864_v32 = vshll.u32 %v6868_v13, 16  ;;  %8021 = vst [vmem:[#allocation44_spill] sm:$0xff] %v6887_v9 }
 0x1fc   : > { %v6877_v38 = vrot.slane %v8019_v14, 4  ;;  %v2268_v11 = vsel %vm5543_vm9, %v2263_v3, %v2267_v51  ;;  %v4958_v50 = vcombine.low %v2468_v18, %v2471_v53  ;;  %v8022_v14 = vor.u32 %v6787_v45, %v6785_v48  ;;  %v6906_v53 = vld [vmem:[#allocation2 + $0x64] sm:$0xf] }
 0x1fd   : > { %v4943_v49 = vcombine.low %v2258_v46, %v2268_v11  ;;  %v2687_v15 = vshrl.u32 %v2506_v31, 16  ;;  %v6895_v35 = vrot.slane %v2669_v16, 4  ;;  %v6897_v51 = vrot.slane %v2672_v52, 5  ;;  %v6930_v9 = vpop.permute.xlu0 %3302 }
 0x1fe   : > { %v6892_v58 = vrot.slane %v8022_v14, 4  ;;  %v6899_v18 = vrot.slane %v2676_v12, 4  ;;  %v6903_v3 = vsel %vm400_vm1, %v4868_v27, %v6589_v23  ;;  %3574 = vrot.lane.b32.xlu0 %v4958_v50, %s5385_s15  ;;  %v6909_v48 = vrot.slane %v2855_v20, 4  ;;  %v8024_v20 = vld [vmem:[#allocation26_spill] sm:$0xff]  ;;  %v6932_v47 = vpop.permute.xlu1 %3416 }
 0x1ff   : > { %3496 = vrot.lane.b32.xlu1 %v4943_v49, %s5387_s17  ;;  %v2868_v45 = vshrl.u32 %v6868_v13, 16  ;;  %v2690_v52 = vshll.u32 %v2506_v31, 16  ;;  %v6913_v46 = vrot.slane %v2858_v7, 5  ;;  %v6915_v12 = vrot.slane %v2864_v32, 5  ;;  %v5347_v49 = vld [vmem:[#allocation2 + $0x40] sm:$0xf] }
 0x200   : > { %v4975_v23 = vcombine.low %v2520_v30, %v6868_v13  ;;  %v4968_v27 = vcombine.low %v2506_v31, %v6906_v53  ;;  %v6919_v11 = vrot.slane %v2687_v15, 4  ;;  %v2696_v50 = vshll.u32 %v6906_v53, 16  ;;  %v5348_v31 = vld [vmem:[#allocation2 + $0x4c] sm:$0xf]  ;;  %8026 = vst [vmem:[#allocation26_spill] sm:$0xff] %v6930_v9  ;;  %8027 = vst [vmem:[#allocation46_spill] sm:$0xff] %v6932_v47 }
 0x201   : > { %8023 = vst [vmem:[#allocation45_spill] sm:$0xff] %v6915_v12  ;;  %v2621_v14 = vor.u32 %v8024_v20, %v6411_v29  ;;  %v2624_v33 = vshll.u32 %v5347_v49, 16  ;;  %v8025_v7 = vshrl.u32 %v6308_v61, 16  ;;  %v2634_v32 = vshll.u32 %v6755_v36, 16  ;;  %v5350_v20 = vld [vmem:[#allocation2 + $0x78] sm:$0xf] }
 0x202   : > { %3658 = vrot.lane.b32.xlu0 %v4968_v27, %s5383_s13  ;;  %v2645_v30 = vor.u32 %v6532_v17, %v6525_v28  ;;  %v2648_v15 = vshll.u32 %v5348_v31, 16  ;;  %v6935_v29 = vrot.slane %v2690_v52, 5  ;;  %v5349_v27 = vld [vmem:[#allocation2 + $0x7c] sm:$0xf]  ;;  %v8028_v28 = vshrl.u32 %v6418_v25, 16 }
 0x203   : > { %v2630_v16 = vrot.slane %v8025_v7, 4  ;;  %3672 = vrot.lane.b32.xlu1 %v4975_v23, %s5383_s13  ;;  %v4876_v61 = vcombine.low %v5350_v20, %v5349_v27  ;;  %v2622_v49 = vrot.slane %v2621_v14, 4  ;;  %v2626_v7 = vrot.slane %v2624_v33, 5  ;;  %v1897_v14 = vld [vmem:[#allocation2 + $0x54] sm:$0xf] }
 0x204   : > { %v2636_v36 = vrot.slane %v2634_v32, 5  ;;  %v2646_v1 = vrot.slane %v2645_v30, 4  ;;  %v2650_v4 = vrot.slane %v2648_v15, 5  ;;  %v2654_v17 = vrot.slane %v8028_v28, 4 }
 0x205   : > { %v2627_v31 = vsel %vm5543_vm9, %v2622_v49, %v2626_v7  ;;  %v2631_v9 = vor.u32 %v2630_v16, %v2626_v7  ;;  %v2658_v47 = vshll.u32 %v6707_v60, 16  ;;  %v1443_v23 = vshrl.u32 %v1281_v39, 16  ;;  %v6947_v60 = vpop.permute.xlu0 %3826  ;;  %v6949_v7 = vpop.permute.xlu1 %3476 }
 0x206   : > { %v2651_v52 = vsel %vm5543_vm9, %v2646_v1, %v2650_v4  ;;  %v2655_v12 = vor.u32 %v2654_v17, %v2650_v4  ;;  %v1446_v27 = vshll.u32 %v1281_v39, 16  ;;  %v1452_v33 = vshll.u32 %v6662_v54, 16  ;;  %8029 = vst [vmem:[#allocation47_spill] sm:$0xff] %v6947_v60  ;;  %8030 = vst [vmem:[#allocation48_spill] sm:$0xff] %v6949_v7  ;;  %v6959_v60 = vld [vmem:[#allocation2 + $0x58] sm:$0xf] }
 0x207   : > { %v2632_v32 = vrot.slane %v2631_v9, 4  ;;  %v2660_v30 = vrot.slane %v2658_v47, 5  ;;  %v1445_v15 = vrot.slane %v1443_v23, 4  ;;  %v1456_v25 = vshrl.u32 %v6662_v54, 16 }
 0x208   : > { %v2656_v20 = vrot.slane %v2655_v12, 4  ;;  %v1448_v28 = vrot.slane %v1446_v27, 5  ;;  %v1454_v49 = vrot.slane %v1452_v33, 5  ;;  %v1462_v16 = vshll.u32 %v6650_v40, 16 }
 0x209   : > { %v2637_v1 = vsel %vm5543_vm9, %v2632_v32, %v2636_v36  ;;  %v1458_v39 = vrot.slane %v1456_v25, 4  ;;  %v2078_v4 = vshrl.u32 %v1897_v14, 16  ;;  %v2081_v17 = vshll.u32 %v1897_v14, 16 }
 0x20a   : > { %v3870_v47 = vsel %vm400_vm1, %v4876_v61, %v6700_v63  ;;  %v4981_v9 = vcombine.low %v2627_v31, %v2637_v1  ;;  %v2661_v54 = vsel %vm5543_vm9, %v2656_v20, %v2660_v30  ;;  %v1449_v12 = vor.u32 %v1448_v28, %v1445_v15  ;;  %v6978_v20 = vpop.permute.xlu0 %3318  ;;  %v6980_v28 = vpop.permute.xlu1 %3652 }
 0x20b   : > { %v6957_v23 = vrot.slane %v2868_v45, 4  ;;  %v4982_v40 = vcombine.low %v2651_v52, %v2661_v54  ;;  %v1459_v27 = vor.u32 %v1458_v39, %v1454_v49  ;;  %v1464_v33 = vrot.slane %v1462_v16, 5  ;;  %v5351_v39 = vld [vmem:[#allocation2 + $0xa0] sm:$0xf] }
 0x20c   : > { %v6961_v7 = vrot.slane %v2696_v50, 5  ;;  %v2700_v36 = vshrl.u32 %v6906_v53, 16  ;;  %v3034_v32 = vrot.slane %v6906_v53, 5  ;;  %3732 = vrot.lane.b32.xlu1 %v4981_v9, %s5388_s20  ;;  %v1450_v63 = vrot.slane %v1449_v12, 4  ;;  %v6991_v9 = vld [vmem:[#allocation2 + $0xb0] sm:$0x1] }
 0x20d   : > { %3734 = vrot.lane.b32.xlu0 %v4982_v40, %s5388_s20  ;;  %v1460_v61 = vrot.slane %v1459_v27, 4  ;;  %v2080_v31 = vrot.slane %v2078_v4, 4  ;;  %v2083_v45 = vrot.slane %v2081_v17, 5  ;;  %v3908_v52 = vsel %vm3886_vm3, %v3870_v47, %v6471_v57  ;;  %v5352_v40 = vld [vmem:[#allocation2 + $0xac] sm:$0xf] }
 0x20e   : > { %v2693_v30 = vor.u32 %v6935_v29, %v6919_v11  ;;  %v1455_v50 = vsel %vm5543_vm9, %v1450_v63, %v1454_v49  ;;  %v2087_v15 = vshll.u32 %v6959_v60, 16  ;;  %v6976_v25 = vsel %vm3919_vm4, %v3908_v52, %v6771_v62  ;;  %v8031_v29 = vld [vmem:[#allocation29_spill] sm:$0xff] }
 0x20f   : > { %v1465_v16 = vsel %vm5543_vm9, %v1460_v61, %v1464_v33  ;;  %v2091_v57 = vshrl.u32 %v6959_v60, 16  ;;  %v4920_v11 = vcombine.low %v1897_v14, %v6959_v60  ;;  %v2813_v49 = vor.u32 %v6500_v0, %v8031_v29  ;;  %v1297_v61 = vld [vmem:[#allocation2 + $0x9c] sm:$0xf] }
 0x210   : > { %v4887_v1 = vcombine.low %v1455_v50, %v1465_v16  ;;  %v2816_v4 = vshll.u32 %v5351_v39, 16  ;;  %v8032_v62 = vshrl.u32 %v6409_v22, 16  ;;  %v2826_v47 = vshll.u32 %v6832_v44, 16  ;;  %v7009_v16 = vpop.permute.xlu0 %3808 }
 0x211   : > { %v6993_v54 = vrot.slane %v2700_v36, 4  ;;  %v2084_v12 = vor.u32 %v2083_v45, %v2080_v31  ;;  %3402 = vrot.lane.b32.xlu0 %v4920_v11, %s5384_s14  ;;  %v2837_v14 = vor.u32 %v6722_v42, %v6534_v55  ;;  %v2840_v0 = vshll.u32 %v5352_v40, 16  ;;  %v7011_v11 = vpop.permute.xlu1 %3222 }
 0x212   : > { %v2822_v17 = vrot.slane %v8032_v62, 4  ;;  %v6998_v27 = vrot.slane %v2693_v30, 4  ;;  %3224 = vrot.lane.b32.xlu1 %v4887_v1, %s5382_s10  ;;  %v2814_v22 = vrot.slane %v2813_v49, 4  ;;  %v2818_v33 = vrot.slane %v2816_v4, 5 }
 0x213   : > { %v8033_v44 = vshrl.u32 %v6469_v43, 16  ;;  %v2838_v31 = vrot.slane %v2837_v14, 4  ;;  %v2842_v45 = vrot.slane %v2840_v0, 5  ;;  %v2850_v52 = vshll.u32 %v6991_v9, 16  ;;  %v7021_v0 = vld [vmem:[#allocation2 + $0x70] sm:$0xf] }
 0x214   : > { %v7005_v50 = vrot.slane %v2087_v15, 5  ;;  %v7007_v55 = vrot.slane %v2091_v57, 4  ;;  %v2823_v42 = vor.u32 %v2822_v17, %v2818_v33  ;;  %v2828_v30 = vrot.slane %v2826_v47, 5 }
 0x215   : > { %v2846_v63 = vrot.slane %v8033_v44, 4  ;;  %v7013_v29 = vrot.slane %v2084_v12, 4  ;;  %v2852_v1 = vrot.slane %v2850_v52, 5  ;;  %v1635_v39 = vshrl.u32 %v1297_v61, 16  ;;  %v7023_v12 = vld [vmem:[#allocation2 + $0x6c] sm:$0xf]  ;;  %v7035_v44 = vpop.permute.xlu0 %3554  ;;  %v7037_v36 = vpop.permute.xlu1 %3492 }
 0x216   : > { %v2819_v4 = vsel %vm5543_vm9, %v2814_v22, %v2818_v33  ;;  %v2824_v62 = vrot.slane %v2823_v42, 4  ;;  %v1638_v14 = vshll.u32 %v1297_v61, 16  ;;  %v1644_v15 = vshll.u32 %v6705_v21, 16 }
 0x217   : > { %v2847_v49 = vor.u32 %v2846_v63, %v2842_v45  ;;  %v2843_v57 = vsel %vm5543_vm9, %v2838_v31, %v2842_v45  ;;  %v1637_v47 = vrot.slane %v1635_v39, 4  ;;  %v1648_v40 = vshrl.u32 %v6705_v21, 16 }
 0x218   : > { %v2829_v22 = vsel %vm5543_vm9, %v2824_v62, %v2828_v30  ;;  %v1640_v33 = vrot.slane %v1638_v14, 5  ;;  %v1646_v63 = vrot.slane %v1644_v15, 5  ;;  %v1654_v52 = vshll.u32 %v6684_v5, 16  ;;  %v2324_v14 = vld [vmem:[#allocation2 + $0x60] sm:$0xe] }
 0x219   : > { %v2848_v17 = vrot.slane %v2847_v49, 4  ;;  %v4989_v61 = vcombine.low %v2819_v4, %v2829_v22  ;;  %v1650_v45 = vrot.slane %v1648_v40, 4  ;;  %v2036_v49 = vor.u32 %v6745_v24, %v6734_v10 }
 0x21a   : > { %v1641_v42 = vor.u32 %v1640_v33, %v1637_v47  ;;  %v2039_v39 = vshll.u32 %v6538_v6, 16  ;;  %v1656_v4 = vrot.slane %v1654_v52, 5  ;;  %v2049_v5 = vshll.u32 %v6800_v26, 16 }
 0x21b   : > { %v2853_v31 = vsel %vm5543_vm9, %v2848_v17, %v2852_v1  ;;  %3748 = vrot.lane.b32.xlu1 %v4989_v61, %s5388_s20  ;;  %v1651_v30 = vor.u32 %v1650_v45, %v1646_v63  ;;  %v8034_v1 = vshrl.u32 %v6538_v6, 16  ;;  %v2037_v10 = vrot.slane %v2036_v49, 4  ;;  %v8035_v61 = vld [vmem:[#allocation31_spill] sm:$0xff]  ;;  %v8036_v49 = vld [vmem:[#allocation6_spill] sm:$0xff] }
 0x21c   : > { %v4990_v21 = vcombine.low %v2843_v57, %v2853_v31  ;;  %v1642_v15 = vrot.slane %v1641_v42, 4  ;;  %v2041_v24 = vrot.slane %v2039_v39, 5  ;;  %vm3952_vm2 = vcmask 261120   ;;  %v1924_v57 = vld [vmem:[#allocation2 + $0x68] sm:$0x1] }
 0x21d   : > { %v2045_v62 = vrot.slane %v8034_v1, 4  ;;  %v1652_v17 = vrot.slane %v1651_v30, 4  ;;  %v2051_v47 = vrot.slane %v2049_v5, 5  ;;  %v3954_v26 = vsel %vm3952_vm2, %v6728_v56, %v6834_v2  ;;  %v7058_v30 = vld [vmem:[#allocation2 + $0x5c] sm:$0x1]  ;;  %v7060_v1 = vpop.permute.xlu0 %3824  ;;  %v7062_v56 = vpop.permute.xlu1 %3668  ;;  %v8039_v5 = vld [vmem:[#allocation36_spill] sm:$0xff] }
 0x21e   : > { %3750 = vrot.lane.b32.xlu0 %v4990_v21, %s5388_s20  ;;  %v1647_v40 = vsel %vm5543_vm9, %v1642_v15, %v1646_v63  ;;  %v2042_v6 = vsel %vm5543_vm9, %v2037_v10, %v2041_v24  ;;  %v3987_v31 = vsel %vm3985_vm5, %v3954_v26, %v8035_v61  ;;  %v2121_v45 = vshll.u32 %v1924_v57, 16  ;;  %8037 = vst [vmem:[#allocation29_spill] sm:$0xff] %v7060_v1  ;;  %v1713_v10 = vld [vmem:[#allocation2 + $0x54] sm:$0xe]  ;;  %v2932_v26 = vld [vmem:[#allocation2 + $0x60] sm:$0xe] }
 0x21f   : > { %v2046_v22 = vor.u32 %v2045_v62, %v2041_v24  ;;  %v1657_v33 = vsel %vm5543_vm9, %v1652_v17, %v1656_v4  ;;  %v4841_v52 = vrot.slane %v2324_v14, 9  ;;  %v4020_v63 = vsel %vm4018_vm7, %v3987_v31, %v8036_v49  ;;  %v8038_v62 = vld [vmem:[#allocation12_spill] sm:$0xff] }
 0x220   : > { %v4895_v21 = vcombine.low %v1647_v40, %v1657_v33  ;;  %v2432_v39 = vrot.slane %v6761_v59, 5  ;;  %v7064_v2 = vrot.slane %v2121_v45, 5  ;;  %v2435_v4 = vrot.slane %v1924_v57, 5  ;;  %v7077_v45 = vld [vmem:[#allocation2 + $0x58] sm:$0xf] }
 0x221   : > { %v2047_v42 = vrot.slane %v2046_v22, 4  ;;  %v2228_v15 = vor.u32 %v8039_v5, %v8038_v62  ;;  %v2231_v14 = vshll.u32 %v6595_v19, 16  ;;  %v8040_v40 = vshrl.u32 %v6595_v19, 16  ;;  %8041 = vst [vmem:[#allocation31_spill] sm:$0xff] %v7077_v45 }
 0x222   : > { %3240 = vrot.lane.b32.xlu1 %v4895_v21, %s5382_s10  ;;  %v2433_v24 = vsel %vm5537_vm6, %v4841_v52, %v2432_v39  ;;  %v2434_v17 = vrot.slane %v2432_v39, 4  ;;  %v2241_v31 = vshll.u32 %v6849_v8, 16  ;;  %v4825_v49 = vrot.slane %v1713_v10, 9  ;;  %v7094_v10 = vpop.permute.xlu1 %3238 }
 0x223   : > { %v2052_v59 = vsel %vm5543_vm9, %v2047_v42, %v2051_v47  ;;  %v2237_v22 = vrot.slane %v8040_v40, 4  ;;  %v2229_v33 = vrot.slane %v2228_v15, 4  ;;  %v2233_v61 = vrot.slane %v2231_v14, 5  ;;  %v7083_v42 = vld [vmem:[#allocation2 + $0x68] sm:$0x1]  ;;  %v7092_v14 = vpop.permute.xlu0 %3570 }
 0x224   : > { %v4934_v57 = vcombine.low %v2042_v6, %v2052_v59  ;;  %v2436_v21 = vsel %vm5537_vm6, %v2434_v17, %v2435_v4  ;;  %v1824_v47 = vrot.slane %v7077_v45, 5  ;;  %v1827_v52 = vrot.slane %v7058_v30, 5  ;;  %v1714_v17 = vld [vmem:[#allocation2 + $0x60] sm:$0xe] }
 0x225   : > { %v4953_v19 = vcombine.low %v2433_v24, %v2436_v21  ;;  %v2234_v6 = vsel %vm5543_vm9, %v2229_v33, %v2233_v61  ;;  %v2238_v39 = vor.u32 %v2237_v22, %v2233_v61  ;;  %v2243_v8 = vrot.slane %v2241_v31, 5  ;;  %v1311_v33 = vld [vmem:[#allocation2 + $0x68] sm:$0x1]  ;;  %v7106_v61 = vld [vmem:[#allocation2 + $0x60] sm:$0xf] }
 0x226   : > { %3478 = vrot.lane.b32.xlu0 %v4934_v57, %s5387_s17  ;;  %v1825_v62 = vsel %vm5537_vm6, %v4825_v49, %v1824_v47  ;;  %v1826_v5 = vrot.slane %v1824_v47, 4  ;;  %v4856_v4 = vrot.slane %v2932_v26, 9  ;;  %v3036_v15 = vrot.slane %v3034_v32, 4  ;;  %v8042_v26 = vld [vmem:[#allocation5_spill] sm:$0xff]  ;;  %8043 = vst [vmem:[#allocation6_spill] sm:$0xff] %v7106_v61  ;;  %v8044_v47 = vld [vmem:[#allocation10_spill] sm:$0xff] }
 0x227   : > { %3564 = vrot.lane.b32.xlu1 %v4953_v19, %s5385_s15  ;;  %v2239_v59 = vrot.slane %v2238_v39, 4  ;;  %v3037_v24 = vrot.slane %v7083_v42, 5  ;;  %v4053_v57 = vsel %vm4051_vm8, %v4020_v63, %v8042_v26  ;;  %v8046_v63 = vld [vmem:[#allocation37_spill] sm:$0xff] }
 0x228   : > { %v1828_v40 = vsel %vm5537_vm6, %v1826_v5, %v1827_v52  ;;  %v3035_v22 = vsel %vm5537_vm6, %v4856_v4, %v3034_v32  ;;  %v4086_v53 = vsel %vm4084_vm10, %v4053_v57, %v8044_v47  ;;  %v7114_v52 = vld [vmem:[#allocation2 + $0x64] sm:$0xf]  ;;  %v2114_v39 = vsel %vm5543_vm9, %v6892_v58, %v8046_v63 }
 0x229   : > { %v2244_v31 = vsel %vm5543_vm9, %v2239_v59, %v2243_v8  ;;  %v4905_v21 = vcombine.low %v1825_v62, %v1828_v40  ;;  %v3038_v49 = vsel %vm5537_vm6, %v3036_v15, %v3037_v24  ;;  %8045 = vst [vmem:[#allocation12_spill] sm:$0xff] %v7114_v52  ;;  %5184 = vmatprep.mubr.msk.bf16.mxu1 %vm4160_vm11, %v4086_v53  ;;  %v4826_v62 = vrot.slane %v1714_v17, 9  ;;  %v2931_v40 = vld [vmem:[#allocation2 + $0x54] sm:$0xe] }
 0x22a   : > { %v4942_v32 = vcombine.low %v2234_v6, %v2244_v31  ;;  %v5000_v19 = vcombine.low %v3035_v22, %v3038_v49  ;;  %v2118_v8 = vor.u32 %v6877_v38, %v8046_v63  ;;  %v1831_v5 = vrot.slane %v7114_v52, 5  ;;  %v7130_v22 = vpop.permute.xlu0 %3654  ;;  %v7132_v38 = vpop.permute.xlu1 %3728 }
 0x22b   : > { %3308 = vrot.lane.b32.xlu1 %v4905_v21, %s5381_s9  ;;  %v1834_v4 = vrot.slane %v1311_v33, 5  ;;  %v1515_v15 = vshrl.u32 %v7106_v61, 16  ;;  %v1518_v59 = vshll.u32 %v7106_v61, 16  ;;  %v1524_v24 = vshll.u32 %v7114_v52, 16  ;;  %8047 = vst [vmem:[#allocation36_spill] sm:$0xff] %v7130_v22 }
 0x22c   : > { %3494 = vrot.lane.b32.xlu0 %v4942_v32, %s5387_s17  ;;  %v2119_v6 = vrot.slane %v2118_v8, 4  ;;  %v1528_v58 = vshrl.u32 %v7114_v52, 16  ;;  %v1832_v17 = vsel %vm5537_vm6, %v4826_v62, %v1831_v5  ;;  %v1833_v26 = vrot.slane %v1831_v5, 4  ;;  %v2531_v32 = vld [vmem:[#allocation2 + $0x5c] sm:$0x1] }
 0x22d   : > { %v1517_v57 = vrot.slane %v1515_v15, 4  ;;  %v1534_v31 = vshll.u32 %v1311_v33, 16  ;;  %v1520_v49 = vrot.slane %v1518_v59, 5  ;;  %v1526_v47 = vrot.slane %v1524_v24, 5  ;;  %v2323_v52 = vld [vmem:[#allocation2 + $0x54] sm:$0xe] }
 0x22e   : > { %v2124_v21 = vsel %vm5543_vm9, %v2119_v6, %v7064_v2  ;;  %v1530_v53 = vrot.slane %v1528_v58, 4  ;;  %v1835_v8 = vsel %vm5537_vm6, %v1833_v26, %v1834_v4  ;;  %v4855_v61 = vrot.slane %v2931_v40, 9  ;;  %v7144_v2 = vld [vmem:[#allocation2 + $0x5c] sm:$0x1]  ;;  %v7157_v26 = vld [vmem:[#allocation2 + $0x54] sm:$0xf] }
 0x22f   : > { %v4937_v63 = vcombine.low %v2114_v39, %v2124_v21  ;;  %v1536_v1 = vrot.slane %v1534_v31, 5  ;;  %v4906_v62 = vcombine.low %v1832_v17, %v1835_v8  ;;  %v1521_v5 = vor.u32 %v1520_v49, %v1517_v57  ;;  %8050 = vst [vmem:[#allocation5_spill] sm:$0xff] %v7157_v26  ;;  %v7159_v57 = vpop.permute.xlu0 %3670 }
 0x230   : > { %3818 = vrot.lane.b32.xlu0 %v5000_v19, %s5386_s16  ;;  %v1531_v33 = vor.u32 %v1530_v53, %v1526_v47  ;;  %v8048_v15 = vrot.slane %v6821_v34, 5  ;;  %v3030_v6 = vrot.slane %v2531_v32, 5  ;;  %v2675_v19 = vsel %vm5543_vm9, %v6895_v35, %v6897_v51  ;;  %8051 = vst [vmem:[#allocation10_spill] sm:$0xff] %v7159_v57  ;;  %v7161_v34 = vpop.permute.xlu1 %3220 }
 0x231   : > { %3484 = vrot.lane.b32.xlu1 %v4937_v63, %s5387_s17  ;;  %v2679_v59 = vor.u32 %v6899_v18, %v6897_v51  ;;  %v1522_v24 = vrot.slane %v1521_v5, 4  ;;  %v2682_v40 = vshll.u32 %v2531_v32, 16  ;;  %v4840_v17 = vrot.slane %v2323_v52, 9 }
 0x232   : > { %v3029_v22 = vrot.slane %v8048_v15, 4  ;;  %v8049_v39 = vmov %v8048_v15  ;;  %v1532_v58 = vrot.slane %v1531_v33, 4  ;;  %v8052_v21 = vrot.slane %v6959_v60, 5  ;;  %v7184_v15 = vld [vmem:[#allocation2 + $0xa8] sm:$0xf] }
 0x233   : > { %v3028_v4 = vsel %vm5537_vm6, %v4855_v61, %v8049_v39  ;;  %v2680_v31 = vrot.slane %v2679_v59, 4  ;;  %v2428_v49 = vrot.slane %v7144_v2, 5  ;;  %v1527_v51 = vsel %vm5543_vm9, %v1522_v24, %v1526_v47  ;;  %v7189_v59 = vld [vmem:[#allocation2 + $0xac] sm:$0xf] }
 0x234   : > { %v3031_v61 = vsel %vm5537_vm6, %v3029_v22, %v3030_v6  ;;  %v2427_v35 = vrot.slane %v8052_v21, 4  ;;  %3310 = vrot.lane.b32.xlu0 %v4906_v62, %s5381_s9  ;;  %v1537_v18 = vsel %vm5543_vm9, %v1532_v58, %v1536_v1  ;;  %v2684_v53 = vrot.slane %v2682_v40, 5 }
 0x235   : > { %v4999_v52 = vcombine.low %v3028_v4, %v3031_v61  ;;  %v4890_v32 = vcombine.low %v1527_v51, %v1537_v18  ;;  %v8053_v63 = vmov %v8052_v21  ;;  %v1491_v5 = vshrl.u32 %v7157_v26, 16 }
 0x236   : > { %v2426_v22 = vsel %vm5537_vm6, %v4840_v17, %v8053_v63  ;;  %v2429_v8 = vsel %vm5537_vm6, %v2427_v35, %v2428_v49  ;;  %v2685_v62 = vsel %vm5543_vm9, %v2680_v31, %v2684_v53  ;;  %v1494_v33 = vshll.u32 %v7157_v26, 16  ;;  %v7203_v35 = vld [vmem:[#allocation2 + $0xb0] sm:$0x1] }
 0x237   : > { %v4952_v47 = vcombine.low %v2426_v22, %v2429_v8  ;;  %v1500_v1 = vshll.u32 %v7077_v45, 16  ;;  %3230 = vrot.lane.b32.xlu1 %v4890_v32, %s5382_s10  ;;  %v4983_v60 = vcombine.low %v2675_v19, %v2685_v62  ;;  %v1493_v39 = vrot.slane %v1491_v5, 4  ;;  %v7198_v19 = vpop.permute.xlu0 %3730  ;;  %v7200_v61 = vpop.permute.xlu1 %3744 }
 0x238   : > { %v1504_v4 = vshrl.u32 %v7077_v45, 16  ;;  %v1510_v6 = vshll.u32 %v7058_v30, 16  ;;  %3816 = vrot.lane.b32.xlu0 %v4999_v52, %s5386_s16  ;;  %v1496_v24 = vrot.slane %v1494_v33, 5  ;;  %v2699_v40 = vsel %vm5543_vm9, %v6998_v27, %v6961_v7 }
 0x239   : > { %v1502_v58 = vrot.slane %v1500_v1, 5  ;;  %v2703_v17 = vor.u32 %v6993_v54, %v6961_v7  ;;  %v2706_v21 = vshll.u32 %v7083_v42, 16  ;;  %v1659_v49 = vshrl.u32 %v7184_v15, 16 }
 0x23a   : > { %v1506_v31 = vrot.slane %v1504_v4, 4  ;;  %v1512_v30 = vrot.slane %v1510_v6, 5  ;;  %v1497_v51 = vor.u32 %v1496_v24, %v1493_v39  ;;  %v1662_v52 = vshll.u32 %v7184_v15, 16 }
 0x23b   : > { %v2704_v18 = vrot.slane %v2703_v17, 4  ;;  %v1668_v27 = vshll.u32 %v7189_v59, 16  ;;  %3736 = vrot.lane.b32.xlu1 %v4983_v60, %s5388_s20  ;;  %v2708_v54 = vrot.slane %v2706_v21, 5  ;;  %v1661_v53 = vrot.slane %v1659_v49, 4  ;;  %v1721_v60 = vld [vmem:[#allocation2 + $0xb4] sm:$0xe] }
 0x23c   : > { %v1507_v7 = vor.u32 %v1506_v31, %v1502_v58  ;;  %v1672_v32 = vshrl.u32 %v7189_v59, 16  ;;  %3562 = vrot.lane.b32.xlu0 %v4952_v47, %s5385_s15  ;;  %v1498_v42 = vrot.slane %v1497_v51, 4  ;;  %v1664_v63 = vrot.slane %v1662_v52, 5  ;;  %v7217_v47 = vpop.permute.xlu0 %3398  ;;  %v7219_v17 = vpop.permute.xlu1 %3236  ;;  %v7226_v51 = vld [vmem:[#allocation2 + $0xbc] sm:$0x1] }
 0x23d   : > { %v1670_v22 = vrot.slane %v1668_v27, 5  ;;  %v1678_v8 = vshll.u32 %v7203_v35, 16  ;;  %v3079_v5 = vrot.slane %v6991_v9, 5  ;;  %v2709_v33 = vsel %vm5543_vm9, %v2704_v18, %v2708_v54  ;;  %v2938_v18 = vld [vmem:[#allocation2 + $0xa8] sm:$0xe] }
 0x23e   : > { %v1508_v62 = vrot.slane %v1507_v7, 4  ;;  %v1674_v1 = vrot.slane %v1672_v32, 4  ;;  %v1503_v39 = vsel %vm5543_vm9, %v1498_v42, %v1502_v58  ;;  %v4984_v4 = vcombine.low %v2699_v40, %v2709_v33  ;;  %v7233_v27 = vld [vmem:[#allocation2 + $0xb8] sm:$0xf]  ;;  %v5356_v32 = vld [vmem:[#allocation2 + $0xc] sm:$0xf] }
 0x23f   : > { %v1665_v6 = vor.u32 %v1664_v63, %v1661_v53  ;;  %v1680_v24 = vrot.slane %v1678_v8, 5  ;;  %v2094_v21 = vor.u32 %v7007_v55, %v7005_v50  ;;  %v2097_v49 = vshll.u32 %v7144_v2, 16  ;;  %v5355_v53 = vld [vmem:[#allocation2 + $0x10] sm:$0xf] }
 0x240   : > { %v1513_v31 = vsel %vm5543_vm9, %v1508_v62, %v1512_v30  ;;  %v1675_v9 = vor.u32 %v1674_v1, %v1670_v22  ;;  %3738 = vrot.lane.b32.xlu0 %v4984_v4, %s5388_s20  ;;  %v2090_v52 = vsel %vm5543_vm9, %v7013_v29, %v7005_v50  ;;  %v4833_v30 = vrot.slane %v1721_v60, 9  ;;  %v1915_v50 = vld [vmem:[#allocation2 + $0xc0] sm:$0xf]  ;;  %v7240_v29 = vld [vmem:[#allocation2 + $0xc4] sm:$0xf] }
 0x241   : > { %v4889_v58 = vcombine.low %v1503_v39, %v1513_v31  ;;  %v1666_v40 = vrot.slane %v1665_v6, 4  ;;  %v2095_v54 = vrot.slane %v2094_v21, 4  ;;  %v2099_v55 = vrot.slane %v2097_v49, 5  ;;  %v2939_v4 = vld [vmem:[#allocation2 + $0xb4] sm:$0xe] }
 0x242   : > { %v1676_v7 = vrot.slane %v1675_v9, 4  ;;  %v1880_v2 = vrot.slane %v7233_v27, 5  ;;  %v4867_v42 = vcombine.low %v5356_v32, %v5355_v53  ;;  %v1883_v8 = vrot.slane %v7226_v51, 5  ;;  %v1932_v32 = vld [vmem:[#allocation2 + $0xc8] sm:$0x1] }
 0x243   : > { %3228 = vrot.lane.b32.xlu1 %v4889_v58, %s5382_s10  ;;  %v1671_v63 = vsel %vm5543_vm9, %v1666_v40, %v1670_v22  ;;  %v4862_v62 = vrot.slane %v2938_v18, 9  ;;  %v2100_v1 = vsel %vm5543_vm9, %v2095_v54, %v2099_v55  ;;  %v8054_v22 = vrot.slane %v6469_v43, 5  ;;  %v7254_v18 = vpop.permute.xlu0 %3746  ;;  %v8057_v54 = vld [vmem:[#allocation38_spill] sm:$0xff] }
 0x244   : > { %v1681_v33 = vsel %vm5543_vm9, %v1676_v7, %v1680_v24  ;;  %v1881_v60 = vsel %vm5537_vm6, %v4833_v30, %v1880_v2  ;;  %v1882_v39 = vrot.slane %v1880_v2, 4  ;;  %v4936_v31 = vcombine.low %v2090_v52, %v2100_v1  ;;  %v7256_v24 = vpop.permute.xlu1 %3560  ;;  %v7261_v52 = vld [vmem:[#allocation2 + $0xbc] sm:$0x1] }
 0x245   : > { %v4896_v6 = vcombine.low %v1671_v63, %v1681_v33  ;;  %v3077_v9 = vsel %vm5537_vm6, %v4862_v62, %v8054_v22  ;;  %v8055_v21 = vmov %v8054_v22  ;;  %8056 = vst [vmem:[#allocation37_spill] sm:$0xff] %v7256_v24  ;;  %v2294_v40 = vshrl.u32 %v1915_v50, 16  ;;  %v1720_v63 = vld [vmem:[#allocation2 + $0xa8] sm:$0xe] }
 0x246   : > { %v3078_v49 = vrot.slane %v8055_v21, 4  ;;  %v1884_v58 = vsel %vm5537_vm6, %v1882_v39, %v1883_v8  ;;  %v2297_v30 = vshll.u32 %v1915_v50, 16  ;;  %v2307_v7 = vshrl.u32 %v7240_v29, 16  ;;  %3482 = vrot.lane.b32.xlu0 %v4936_v31, %s5387_s17 }
 0x247   : > { %v3843_v55 = vsel %vm400_vm1, %v4867_v42, %v8057_v54  ;;  %3242 = vrot.lane.b32.xlu1 %v4896_v6, %s5382_s10  ;;  %v4913_v43 = vcombine.low %v1881_v60, %v1884_v58  ;;  %v4863_v53 = vrot.slane %v2939_v4, 9  ;;  %v2296_v62 = vrot.slane %v2294_v40, 4 }
 0x248   : > { %v3080_v2 = vsel %vm5537_vm6, %v3078_v49, %v3079_v5  ;;  %v2299_v33 = vrot.slane %v2297_v30, 5  ;;  %v8058_v1 = vrot.slane %v6868_v13, 5  ;;  %v3086_v6 = vrot.slane %v7261_v52, 5  ;;  %v2332_v30 = vld [vmem:[#allocation2 + $0xc0] sm:$0xe]  ;;  %v7287_v54 = vpop.permute.xlu1 %3576 }
 0x249   : > { %v5006_v8 = vcombine.low %v3077_v9, %v3080_v2  ;;  %v2303_v60 = vshll.u32 %v7240_v29, 16  ;;  %v2309_v31 = vrot.slane %v2307_v7, 4  ;;  %v2313_v4 = vshll.u32 %v1932_v32, 16  ;;  %v7285_v7 = vpop.permute.xlu0 %3414  ;;  %v8060_v2 = vld [vmem:[#allocation13_spill] sm:$0xff] }
 0x24a   : > { %v3085_v39 = vrot.slane %v8058_v1, 4  ;;  %v8059_v22 = vmov %v8058_v1  ;;  %v2300_v5 = vor.u32 %v2299_v33, %v2296_v62  ;;  %v4832_v21 = vrot.slane %v1720_v63, 9 }
 0x24b   : > { %v3084_v42 = vsel %vm5537_vm6, %v4863_v53, %v8059_v22  ;;  %v1873_v9 = vrot.slane %v7189_v59, 5  ;;  %v2861_v49 = vor.u32 %v6913_v46, %v6909_v48  ;;  %3324 = vrot.lane.b32.xlu1 %v4913_v43, %s5381_s9  ;;  %3830 = vrot.lane.b32.xlu0 %v5006_v8, %s5386_s16  ;;  %v2305_v58 = vrot.slane %v2303_v60, 5  ;;  %v8062_v46 = vld [vmem:[#allocation18_spill] sm:$0xff] }
 0x24c   : > { %v3087_v13 = vsel %vm5537_vm6, %v3085_v39, %v3086_v6  ;;  %v1876_v40 = vrot.slane %v7203_v35, 5  ;;  %v8061_v53 = vcombine.low %v7023_v12, %v7021_v0  ;;  %v3890_v43 = vsel %vm3886_vm3, %v3843_v55, %v8062_v46  ;;  %v8063_v0 = vld [vmem:[#allocation3_spill] sm:$0xff] }
 0x24d   : > { %v4929_v63 = vcombine.low %v1915_v50, %v7240_v29  ;;  %v2301_v8 = vrot.slane %v2300_v5, 4  ;;  %v5007_v62 = vcombine.low %v3084_v42, %v3087_v13  ;;  %v2310_v33 = vor.u32 %v2309_v31, %v2305_v58  ;;  %v8064_v5 = vld [vmem:[#allocation11_spill] sm:$0xff]  ;;  %v8066_v13 = vld [vmem:[#allocation22_spill] sm:$0xff] }
 0x24e   : > { %v3867_v48 = vsel %vm400_vm1, %v8061_v53, %v8060_v2  ;;  %v2315_v35 = vrot.slane %v2313_v4, 5  ;;  %v1875_v1 = vrot.slane %v1873_v9, 4  ;;  %v1874_v39 = vsel %vm5537_vm6, %v4832_v21, %v1873_v9  ;;  %v7315_v9 = vld [vmem:[#allocation2 + $0xb4] sm:$0xf] }
 0x24f   : > { %v4849_v22 = vrot.slane %v2332_v30, 9  ;;  %v2488_v6 = vrot.slane %v7240_v29, 5  ;;  %v2491_v60 = vrot.slane %v1932_v32, 5  ;;  %v3923_v12 = vsel %vm3919_vm4, %v3890_v43, %v8063_v0  ;;  %3420 = vrot.lane.b32.xlu1 %v4929_v63, %s5384_s14  ;;  %3832 = vrot.lane.b32.xlu0 %v5007_v62, %s5386_s16  ;;  %v8065_v32 = vld [vmem:[#allocation28_spill] sm:$0xff]  ;;  %v2331_v2 = vld [vmem:[#allocation2 + $0xb4] sm:$0xe]  ;;  %v7327_v53 = vpop.permute.xlu0 %3474 }
 0x250   : > { %v2306_v50 = vsel %vm5543_vm9, %v2301_v8, %v2305_v58  ;;  %v2311_v55 = vrot.slane %v2310_v33, 4  ;;  %v1877_v42 = vsel %vm5537_vm6, %v1875_v1, %v1876_v40  ;;  %v7308_v31 = vrot.slane %v2861_v49, 4  ;;  %v5357_v49 = vld [vmem:[%s7852_s3 + $0x20] ss:$0 sps:$4 sm:$0xff]   ;;  %v8067_v8 = vld [vmem:[#allocation34_spill] sm:$0xff] }
 0x251   : > { %v3892_v29 = vsel %vm3886_vm3, %v6903_v3, %v8064_v5  ;;  %v3906_v4 = vsel %vm3886_vm3, %v3867_v48, %v8065_v32  ;;  %v2490_v21 = vrot.slane %v2488_v6, 4  ;;  %v4912_v40 = vcombine.low %v1874_v39, %v1877_v42  ;;  %v7329_v48 = vpop.permute.xlu1 %3304  ;;  %v7337_v33 = vld [vmem:[#allocation2 + $0xbc] sm:$0x1]  ;;  %v7342_v39 = vld [vmem:[#allocation2 + $0x94] sm:$0xf] }
 0x252   : > { %v7319_v30 = vsel %vm3919_vm4, %v3892_v29, %v8066_v13  ;;  %v2316_v58 = vsel %vm5543_vm9, %v2311_v55, %v2315_v35  ;;  %v4194_v3 = vsel %vm449_vm0, %v5357_v49, 0  ;;  %v2489_v43 = vsel %vm5537_vm6, %v4849_v22, %v2488_v6  ;;  %v8068_v35 = vld [vmem:[#allocation16_spill] sm:$0xff]  ;;  %v7344_v0 = vld [vmem:[#allocation2 + $0x90] sm:$0xf]  ;;  %v7348_v6 = vld [vmem:[#allocation2 + $0xb8] sm:$0xf] }
 0x253   : > { %v4945_v46 = vcombine.low %v2306_v50, %v2316_v58  ;;  %v2492_v63 = vsel %vm5537_vm6, %v2490_v21, %v2491_v60  ;;  %5183 = vmatpush3.bf16.msra.mxu1 %v4194_v3  ;;  %v3956_v62 = vsel %vm3952_vm2, %v3923_v12, %v8067_v8  ;;  %v3939_v1 = vsel %vm3919_vm4, %v3906_v4, %v8068_v35  ;;  %v8069_v50 = vld [vmem:[#allocation24_spill] sm:$0xff]  ;;  %v2524_v55 = vld [vmem:[#allocation2 + $0xcc] sm:$0xf]  ;;  %v8070_v5 = vld [vmem:[#allocation19_spill] sm:$0xff] }
 0x254   : > { %3322 = vrot.lane.b32.xlu0 %v4912_v40, %s5381_s9  ;;  %v3989_v12 = vsel %vm3985_vm5, %v3956_v62, %v8069_v50  ;;  %v4928_v42 = vcombine.low %v7315_v9, %v7348_v6  ;;  %v2903_v32 = vshrl.u32 %v2524_v55, 16  ;;  %v4848_v4 = vrot.slane %v2331_v2, 9  ;;  %v2522_v21 = vld [vmem:[#allocation2 + $0xc0] sm:$0xf]  ;;  %v7360_v40 = vld [vmem:[#allocation2 + $0xd0] sm:$0xf] }
 0x255   : > { %3500 = vrot.lane.b32.xlu1 %v4945_v46, %s5387_s17  ;;  %v4022_v29 = vsel %vm4018_vm7, %v3989_v12, %v8070_v5  ;;  %v4961_v13 = vcombine.low %v2489_v43, %v2492_v63  ;;  %v2481_v49 = vrot.slane %v7348_v6, 5  ;;  %v2484_v3 = vrot.slane %v7337_v33, 5  ;;  %v8071_v62 = vld [vmem:[#allocation45_spill] sm:$0xff]  ;;  %v7377_v50 = vld [vmem:[#allocation2 + $0xb4] sm:$0xf] }
 0x256   : > { %v4055_v58 = vsel %vm4051_vm8, %v4022_v29, %v7132_v38  ;;  %v2906_v8 = vshll.u32 %v2524_v55, 16  ;;  %v2867_v2 = vsel %vm5543_vm9, %v7308_v31, %v8071_v62  ;;  %v2871_v43 = vor.u32 %v6957_v23, %v8071_v62  ;;  %v7379_v12 = vpop.permute.xlu0 %3490  ;;  %v7381_v5 = vpop.permute.xlu1 %3320  ;;  %v7386_v29 = vld [vmem:[#allocation2 + $0xc4] sm:$0xf] }
 0x257   : > { %v4088_v46 = vsel %vm4084_vm10, %v4055_v58, %v7009_v16  ;;  %v2482_v38 = vsel %vm5537_vm6, %v4848_v4, %v2481_v49  ;;  %v2483_v63 = vrot.slane %v2481_v49, 4  ;;  %v2874_v35 = vshll.u32 %v7261_v52, 16 }
 0x258   : > { %3418 = vrot.lane.b32.xlu0 %v4928_v42, %s5384_s14  ;;  %5185 = vmatmul.mubr.msk.bf16.vlgmr.msra.gmra.mrb[16].mxu1 %vm4160_vm11, %v4088_v46  ;;  %v2879_v16 = vshrl.u32 %v2522_v21, 16  ;;  %v2273_v23 = vshll.u32 %v7315_v9, 16  ;;  %v4977_v31 = vcombine.low %v2524_v55, %v7360_v40  ;;  %v2872_v42 = vrot.slane %v2871_v43, 4  ;;  %v8072_v43 = vld [vmem:[#allocation21_spill] sm:$0xff] }
 0x259   : > { %3580 = vrot.lane.b32.xlu1 %v4961_v13, %s5385_s15  ;;  %v2882_v4 = vshll.u32 %v2522_v21, 16  ;;  %v2905_v58 = vrot.slane %v2903_v32, 4  ;;  %v2916_v52 = vshrl.u32 %v7360_v40, 16  ;;  %v2485_v49 = vsel %vm5537_vm6, %v2483_v63, %v2484_v3 }
 0x25a   : > { %v2876_v46 = vrot.slane %v2874_v35, 5  ;;  %v2908_v62 = vrot.slane %v2906_v8, 5  ;;  %v4960_v22 = vcombine.low %v2482_v38, %v2485_v49  ;;  %v2881_v60 = vrot.slane %v2879_v16, 4  ;;  %v8073_v38 = vld [vmem:[#allocation25_spill] sm:$0xff]  ;;  %v7403_v16 = vpop.permute.xlu0 %3814 }
 0x25b   : > { %v2884_v57 = vrot.slane %v2882_v4, 5  ;;  %v2892_v55 = vshrl.u32 %v7386_v29, 16  ;;  %v3972_v26 = vsel %vm3952_vm2, %v3939_v1, %v8072_v43  ;;  %v1683_v32 = vshrl.u32 %v7377_v50, 16 }
 0x25c   : > { %v2877_v13 = vsel %vm5543_vm9, %v2872_v42, %v2876_v46  ;;  %3578 = vrot.lane.b32.xlu0 %v4960_v22, %s5385_s15  ;;  %v4976_v8 = vcombine.low %v2522_v21, %v7386_v29  ;;  %v4005_v63 = vsel %vm3985_vm5, %v3972_v26, %v8073_v38  ;;  %v1686_v35 = vshll.u32 %v7377_v50, 16  ;;  %v8074_v42 = vld [vmem:[#allocation8_spill] sm:$0xff]  ;;  %v7409_v46 = vld [vmem:[#allocation2 + $0xc8] sm:$0x1]  ;;  %v7411_v22 = vpop.permute.xlu1 %3404 }
 0x25d   : > { %3676 = vrot.lane.b32.xlu1 %v4977_v31, %s5383_s13  ;;  %v4991_v3 = vcombine.low %v2867_v2, %v2877_v13  ;;  %v4038_v4 = vsel %vm4018_vm7, %v4005_v63, %v8074_v42  ;;  %v1685_v1 = vrot.slane %v1683_v32, 4  ;;  %v1692_v49 = vshll.u32 %v7233_v27, 16  ;;  %8075 = vst [vmem:[#allocation38_spill] sm:$0xff] %v7411_v22 }
 0x25e   : > { %v1696_v31 = vshrl.u32 %v7233_v27, 16  ;;  %v7415_v21 = vsel %vm4051_vm8, %v4038_v4, %v7200_v61  ;;  %v1688_v26 = vrot.slane %v1686_v35, 5  ;;  %v1702_v2 = vshll.u32 %v7226_v51, 16 }
 0x25f   : > { %8076 = vst [vmem:[#allocation13_spill] sm:$0xff] %v7415_v21  ;;  %v2885_v13 = vor.u32 %v2884_v57, %v2881_v60  ;;  %v1694_v43 = vrot.slane %v1692_v49, 5  ;;  %v2888_v32 = vshll.u32 %v7386_v29, 16  ;;  %v2894_v63 = vrot.slane %v2892_v55, 4 }
 0x260   : > { %v1698_v38 = vrot.slane %v1696_v31, 4  ;;  %v8077_v42 = vshrl.u32 %v7315_v9, 16  ;;  %3674 = vrot.lane.b32.xlu0 %v4976_v8, %s5383_s13  ;;  %v1689_v22 = vor.u32 %v1688_v26, %v1685_v1  ;;  %v1704_v24 = vrot.slane %v1702_v2, 5  ;;  %v2541_v31 = vld [vmem:[#allocation2 + $0xd4] sm:$0x1]  ;;  %v7425_v9 = vpop.permute.xlu0 %3306 }
 0x261   : > { %3752 = vrot.lane.b32.xlu1 %v4991_v3, %s5388_s20  ;;  %v2898_v61 = vshll.u32 %v7409_v46, 16  ;;  %v2886_v4 = vrot.slane %v2885_v13, 4  ;;  %v2890_v51 = vrot.slane %v2888_v32, 5  ;;  %v2909_v57 = vor.u32 %v2908_v62, %v2905_v58 }
 0x262   : > { %v2272_v45 = vrot.slane %v8077_v42, 4  ;;  %v1699_v35 = vor.u32 %v1698_v38, %v1694_v43  ;;  %v2275_v60 = vrot.slane %v2273_v23, 5  ;;  %v1690_v49 = vrot.slane %v1689_v22, 4  ;;  %v7428_v26 = vpop.permute.xlu1 %3480 }
 0x263   : > { %v2912_v55 = vshll.u32 %v7360_v40, 16  ;;  %v2918_v21 = vrot.slane %v2916_v52, 4  ;;  %v2283_v3 = vshrl.u32 %v7348_v6, 16  ;;  %v2895_v8 = vor.u32 %v2894_v63, %v2890_v51 }
 0x264   : > { %v1700_v42 = vrot.slane %v1699_v35, 4  ;;  %v2900_v1 = vrot.slane %v2898_v61, 5  ;;  %v8078_v2 = vcombine.low %v7344_v0, %v7342_v39  ;;  %v1695_v58 = vsel %vm5543_vm9, %v1690_v49, %v1694_v43 }
 0x265   : > { %v2910_v62 = vrot.slane %v2909_v57, 4  ;;  %v2914_v52 = vrot.slane %v2912_v55, 5  ;;  %v2891_v13 = vsel %vm5543_vm9, %v2886_v4, %v2890_v51  ;;  %v2896_v38 = vrot.slane %v2895_v8, 4 }
 0x266   : > { %v3876_v23 = vsel %vm400_vm1, %v8078_v2, %v7094_v10  ;;  %v1705_v22 = vsel %vm5543_vm9, %v1700_v42, %v1704_v24  ;;  %v2922_v32 = vshll.u32 %v2541_v31, 16  ;;  %v2276_v0 = vor.u32 %v2275_v60, %v2272_v45  ;;  %v2941_v10 = vld [vmem:[#allocation2 + $0xcc] sm:$0xe]  ;;  %v7448_v42 = vpop.permute.xlu0 %3812  ;;  %v7450_v8 = vpop.permute.xlu1 %3656  ;;  %v5361_v2 = vld [vmem:[#allocation2 + $0x24] sm:$0xf] }
 0x267   : > { %v4897_v63 = vcombine.low %v1695_v58, %v1705_v22  ;;  %v2915_v61 = vsel %vm5543_vm9, %v2910_v62, %v2914_v52  ;;  %v2919_v39 = vor.u32 %v2918_v21, %v2914_v52  ;;  %v2901_v43 = vsel %vm5543_vm9, %v2896_v38, %v2900_v1 }
 0x268   : > { %v2924_v35 = vrot.slane %v2922_v32, 5  ;;  %v2279_v57 = vshll.u32 %v7348_v6, 16  ;;  %v2285_v49 = vrot.slane %v2283_v3, 4  ;;  %v4992_v24 = vcombine.low %v2891_v13, %v2901_v43  ;;  %v2940_v6 = vld [vmem:[#allocation2 + $0xc0] sm:$0xe] }
 0x269   : > { %3244 = vrot.lane.b32.xlu1 %v4897_v63, %s5382_s10  ;;  %v2920_v4 = vrot.slane %v2919_v39, 4  ;;  %v2277_v51 = vrot.slane %v2276_v0, 4  ;;  %v2289_v55 = vshll.u32 %v7337_v33, 16  ;;  %v3912_v21 = vsel %vm3886_vm3, %v3876_v23, %v6978_v20  ;;  %v5360_v3 = vld [vmem:[#allocation2 + $0x28] sm:$0xf] }
 0x26a   : > { %v2281_v45 = vrot.slane %v2279_v57, 5  ;;  %v4865_v60 = vrot.slane %v2941_v10, 9  ;;  %v3097_v1 = vrot.slane %v7360_v40, 5  ;;  %v4869_v58 = vcombine.low %v5361_v2, %v5360_v3  ;;  %3754 = vrot.lane.b32.xlu0 %v4992_v24, %s5388_s20  ;;  %v7479_v43 = vpop.permute.xlu0 %3558  ;;  %v5363_v57 = vld [vmem:[#allocation2 + $0x48] sm:$0xf]  ;;  %v8079_v24 = vld [vmem:[#allocation7_spill] sm:$0xff] }
 0x26b   : > { %v2925_v33 = vsel %vm5543_vm9, %v2920_v4, %v2924_v35  ;;  %v7460_v62 = vsel %vm3919_vm4, %v3912_v21, %v7285_v7  ;;  %v3100_v52 = vrot.slane %v2541_v31, 5  ;;  %v2291_v40 = vrot.slane %v2289_v55, 5  ;;  %v5362_v35 = vld [vmem:[#allocation2 + $0x4c] sm:$0xf] }
 0x26c   : > { %v4993_v22 = vcombine.low %v2915_v61, %v2925_v33  ;;  %v2282_v20 = vsel %vm5543_vm9, %v2277_v51, %v2281_v45  ;;  %v2286_v23 = vor.u32 %v2285_v49, %v2281_v45  ;;  %v3098_v13 = vsel %vm5537_vm6, %v4865_v60, %v3097_v1  ;;  %v3227_v49 = vpop.permute.xlu1 %3226  ;;  %v8080_v45 = vld [vmem:[#allocation43_spill] sm:$0xff] }
 0x26d   : > { %v3099_v38 = vrot.slane %v3097_v1, 4  ;;  %v4864_v32 = vrot.slane %v2940_v6, 9  ;;  %v3090_v63 = vrot.slane %v7386_v29, 5  ;;  %v3093_v7 = vrot.slane %v7409_v46, 5  ;;  %v8082_v1 = vld [vmem:[#allocation40_spill] sm:$0xff] }
 0x26e   : > { %3756 = vrot.lane.b32.xlu1 %v4993_v22, %s5388_s20  ;;  %v2287_v39 = vrot.slane %v2286_v23, 4  ;;  %v3958_v31 = vsel %vm3952_vm2, %v7319_v30, %v7327_v53  ;;  %v3974_v61 = vsel %vm3952_vm2, %v6976_v25, %v7379_v12  ;;  %v4872_v46 = vcombine.low %v5363_v57, %v5362_v35  ;;  %v3829_v2 = vpop.permute.xlu0 %3828  ;;  %v8083_v22 = vld [vmem:[#allocation30_spill] sm:$0xff]  ;;  %v8084_v23 = vld [vmem:[#allocation48_spill] sm:$0xff] }
 0x26f   : > { %v3101_v0 = vsel %vm5537_vm6, %v3099_v38, %v3100_v52  ;;  %v3092_v10 = vrot.slane %v3090_v63, 4  ;;  %v3991_v29 = vsel %vm3985_vm5, %v3958_v31, %v7035_v44  ;;  %v4007_v12 = vsel %vm3985_vm5, %v3974_v61, %v7092_v14  ;;  %v8085_v38 = vld [vmem:[#allocation14_spill] sm:$0xff] }
 0x270   : > { %v2292_v30 = vsel %vm5543_vm9, %v2287_v39, %v2291_v40  ;;  %v5009_v53 = vcombine.low %v3098_v13, %v3101_v0  ;;  %v4024_v25 = vsel %vm4018_vm7, %v3991_v29, %v8079_v24  ;;  %v3849_v4 = vsel %vm400_vm1, %v4869_v58, %v7161_v34  ;;  %v8081_v34 = vld [vmem:[#allocation20_spill] sm:$0xff]  ;;  %v8086_v35 = vld [vmem:[#allocation42_spill] sm:$0xff] }
 0x271   : > { %v4944_v44 = vcombine.low %v2282_v20, %v2292_v30  ;;  %v4057_v51 = vsel %vm4051_vm8, %v4024_v25, %v7198_v19  ;;  %v3091_v41 = vsel %vm5537_vm6, %v4864_v32, %v3090_v63  ;;  %v3094_v55 = vsel %vm5537_vm6, %v3092_v10, %v3093_v7  ;;  %v3497_v6 = vpop.permute.xlu1 %3496  ;;  %v5364_v63 = vld [vmem:[#allocation2 + $0x88] sm:$0xf]  ;;  %v5365_v39 = vld [vmem:[#allocation2 + $0x84] sm:$0xf] }
 0x272   : > { %3836 = vrot.lane.b32.xlu1 %v5009_v53, %s5386_s16  ;;  %v4090_v21 = vsel %vm4084_vm10, %v4057_v51, %v8080_v45  ;;  %v3858_v14 = vsel %vm400_vm1, %v4872_v46, %v3227_v49  ;;  %v4040_v60 = vsel %vm4018_vm7, %v4007_v12, %v8081_v34  ;;  %v3894_v37 = vsel %vm3886_vm3, %v3849_v4, %v8082_v1  ;;  %v3575_v13 = vpop.permute.xlu0 %3574  ;;  %v5366_v46 = vld [vmem:[#allocation2 + $0x40] sm:$0xf]  ;;  %v5367_v49 = vld [vmem:[#allocation2 + $0x3c] sm:$0xf]  ;;  %v5369_v1 = vld [vmem:[#allocation2 + $0x30] sm:$0xf] }
 0x273   : > { %3498 = vrot.lane.b32.xlu0 %v4944_v44, %s5387_s17  ;;  %5188 = vmatprep.mubr.msk.bf16.mxu1 %vm4160_vm11, %v4090_v21  ;;  %v7505_v19 = vsel %vm3886_vm3, %v3858_v14, %v7425_v9  ;;  %v5008_v3 = vcombine.low %v3091_v41, %v3094_v55  ;;  %v4880_v58 = vcombine.low %v7184_v15, %v7189_v59  ;;  %v8088_v4 = vld [vmem:[#allocation44_spill] sm:$0xff]  ;;  %v8089_v41 = vld [vmem:[#allocation39_spill] sm:$0xff]  ;;  %s5052_s17 = sshll.u32 %s8113_s25, 8 }
 0x274   : > { %v7513_v33 = vsel %vm4051_vm8, %v4040_v60, %v7254_v18  ;;  %v4881_v52 = vcombine.low %v7377_v50, %v7233_v27  ;;  %v3927_v9 = vsel %vm3919_vm4, %v3894_v37, %v8083_v22  ;;  %v4877_v18 = vcombine.low %v5365_v39, %v5364_v63  ;;  %v5368_v60 = vld [vmem:[#allocation2 + $0x34] sm:$0xf]  ;;  %v5371_v22 = vld [vmem:[#allocation2 + $0x9c] sm:$0xf]  ;;  %s7751_s23 = scalar_lea.vmem %s7856_s7, %s5052_s17 }
 0x275   : > { %v3673_v20 = vpop.permute.xlu1 %3672  ;;  %v3960_v40 = vsel %vm3952_vm2, %v3927_v9, %v8084_v23  ;;  %v4871_v30 = vcombine.low %v5367_v49, %v5366_v46  ;;  %v8091_v63 = vld [vmem:[#allocation46_spill] sm:$0xff] }
 0x276   : > { %v3993_v32 = vsel %vm3985_vm5, %v3960_v40, %v8085_v38  ;;  %v3873_v7 = vsel %vm400_vm1, %v4877_v18, %v7219_v17  ;;  %v7528_v0 = vpop.permute.xlu0 %3658  ;;  %v8087_v17 = vld [vmem:[#allocation32_spill] sm:$0xff]  ;;  %v8090_v40 = vld [vmem:[#allocation26_spill] sm:$0xff] }
 0x277   : > { %3834 = vrot.lane.b32.xlu0 %v5008_v3, %s5386_s16  ;;  %v4026_v31 = vsel %vm4018_vm7, %v3993_v32, %v6980_v28  ;;  %v3910_v57 = vsel %vm3886_vm3, %v3873_v7, %v8086_v35  ;;  %v5370_v3 = vld [vmem:[#allocation2 + $0xa0] sm:$0xf] }
 0x278   : > { %v3943_v53 = vsel %vm3919_vm4, %v3910_v57, %v8087_v17  ;;  %v4879_v9 = vcombine.low %v5371_v22, %v5370_v3 }
 0x279   : > { %v3976_v44 = vsel %vm3952_vm2, %v3943_v53, %v7037_v36  ;;  %v4870_v36 = vcombine.low %v5369_v1, %v5368_v60  ;;  %v8093_v53 = vld [vmem:[#allocation12_spill] sm:$0xff]  ;;  %v8097_v60 = vld [vmem:[#allocation41_spill] sm:$0xff] }
 0x27a   : > { %v4009_v55 = vsel %vm3985_vm5, %v3976_v44, %v8089_v41 }
 0x27b   : > { %v4042_v21 = vsel %vm4018_vm7, %v4009_v55, %v7062_v56 }
 0x27e   : > { %v3733_v61 = vpop.permute.xlu1 %3732 }
 0x27f   : > { %v4059_v10 = vsel %vm4051_vm8, %v4026_v31, %v3733_v61  ;;  %v3735_v24 = vpop.permute.xlu0 %3734 }
 0x280   : > { %v4092_v29 = vsel %vm4084_vm10, %v4059_v10, %v7448_v42 }
 0x281   : > { %5189 = vmatmul.mubr.msk.bf16.gmra.mrb[20].mxu1 %vm4160_vm11, %v4092_v29  ;;  %v8092_v29 = vld [vmem:[#allocation36_spill] sm:$0xff] }
 0x283   : > { %v7549_v45 = vpop.permute.xlu0 %3402 }
 0x284   : > { %v3225_v28 = vpop.permute.xlu1 %3224 }
 0x285   : > { %v3855_v25 = vsel %vm400_vm1, %v4871_v30, %v3225_v28 }
 0x286   : > { %v3898_v12 = vsel %vm3886_vm3, %v3855_v25, %v7329_v48 }
 0x287   : > { %v3931_v42 = vsel %vm3919_vm4, %v3898_v12, %v8088_v4 }
 0x288   : > { %v3964_v51 = vsel %vm3952_vm2, %v3931_v42, %v7428_v26  ;;  %v3852_v26 = vsel %vm400_vm1, %v4870_v36, %v7011_v11  ;;  %v8098_v36 = vld [vmem:[#allocation31_spill] sm:$0xff] }
 0x289   : > { %v3896_v38 = vsel %vm3886_vm3, %v3852_v26, %v8090_v40  ;;  %v8099_v26 = vld [vmem:[#allocation5_spill] sm:$0xff] }
 0x28a   : > { %v3929_v32 = vsel %vm3919_vm4, %v3896_v38, %v7217_v47  ;;  %v4873_v3 = vcombine.low %v8099_v26, %v8098_v36  ;;  %v8101_v38 = vld [vmem:[#allocation38_spill] sm:$0xff] }
 0x28d   : > { %v3749_v14 = vpop.permute.xlu1 %3748 }
 0x28e   : > { %v4075_v48 = vsel %vm4051_vm8, %v4042_v21, %v3749_v14  ;;  %v4373_v21 = vld [vmem:[%s7854_s5] sm:$0xf] }
 0x28f   : > { %v7555_v34 = vsel %vm4084_vm10, %v4075_v48, %v3829_v2  ;;  %v8096_v14 = vld [vmem:[#allocation4_spill] sm:$0xff]  ;;  %5255 = vmatprep.subr.msk.bf16.mxu0 %vm449_vm0, %v4373_v21 }
 0x290   : > { %v7557_v37 = vpop.permute.xlu0 %3750 }
 0x294   : > { %v3241_v23 = vpop.permute.xlu1 %3240 }
 0x295   : > { %v3879_v56 = vsel %vm400_vm1, %v4879_v9, %v3241_v23 }
 0x296   : > { %v3914_v2 = vsel %vm3886_vm3, %v3879_v56, %v7381_v5  ;;  %v8100_v56 = vld [vmem:[#allocation35_spill] sm:$0xff] }
 0x297   : > { %v3947_v39 = vsel %vm3919_vm4, %v3914_v2, %v8091_v63 }
 0x298   : > { %v3479_v18 = vpop.permute.xlu0 %3478  ;;  %v3980_v7 = vsel %vm3952_vm2, %v3947_v39, %v3497_v6 }
 0x299   : > { %v3962_v11 = vsel %vm3952_vm2, %v3929_v32, %v3479_v18  ;;  %v3565_v61 = vpop.permute.xlu1 %3564  ;;  %v4013_v10 = vsel %vm3985_vm5, %v3980_v7, %v7287_v54  ;;  %v3933_v32 = vsel %vm3919_vm4, %v7505_v19, %v7549_v45  ;;  %v8104_v19 = vld [vmem:[#allocation9_spill] sm:$0xff] }
 0x29a   : > { %v3995_v31 = vsel %vm3985_vm5, %v3962_v11, %v7479_v43  ;;  %v7579_v47 = vsel %vm4018_vm7, %v4013_v10, %v3673_v20  ;;  %v8094_v20 = vld [vmem:[#allocation6_spill] sm:$0xff] }
 0x29b   : > { %v4028_v5 = vsel %vm4018_vm7, %v3995_v31, %v8092_v29  ;;  %v4874_v28 = vcombine.low %v8094_v20, %v8093_v53  ;;  %v8102_v31 = vld [vmem:[#allocation15_spill] sm:$0xff]  ;;  %v8106_v53 = vld [vmem:[#allocation33_spill] sm:$0xff] }
 0x29c   : > { %v4061_v35 = vsel %vm4051_vm8, %v4028_v5, %v3735_v24  ;;  %v8103_v5 = vld [vmem:[#allocation17_spill] sm:$0xff] }
 0x29d   : > { %v4094_v57 = vsel %vm4084_vm10, %v4061_v35, %v7403_v16  ;;  %v3309_v6 = vpop.permute.xlu1 %3308  ;;  %v8095_v16 = vld [vmem:[#allocation37_spill] sm:$0xff] }
 0x29e   : > { %5192 = vmatprep.mubr.msk.bf16.mxu1 %vm4160_vm11, %v4094_v57  ;;  %v3495_v46 = vpop.permute.xlu0 %3494  ;;  %v3997_v4 = vsel %vm3985_vm5, %v3964_v51, %v8095_v16  ;;  %v4430_v51 = vsel %vm449_vm0, %v4373_v21, 0 }
 0x29f   : > { %v3978_v43 = vsel %vm3952_vm2, %v7460_v62, %v3495_v46  ;;  %v4030_v62 = vsel %vm4018_vm7, %v3997_v4, %v7450_v8  ;;  %5217 = vmatpush3.bf16.msra.mxu0 %v4430_v51  ;;  %v8108_v4 = vld [vmem:[#allocation29_spill] sm:$0xff] }
 0x2a0   : > { %v4011_v54 = vsel %vm3985_vm5, %v3978_v43, %v3575_v13 }
 0x2a2   : > { %v3819_v49 = vpop.permute.xlu0 %3818 }
 0x2a3   : > { %v3485_v30 = vpop.permute.xlu1 %3484 }
 0x2a6   : > { %v3311_v17 = vpop.permute.xlu0 %3310 }
 0x2a9   : > { %v3231_v25 = vpop.permute.xlu1 %3230 }
 0x2aa   : > { %v3864_v24 = vsel %vm400_vm1, %v4874_v28, %v3231_v25  ;;  %v3817_v12 = vpop.permute.xlu0 %3816 }
 0x2ab   : > { %v3904_v42 = vsel %vm3886_vm3, %v3864_v24, %v3311_v17 }
 0x2ac   : > { %v3937_v48 = vsel %vm3919_vm4, %v3904_v42, %v8096_v14  ;;  %v8109_v42 = vld [vmem:[#allocation13_spill] sm:$0xff] }
 0x2ad   : > { %v3737_v44 = vpop.permute.xlu1 %3736  ;;  %v3970_v1 = vsel %vm3952_vm2, %v3937_v48, %v8097_v60 }
 0x2ae   : > { %v4063_v13 = vsel %vm4051_vm8, %v4030_v62, %v3737_v44  ;;  %v3563_v41 = vpop.permute.xlu0 %3562  ;;  %v4003_v40 = vsel %vm3985_vm5, %v3970_v1, %v8100_v56  ;;  %v8110_v62 = vld [vmem:[#allocation47_spill] sm:$0xff] }
 0x2af   : > { %v4096_v55 = vsel %vm4084_vm10, %v4063_v13, %v3817_v12  ;;  %v4036_v10 = vsel %vm4018_vm7, %v4003_v40, %v8102_v31  ;;  %v4106_v44 = vsel %vm4084_vm10, %v7513_v33, %v8110_v62 }
 0x2b0   : > { %5193 = vmatmul.mubr.msk.bf16.gmra.mrb[24].mxu1 %vm4160_vm11, %v4096_v55 }
 0x2b2   : > { %v3739_v8 = vpop.permute.xlu0 %3738 }
 0x2b5   : > { %v3229_v22 = vpop.permute.xlu1 %3228 }
 0x2b6   : > { %v3861_v9 = vsel %vm400_vm1, %v4873_v3, %v3229_v22 }
 0x2b7   : > { %v3902_v23 = vsel %vm3886_vm3, %v3861_v9, %v3309_v6 }
 0x2b8   : > { %v3935_v2 = vsel %vm3919_vm4, %v3902_v23, %v8101_v38  ;;  %v3483_v18 = vpop.permute.xlu0 %3482 }
 0x2b9   : > { %v3968_v63 = vsel %vm3952_vm2, %v3935_v2, %v3485_v30  ;;  %v3243_v39 = vpop.permute.xlu1 %3242  ;;  %v3966_v11 = vsel %vm3952_vm2, %v3933_v32, %v3483_v18  ;;  %v8105_v30 = vld [vmem:[#allocation23_spill] sm:$0xff] }
 0x2ba   : > { %v4001_v7 = vsel %vm3985_vm5, %v3968_v63, %v3565_v61  ;;  %v3999_v29 = vsel %vm3985_vm5, %v3966_v11, %v3563_v41  ;;  %v4069_v61 = vsel %vm4051_vm8, %v4036_v10, %v8105_v30  ;;  %v8111_v41 = vld [vmem:[#allocation10_spill] sm:$0xff]  ;;  %v3882_v23 = vsel %vm400_vm1, %v4880_v58, %v3243_v39  ;;  %v7689_v11 = vld [vmem:[%s7853_s4] ss:$0 sm:$0xff] }
 0x2bb   : > { %v4034_v35 = vsel %vm4018_vm7, %v4001_v7, %v8103_v5  ;;  %v4032_v57 = vsel %vm4018_vm7, %v3999_v29, %v7528_v0  ;;  %v8107_v0 = vld [vmem:[#allocation27_spill] sm:$0xff]  ;;  %v4044_v55 = vsel %vm4018_vm7, %v4011_v54, %v8111_v41 }
 0x2bc   : > { %v4067_v45 = vsel %vm4051_vm8, %v4034_v35, %v8104_v19  ;;  %v4065_v43 = vsel %vm4051_vm8, %v4032_v57, %v3739_v8  ;;  %v4102_v28 = vsel %vm4084_vm10, %v4069_v61, %v8107_v0  ;;  %v4077_v48 = vsel %vm4051_vm8, %v4044_v55, %v7557_v37 }
 0x2bd   : > { %v3325_v6 = vpop.permute.xlu1 %3324  ;;  %v3831_v46 = vpop.permute.xlu0 %3830  ;;  %v4098_v17 = vsel %vm4084_vm10, %v4065_v43, %v3819_v49  ;;  %v4100_v20 = vsel %vm4084_vm10, %v4067_v45, %v8106_v53  ;;  %v4104_v49 = vsel %vm4084_vm10, %v8109_v42, %v8108_v4 }
 0x2be   : > { %5196 = vmatprep.mubr.msk.bf16.mxu1 %vm4160_vm11, %v4098_v17  ;;  %v4110_v51 = vsel %vm4084_vm10, %v4077_v48, %v3831_v46 }
 0x2bf   : > { %5197 = vmatmul.mubr.msk.bf16.gmra.mrb[28].mxu1 %vm4160_vm11, %v4100_v20 }
 0x2c0   : > { %5200 = vmatprep.mubr.msk.bf16.mxu1 %vm4160_vm11, %v4102_v28 }
 0x2c1   : > { %v3421_v25 = vpop.permute.xlu1 %3420  ;;  %v3833_v24 = vpop.permute.xlu0 %3832 }
 0x2c6   : > { %v3323_v16 = vpop.permute.xlu0 %3322 }
 0x2c7   : > { %v3501_v12 = vpop.permute.xlu1 %3500  ;;  %5201 = vmatmul.mubr.msk.bf16.gmra.mrb[32].mxu1 %vm4160_vm11, %v4104_v49  ;;  %v3916_v27 = vsel %vm3886_vm3, %v3882_v23, %v3323_v16 }
 0x2c8   : > { %5204 = vmatprep.mubr.msk.bf16.mxu1 %vm4160_vm11, %v4106_v44 }
 0x2ca   : > { %v3419_v21 = vpop.permute.xlu0 %3418 }
 0x2cb   : > { %v3581_v13 = vpop.permute.xlu1 %3580  ;;  %v3949_v50 = vsel %vm3919_vm4, %v3916_v27, %v3419_v21 }
 0x2ce   : > { %v3579_v8 = vpop.permute.xlu0 %3578 }
 0x2cf   : > { %v3677_v14 = vpop.permute.xlu1 %3676  ;;  %5205 = vmatmul.mubr.msk.bf16.gmra.mrb[36].mxu1 %vm4160_vm11, %v7555_v34 }
 0x2d0   : > { %5208 = vmatprep.mubr.msk.bf16.mxu1 %vm4160_vm11, %v4110_v51 }
 0x2d2   : > { %v3675_v54 = vpop.permute.xlu0 %3674 }
 0x2d3   : > { %v3753_v33 = vpop.permute.xlu1 %3752 }
 0x2d4   : > { %v4079_v60 = vsel %vm4051_vm8, %v7579_v47, %v3753_v33 }
 0x2d5   : > { %v4112_v1 = vsel %vm4084_vm10, %v4079_v60, %v3833_v24 }
 0x2d7   : > { %5209 = vmatmul.mubr.msk.bf16.gmra.mrb[40].mxu1 %vm4160_vm11, %v4112_v1 }
 0x2db   : > { %v3245_v36 = vpop.permute.xlu1 %3244 }
 0x2dc   : > { %v3885_v37 = vsel %vm400_vm1, %v4881_v52, %v3245_v36  ;;  %v3755_v3 = vpop.permute.xlu0 %3754 }
 0x2dd   : > { %v3918_v34 = vsel %vm3886_vm3, %v3885_v37, %v3325_v6 }
 0x2de   : > { %v3951_v26 = vsel %vm3919_vm4, %v3918_v34, %v3421_v25 }
 0x2df   : > { %v3984_v22 = vsel %vm3952_vm2, %v3951_v26, %v3501_v12 }
 0x2e0   : > { %v4017_v47 = vsel %vm3985_vm5, %v3984_v22, %v3581_v13  ;;  %v3757_v9 = vpop.permute.xlu1 %3756 }
 0x2e1   : > { %v4050_v56 = vsel %vm4018_vm7, %v4017_v47, %v3677_v14 }
 0x2e2   : > { %v4083_v40 = vsel %vm4051_vm8, %v4050_v56, %v3757_v9 }
 0x2e4   : > { %v3837_v2 = vpop.permute.xlu1 %3836 }
 0x2e5   : > { %v3499_v52 = vpop.permute.xlu0 %3498  ;;  %v4116_v15 = vsel %vm4084_vm10, %v4083_v40, %v3837_v2 }
 0x2e6   : > { %v3982_v38 = vsel %vm3952_vm2, %v3949_v50, %v3499_v52 }
 0x2e7   : > { %v4015_v32 = vsel %vm3985_vm5, %v3982_v38, %v3579_v8 }
 0x2e8   : > { %v4048_v63 = vsel %vm4018_vm7, %v4015_v32, %v3675_v54 }
 0x2e9   : > { %v4081_v59 = vsel %vm4051_vm8, %v4048_v63, %v3755_v3  ;;  %v3835_v58 = vpop.permute.xlu0 %3834 }
 0x2ea   : > { %v4114_v39 = vsel %vm4084_vm10, %v4081_v59, %v3835_v58 }
 0x2eb   : > { %5212 = vmatprep.mubr.msk.bf16.mxu1 %vm4160_vm11, %v4114_v39 }
 0x2ec   : > { %5213 = vmatmul.mubr.msk.bf16.gmra.mrb[44].mxu1 %vm4160_vm11, %v4116_v15 }
 0x32b   : > { %v5186_v18 = vpop.f32.mrb[16].mxu1 }
 0x32c   : > { %v4230_v7 = vpop.f32.mrb[17].mxu1  ;;  %v4239_v10 = vadd.f32 %v5186_v18, %v7689_v11 }
 0x32d   : > { %v5187_v31 = vpop.f32.mrb[18].mxu1  ;;  %v4231_v35 = vadd.f32 %v7689_v11, %v4230_v7 }
 0x32e   : > { %v4242_v29 = vadd.f32 %v5187_v31, %v7689_v11  ;;  %v4233_v5 = vpop.f32.mrb[19].mxu1 }
 0x32f   : > { %v4234_v57 = vadd.f32 %v7689_v11, %v4233_v5 }
 0x330   : > { %v4358_v19 = vpack.c.bf16 %v4242_v29, %v4239_v10 }
 0x331   : > { %v4357_v45 = vpack.c.bf16 %v4234_v57, %v4231_v35 }
 0x333   : > { %5218 = vmatprep.mubr.msk.bf16.mxu0 %vm400_vm1, %v4357_v45 }
 0x334   : > { %5219 = vmatmul.mubr.msk.bf16.vlgmr.msra.gmra.mrb[16].mxu0 %vm400_vm1, %v4358_v19 }
 0x354   : > { %v5190_v6 = vpop.f32.mrb[20].mxu1 }
 0x355   : > { %v4246_v46 = vpop.f32.mrb[21].mxu1  ;;  %v4255_v30 = vadd.f32 %v5190_v6, %v7689_v11 }
 0x356   : > { %v5191_v43 = vpop.f32.mrb[22].mxu1  ;;  %v4247_v53 = vadd.f32 %v7689_v11, %v4246_v46 }
 0x357   : > { %v4258_v61 = vadd.f32 %v5191_v43, %v7689_v11  ;;  %v4249_v17 = vpop.f32.mrb[23].mxu1 }
 0x358   : > { %v4250_v20 = vadd.f32 %v7689_v11, %v4249_v17 }
 0x359   : > { %v4360_v0 = vpack.c.bf16 %v4258_v61, %v4255_v30 }
 0x35a   : > { %v4359_v28 = vpack.c.bf16 %v4250_v20, %v4247_v53  ;;  %v7742_v20 = vld [vmem:[%s7855_s6] ss:$0 sm:$0xff] }
 0x35c   : > { %5222 = vmatprep.mubr.msk.bf16.mxu0 %vm400_vm1, %v4359_v28 }
 0x35d   : > { %5223 = vmatmul.mubr.msk.bf16.gmra.mrb[20].mxu0 %vm400_vm1, %v4360_v0 }
 0x383   : > { %v5194_v25 = vpop.f32.mrb[24].mxu1 }
 0x384   : > { %v4262_v24 = vpop.f32.mrb[25].mxu1  ;;  %v4271_v16 = vadd.f32 %v5194_v25, %v7689_v11 }
 0x385   : > { %v5195_v12 = vpop.f32.mrb[26].mxu1  ;;  %v4263_v49 = vadd.f32 %v7689_v11, %v4262_v24 }
 0x386   : > { %v4274_v4 = vadd.f32 %v5195_v12, %v7689_v11  ;;  %v4265_v42 = vpop.f32.mrb[27].mxu1 }
 0x387   : > { %v4266_v62 = vadd.f32 %v7689_v11, %v4265_v42 }
 0x388   : > { %v4362_v44 = vpack.c.bf16 %v4274_v4, %v4271_v16 }
 0x389   : > { %v4361_v13 = vpack.c.bf16 %v4266_v62, %v4263_v49 }
 0x38b   : > { %5226 = vmatprep.mubr.msk.bf16.mxu0 %vm400_vm1, %v4361_v13 }
 0x38c   : > { %5227 = vmatmul.mubr.msk.bf16.gmra.mrb[24].mxu0 %vm400_vm1, %v4362_v44 }
 0x392   : > { %v5198_v41 = vpop.f32.mrb[28].mxu1 }
 0x393   : > { %v4278_v55 = vpop.f32.mrb[29].mxu1  ;;  %v4287_v14 = vadd.f32 %v5198_v41, %v7689_v11 }
 0x394   : > { %v5199_v21 = vpop.f32.mrb[30].mxu1  ;;  %v4279_v8 = vadd.f32 %v7689_v11, %v4278_v55 }
 0x395   : > { %v4290_v48 = vadd.f32 %v5199_v21, %v7689_v11  ;;  %v4281_v51 = vpop.f32.mrb[31].mxu1 }
 0x396   : > { %v4282_v33 = vadd.f32 %v7689_v11, %v4281_v51 }
 0x397   : > { %v4364_v60 = vpack.c.bf16 %v4290_v48, %v4287_v14 }
 0x398   : > { %v4363_v1 = vpack.c.bf16 %v4282_v33, %v4279_v8 }
 0x39a   : > { %v5202_v54 = vpop.f32.mrb[32].mxu1  ;;  %5230 = vmatprep.mubr.msk.bf16.mxu0 %vm400_vm1, %v4363_v1 }
 0x39b   : > { %v4294_v36 = vpop.f32.mrb[33].mxu1  ;;  %5231 = vmatmul.mubr.msk.bf16.gmra.mrb[28].mxu0 %vm400_vm1, %v4364_v60  ;;  %v4303_v34 = vadd.f32 %v5202_v54, %v7689_v11 }
 0x39c   : > { %v5203_v37 = vpop.f32.mrb[34].mxu1  ;;  %v4295_v22 = vadd.f32 %v7689_v11, %v4294_v36 }
 0x39d   : > { %v4306_v26 = vadd.f32 %v5203_v37, %v7689_v11  ;;  %v4297_v3 = vpop.f32.mrb[35].mxu1 }
 0x39e   : > { %v4298_v47 = vadd.f32 %v7689_v11, %v4297_v3 }
 0x39f   : > { %v4366_v9 = vpack.c.bf16 %v4306_v26, %v4303_v34 }
 0x3a0   : > { %v4365_v23 = vpack.c.bf16 %v4298_v47, %v4295_v22 }
 0x3a2   : > { %v5206_v56 = vpop.f32.mrb[36].mxu1  ;;  %5234 = vmatprep.mubr.msk.bf16.mxu0 %vm400_vm1, %v4365_v23 }
 0x3a3   : > { %v4310_v27 = vpop.f32.mrb[37].mxu1  ;;  %5235 = vmatmul.mubr.msk.bf16.gmra.mrb[32].mxu0 %vm400_vm1, %v4366_v9  ;;  %v4319_v52 = vadd.f32 %v5206_v56, %v7689_v11 }
 0x3a4   : > { %v5207_v50 = vpop.f32.mrb[38].mxu1  ;;  %v4311_v2 = vadd.f32 %v7689_v11, %v4310_v27 }
 0x3a5   : > { %v4322_v40 = vadd.f32 %v5207_v50, %v7689_v11  ;;  %v4313_v38 = vpop.f32.mrb[39].mxu1 }
 0x3a6   : > { %v4314_v32 = vadd.f32 %v7689_v11, %v4313_v38 }
 0x3a7   : > { %v4368_v63 = vpack.c.bf16 %v4322_v40, %v4319_v52 }
 0x3a8   : > { %v4367_v15 = vpack.c.bf16 %v4314_v32, %v4311_v2 }
 0x3aa   : > { %v5210_v59 = vpop.f32.mrb[40].mxu1  ;;  %5238 = vmatprep.mubr.msk.bf16.mxu0 %vm400_vm1, %v4367_v15 }
 0x3ab   : > { %v4326_v58 = vpop.f32.mrb[41].mxu1  ;;  %5239 = vmatmul.mubr.msk.bf16.gmra.mrb[36].mxu0 %vm400_vm1, %v4368_v63  ;;  %v4335_v18 = vadd.f32 %v5210_v59, %v7689_v11 }
 0x3ac   : > { %v5211_v39 = vpop.f32.mrb[42].mxu1  ;;  %v4327_v10 = vadd.f32 %v7689_v11, %v4326_v58 }
 0x3ad   : > { %v4338_v7 = vadd.f32 %v5211_v39, %v7689_v11  ;;  %v4329_v31 = vpop.f32.mrb[43].mxu1 }
 0x3ae   : > { %v4330_v29 = vadd.f32 %v7689_v11, %v4329_v31 }
 0x3af   : > { %v4370_v5 = vpack.c.bf16 %v4338_v7, %v4335_v18 }
 0x3b0   : > { %v4369_v35 = vpack.c.bf16 %v4330_v29, %v4327_v10 }
 0x3b2   : > { %5242 = vmatprep.mubr.msk.bf16.mxu0 %vm400_vm1, %v4369_v35 }
 0x3b3   : > { %5243 = vmatmul.mubr.msk.bf16.gmra.mrb[40].mxu0 %vm400_vm1, %v4370_v5 }
 0x3bf   : > { %v5214_v57 = vpop.f32.mrb[44].mxu1 }
 0x3c0   : > { %v4342_v19 = vpop.f32.mrb[45].mxu1  ;;  %v4351_v6 = vadd.f32 %v5214_v57, %v7689_v11 }
 0x3c1   : > { %v5215_v45 = vpop.f32.mrb[46].mxu1  ;;  %v4343_v30 = vadd.f32 %v7689_v11, %v4342_v19 }
 0x3c2   : > { %v4354_v46 = vadd.f32 %v5215_v45, %v7689_v11  ;;  %v4345_v43 = vpop.f32.mrb[47].mxu1 }
 0x3c3   : > { %v4346_v61 = vadd.f32 %v7689_v11, %v4345_v43 }
 0x3c4   : > { %v4372_v17 = vpack.c.bf16 %v4354_v46, %v4351_v6 }
 0x3c5   : > { %v4371_v53 = vpack.c.bf16 %v4346_v61, %v4343_v30 }
 0x3c7   : > { %5246 = vmatprep.mubr.msk.bf16.mxu0 %vm400_vm1, %v4371_v53 }
 0x3c8   : > { %5247 = vmatmul.mubr.msk.bf16.gmra.mrb[44].mxu0 %vm400_vm1, %v4372_v17 }
 0x407   : > { %v5220_v0 = vpop.f32.mrb[16].mxu0 }
 0x408   : > { %v4475_v28 = vadd.f32 %v5220_v0, %v7742_v20  ;;  %v4466_v25 = vpop.f32.mrb[17].mxu0 }
 0x409   : > { %v4467_v24 = vadd.f32 %v7742_v20, %v4466_v25  ;;  %v5221_v12 = vpop.f32.mrb[18].mxu0 }
 0x40a   : > { %v4595_v11 = vmax.f32 %v4475_v28, 0.0  ;;  %v4478_v16 = vadd.f32 %v5221_v12, %v7742_v20  ;;  %v4469_v4 = vpop.f32.mrb[19].mxu0 }
 0x40b   : > { %v4593_v42 = vmax.f32 %v4467_v24, 0.0  ;;  %v4470_v49 = vadd.f32 %v7742_v20, %v4469_v4 }
 0x40c   : > { %v4627_v62 = vmin.f32 %v4595_v11, 6.0  ;;  %v4596_v44 = vmax.f32 %v4478_v16, 0.0 }
 0x40d   : > { %v4625_v13 = vmin.f32 %v4593_v42, 6.0  ;;  %v4594_v41 = vmax.f32 %v4470_v49, 0.0 }
 0x40e   : > { %4659 = vst.msk [vmem:[%s7751_s23 + $0x10] sm:$0xff] %vm400_vm1, %v4627_v62  ;;  %v4628_v55 = vmin.f32 %v4596_v44, 6.0 }
 0x40f   : > { %4657 = vst.msk [vmem:[%s7751_s23] sm:$0xff] %vm400_vm1, %v4625_v13  ;;  %v4626_v21 = vmin.f32 %v4594_v41, 6.0 }
 0x410   : > { %4660 = vst.msk [vmem:[%s7751_s23 + $0x18] sm:$0xff] %vm400_vm1, %v4628_v55 }
 0x411   : > { %4658 = vst.msk [vmem:[%s7751_s23 + $0x8] sm:$0xff] %vm400_vm1, %v4626_v21 }
 0x430   : > { %v5224_v14 = vpop.f32.mrb[20].mxu0 }
 0x431   : > { %v4491_v48 = vadd.f32 %v5224_v14, %v7742_v20  ;;  %v4482_v51 = vpop.f32.mrb[21].mxu0 }
 0x432   : > { %v4483_v8 = vadd.f32 %v7742_v20, %v4482_v51  ;;  %v5225_v33 = vpop.f32.mrb[22].mxu0 }
 0x433   : > { %v4599_v60 = vmax.f32 %v4491_v48, 0.0  ;;  %v4494_v1 = vadd.f32 %v5225_v33, %v7742_v20  ;;  %v4485_v54 = vpop.f32.mrb[23].mxu0 }
 0x434   : > { %v4597_v36 = vmax.f32 %v4483_v8, 0.0  ;;  %v4486_v37 = vadd.f32 %v7742_v20, %v4485_v54 }
 0x435   : > { %v4631_v34 = vmin.f32 %v4599_v60, 6.0  ;;  %v4600_v26 = vmax.f32 %v4494_v1, 0.0 }
 0x436   : > { %v4629_v3 = vmin.f32 %v4597_v36, 6.0  ;;  %v4598_v22 = vmax.f32 %v4486_v37, 0.0 }
 0x437   : > { %4663 = vst.msk [vmem:[%s7751_s23 + $0x30] sm:$0xff] %vm400_vm1, %v4631_v34  ;;  %v4632_v47 = vmin.f32 %v4600_v26, 6.0 }
 0x438   : > { %4661 = vst.msk [vmem:[%s7751_s23 + $0x20] sm:$0xff] %vm400_vm1, %v4629_v3  ;;  %v4630_v9 = vmin.f32 %v4598_v22, 6.0 }
 0x439   : > { %4664 = vst.msk [vmem:[%s7751_s23 + $0x38] sm:$0xff] %vm400_vm1, %v4632_v47 }
 0x43a   : > { %4662 = vst.msk [vmem:[%s7751_s23 + $0x28] sm:$0xff] %vm400_vm1, %v4630_v9 }
 0x45f   : > { %v5228_v23 = vpop.f32.mrb[24].mxu0 }
 0x460   : > { %v4507_v56 = vadd.f32 %v5228_v23, %v7742_v20  ;;  %v4498_v27 = vpop.f32.mrb[25].mxu0 }
 0x461   : > { %v4499_v50 = vadd.f32 %v7742_v20, %v4498_v27  ;;  %v5229_v52 = vpop.f32.mrb[26].mxu0 }
 0x462   : > { %v4603_v40 = vmax.f32 %v4507_v56, 0.0  ;;  %v4510_v38 = vadd.f32 %v5229_v52, %v7742_v20  ;;  %v4501_v2 = vpop.f32.mrb[27].mxu0 }
 0x463   : > { %v4601_v32 = vmax.f32 %v4499_v50, 0.0  ;;  %v4502_v63 = vadd.f32 %v7742_v20, %v4501_v2 }
 0x464   : > { %v4635_v15 = vmin.f32 %v4603_v40, 6.0  ;;  %v4604_v59 = vmax.f32 %v4510_v38, 0.0 }
 0x465   : > { %v4633_v58 = vmin.f32 %v4601_v32, 6.0  ;;  %v4602_v39 = vmax.f32 %v4502_v63, 0.0 }
 0x466   : > { %4667 = vst.msk [vmem:[%s7751_s23 + $0x50] sm:$0xff] %vm400_vm1, %v4635_v15  ;;  %v4636_v18 = vmin.f32 %v4604_v59, 6.0 }
 0x467   : > { %4665 = vst.msk [vmem:[%s7751_s23 + $0x40] sm:$0xff] %vm400_vm1, %v4633_v58  ;;  %v4634_v7 = vmin.f32 %v4602_v39, 6.0 }
 0x468   : > { %4668 = vst.msk [vmem:[%s7751_s23 + $0x58] sm:$0xff] %vm400_vm1, %v4636_v18 }
 0x469   : > { %4666 = vst.msk [vmem:[%s7751_s23 + $0x48] sm:$0xff] %vm400_vm1, %v4634_v7 }
 0x46e   : > { %v5232_v31 = vpop.f32.mrb[28].mxu0 }
 0x46f   : > { %v4523_v10 = vadd.f32 %v5232_v31, %v7742_v20  ;;  %v4514_v29 = vpop.f32.mrb[29].mxu0 }
 0x470   : > { %v4515_v5 = vadd.f32 %v7742_v20, %v4514_v29  ;;  %v5233_v35 = vpop.f32.mrb[30].mxu0 }
 0x471   : > { %v4607_v57 = vmax.f32 %v4523_v10, 0.0  ;;  %v4526_v19 = vadd.f32 %v5233_v35, %v7742_v20  ;;  %v4517_v45 = vpop.f32.mrb[31].mxu0 }
 0x472   : > { %v4605_v6 = vmax.f32 %v4515_v5, 0.0  ;;  %v4518_v46 = vadd.f32 %v7742_v20, %v4517_v45 }
 0x473   : > { %v4639_v43 = vmin.f32 %v4607_v57, 6.0  ;;  %v4608_v30 = vmax.f32 %v4526_v19, 0.0 }
 0x474   : > { %v4637_v61 = vmin.f32 %v4605_v6, 6.0  ;;  %v4606_v17 = vmax.f32 %v4518_v46, 0.0 }
 0x475   : > { %4671 = vst.msk [vmem:[%s7751_s23 + $0x70] sm:$0xff] %vm400_vm1, %v4639_v43  ;;  %v4640_v53 = vmin.f32 %v4608_v30, 6.0 }
 0x476   : > { %4669 = vst.msk [vmem:[%s7751_s23 + $0x60] sm:$0xff] %vm400_vm1, %v4637_v61  ;;  %v4638_v0 = vmin.f32 %v4606_v17, 6.0  ;;  %v5236_v28 = vpop.f32.mrb[32].mxu0 }
 0x477   : > { %4672 = vst.msk [vmem:[%s7751_s23 + $0x78] sm:$0xff] %vm400_vm1, %v4640_v53  ;;  %v4539_v25 = vadd.f32 %v5236_v28, %v7742_v20  ;;  %v4530_v24 = vpop.f32.mrb[33].mxu0 }
 0x478   : > { %4670 = vst.msk [vmem:[%s7751_s23 + $0x68] sm:$0xff] %vm400_vm1, %v4638_v0  ;;  %v4531_v12 = vadd.f32 %v7742_v20, %v4530_v24  ;;  %v5237_v11 = vpop.f32.mrb[34].mxu0 }
 0x479   : > { %v4611_v16 = vmax.f32 %v4539_v25, 0.0  ;;  %v4542_v4 = vadd.f32 %v5237_v11, %v7742_v20  ;;  %v4533_v42 = vpop.f32.mrb[35].mxu0 }
 0x47a   : > { %v4609_v49 = vmax.f32 %v4531_v12, 0.0  ;;  %v4534_v62 = vadd.f32 %v7742_v20, %v4533_v42 }
 0x47b   : > { %v4643_v44 = vmin.f32 %v4611_v16, 6.0  ;;  %v4612_v13 = vmax.f32 %v4542_v4, 0.0 }
 0x47c   : > { %v4641_v41 = vmin.f32 %v4609_v49, 6.0  ;;  %v4610_v55 = vmax.f32 %v4534_v62, 0.0 }
 0x47d   : > { %4675 = vst.msk [vmem:[%s7751_s23 + $0x90] sm:$0xff] %vm400_vm1, %v4643_v44  ;;  %v4644_v21 = vmin.f32 %v4612_v13, 6.0 }
 0x47e   : > { %4673 = vst.msk [vmem:[%s7751_s23 + $0x80] sm:$0xff] %vm400_vm1, %v4641_v41  ;;  %v4642_v14 = vmin.f32 %v4610_v55, 6.0  ;;  %v5240_v48 = vpop.f32.mrb[36].mxu0 }
 0x47f   : > { %4676 = vst.msk [vmem:[%s7751_s23 + $0x98] sm:$0xff] %vm400_vm1, %v4644_v21  ;;  %v4555_v51 = vadd.f32 %v5240_v48, %v7742_v20  ;;  %v4546_v8 = vpop.f32.mrb[37].mxu0 }
 0x480   : > { %4674 = vst.msk [vmem:[%s7751_s23 + $0x88] sm:$0xff] %vm400_vm1, %v4642_v14  ;;  %v4547_v33 = vadd.f32 %v7742_v20, %v4546_v8  ;;  %v5241_v60 = vpop.f32.mrb[38].mxu0 }
 0x481   : > { %v4615_v1 = vmax.f32 %v4555_v51, 0.0  ;;  %v4558_v54 = vadd.f32 %v5241_v60, %v7742_v20  ;;  %v4549_v36 = vpop.f32.mrb[39].mxu0 }
 0x482   : > { %v4613_v37 = vmax.f32 %v4547_v33, 0.0  ;;  %v4550_v34 = vadd.f32 %v7742_v20, %v4549_v36 }
 0x483   : > { %v4647_v26 = vmin.f32 %v4615_v1, 6.0  ;;  %v4616_v3 = vmax.f32 %v4558_v54, 0.0 }
 0x484   : > { %v4645_v22 = vmin.f32 %v4613_v37, 6.0  ;;  %v4614_v47 = vmax.f32 %v4550_v34, 0.0 }
 0x485   : > { %4679 = vst.msk [vmem:[%s7751_s23 + $0xb0] sm:$0xff] %vm400_vm1, %v4647_v26  ;;  %v4648_v9 = vmin.f32 %v4616_v3, 6.0 }
 0x486   : > { %4677 = vst.msk [vmem:[%s7751_s23 + $0xa0] sm:$0xff] %vm400_vm1, %v4645_v22  ;;  %v4646_v23 = vmin.f32 %v4614_v47, 6.0  ;;  %v5244_v56 = vpop.f32.mrb[40].mxu0 }
 0x487   : > { %4680 = vst.msk [vmem:[%s7751_s23 + $0xb8] sm:$0xff] %vm400_vm1, %v4648_v9  ;;  %v4571_v27 = vadd.f32 %v5244_v56, %v7742_v20  ;;  %v4562_v50 = vpop.f32.mrb[41].mxu0 }
 0x488   : > { %4678 = vst.msk [vmem:[%s7751_s23 + $0xa8] sm:$0xff] %vm400_vm1, %v4646_v23  ;;  %v4563_v52 = vadd.f32 %v7742_v20, %v4562_v50  ;;  %v5245_v40 = vpop.f32.mrb[42].mxu0 }
 0x489   : > { %v4619_v38 = vmax.f32 %v4571_v27, 0.0  ;;  %v4574_v2 = vadd.f32 %v5245_v40, %v7742_v20  ;;  %v4565_v32 = vpop.f32.mrb[43].mxu0 }
 0x48a   : > { %v4617_v63 = vmax.f32 %v4563_v52, 0.0  ;;  %v4566_v15 = vadd.f32 %v7742_v20, %v4565_v32 }
 0x48b   : > { %v4651_v59 = vmin.f32 %v4619_v38, 6.0  ;;  %v4620_v58 = vmax.f32 %v4574_v2, 0.0 }
 0x48c   : > { %v4649_v39 = vmin.f32 %v4617_v63, 6.0  ;;  %v4618_v18 = vmax.f32 %v4566_v15, 0.0 }
 0x48d   : > { %4683 = vst.msk [vmem:[%s7751_s23 + $0xd0] sm:$0xff] %vm400_vm1, %v4651_v59  ;;  %v4652_v7 = vmin.f32 %v4620_v58, 6.0 }
 0x48e   : > { %4681 = vst.msk [vmem:[%s7751_s23 + $0xc0] sm:$0xff] %vm400_vm1, %v4649_v39  ;;  %v4650_v31 = vmin.f32 %v4618_v18, 6.0 }
 0x48f   : > { %4684 = vst.msk [vmem:[%s7751_s23 + $0xd8] sm:$0xff] %vm400_vm1, %v4652_v7 }
 0x490   : > { %4682 = vst.msk [vmem:[%s7751_s23 + $0xc8] sm:$0xff] %vm400_vm1, %v4650_v31 }
 0x49b   : > { %v5248_v10 = vpop.f32.mrb[44].mxu0 }
 0x49c   : > { %v4587_v29 = vadd.f32 %v5248_v10, %v7742_v20  ;;  %v4578_v5 = vpop.f32.mrb[45].mxu0 }
 0x49d   : > { %v4579_v35 = vadd.f32 %v7742_v20, %v4578_v5  ;;  %v5249_v57 = vpop.f32.mrb[46].mxu0 }
 0x49e   : > { %v4623_v19 = vmax.f32 %v4587_v29, 0.0  ;;  %v4590_v45 = vadd.f32 %v5249_v57, %v7742_v20  ;;  %v4581_v6 = vpop.f32.mrb[47].mxu0 }
 0x49f   : > { %v4621_v46 = vmax.f32 %v4579_v35, 0.0  ;;  %v4582_v43 = vadd.f32 %v7742_v20, %v4581_v6 }
 0x4a0   : > { %v4655_v30 = vmin.f32 %v4623_v19, 6.0  ;;  %v4624_v61 = vmax.f32 %v4590_v45, 0.0 }
 0x4a1   : > { %v4653_v17 = vmin.f32 %v4621_v46, 6.0  ;;  %v4622_v53 = vmax.f32 %v4582_v43, 0.0 }
 0x4a2   : > { %4687 = vst.msk [vmem:[%s7751_s23 + $0xf0] sm:$0xff] %vm400_vm1, %v4655_v30  ;;  %v4656_v0 = vmin.f32 %v4624_v61, 6.0 }
 0x4a3   : > { %4685 = vst.msk [vmem:[%s7751_s23 + $0xe0] sm:$0xff] %vm400_vm1, %v4653_v17  ;;  %v4654_v28 = vmin.f32 %v4622_v53, 6.0 }
 0x4a4   : > { %4688 = vst.msk [vmem:[%s7751_s23 + $0xf8] sm:$0xff] %vm400_vm1, %v4656_v0 }
 0x4a5   : > { %4686 = vst.msk [vmem:[%s7751_s23 + $0xe8] sm:$0xff] %vm400_vm1, %v4654_v28 }
 0x4a6 PF: > { %s17_s24 = sadd.s32 1, %s5378_s24  }
 0x4a7   : > { %p14_p4 = scmp.ge.s32.totalorder %s17_s24, 4  }
 0x4a9   :  { %16 = sbr.rel (!%p14_p4) target bundleno = 1 (0x1), region = 80 }

</bundles_post_ra>
